<compile_context>
chip_gen: v7x
topology: tpu7x:2x2x1
jax: 0.10.0
libtpu: 0.0.40
codegen_flags: <defaults>
</compile_context>

<pallas_src>
import jax
import jax.numpy as jnp
from jax.experimental import pallas as pl
from jax.experimental.pallas import tpu as pltpu

# ----- model sizes (small, consistent with a standard NMT encoder/decoder) -----
SRC_VOCAB = 32
TRG_VOCAB = 48
EMBED = 16
HIDDEN = 32
SRC_LEN = 8
TRG_LEN = 8
BATCH = 2

VPAD = 128           # lane-dense padding for hidden state AND vocab (both -> 128)
GPAD = 4 * VPAD      # padded gate width: each gate in its own 128-lane block
NEG = -1e9           # bias on padded vocab lanes (argmax can never pick them)


def _lstm_cell(gates, c):
    """gates: (N, 4*VPAD) with PyTorch gate order [i, f, g, o]; c: (N, VPAD)."""
    i = jax.nn.sigmoid(gates[:, 0 * VPAD:1 * VPAD])
    f = jax.nn.sigmoid(gates[:, 1 * VPAD:2 * VPAD])
    g = jnp.tanh(gates[:, 2 * VPAD:3 * VPAD])
    o = jax.nn.sigmoid(gates[:, 3 * VPAD:4 * VPAD])
    c_new = f * c + i * g
    h_new = o * jnp.tanh(c_new)
    return h_new, c_new


# ---------------------------------------------------------------------------
# Single fused kernel: encoder loop then decoder feedback loop, all in VMEM.
# ---------------------------------------------------------------------------
def seq2seq_kernel(src_gates_ref,   # (SRC_LEN, N, GPAD)   precomputed x_t@Wih + b
                   enc_whh_ref,     # (VPAD, GPAD)
                   tgt_ref,         # (TRG_LEN, N, VPAD)   target one-hots
                   tf_ref,          # SMEM (TRG_LEN,) int32 teacher-forcing flags
                   dec_embp_ref,    # (VPAD, GPAD)         emb@Wih + b table
                   dec_whh_ref,     # (VPAD, GPAD)
                   fcw_ref,         # (VPAD, VPAD)
                   fcb_ref,         # (1, VPAD)
                   logits_ref):     # out: (TRG_LEN-1, N, VPAD)
    n = tgt_ref.shape[1]
    zero = jnp.zeros((n, VPAD), jnp.float32)

    # ---------------- encoder: serial recurrence over SRC_LEN ----------------
    def enc_step(t, carry):
        h, c = carry
        gates = src_gates_ref[t] + jnp.dot(
            h, enc_whh_ref[...], preferred_element_type=jnp.float32)
        return _lstm_cell(gates, c)

    h, c = jax.lax.fori_loop(0, src_gates_ref.shape[0], enc_step, (zero, zero),
                             unroll=True)

    # ---------------- decoder: feedback loop over TRG_LEN-1 ------------------
    steps = logits_ref.shape[0]
    lane = jax.lax.broadcasted_iota(jnp.int32, (n, VPAD), 1)

    def dec_step(s, carry):
        h, c, x = carry
        # one-hot "embedding gather" + input projection as one MXU matmul,
        # plus the recurrent h @ Whh matmul (both gate-block padded, whole-vreg).
        gates = (jnp.dot(x, dec_embp_ref[...], preferred_element_type=jnp.float32)
                 + jnp.dot(h, dec_whh_ref[...], preferred_element_type=jnp.float32))
        h_new, c_new = _lstm_cell(gates, c)

        # lane-dense (N, 128) logits; padded lanes carry a -1e9 bias.
        logits = jnp.dot(h_new, fcw_ref[...],
                         preferred_element_type=jnp.float32) + fcb_ref[...]
        logits_ref[s] = logits          # VMEM-resident output, one HBM writeback

        # argmax (first occurrence, matches torch.argmax) -> one-hot feedback.
        mx = jnp.max(logits, axis=-1, keepdims=True)
        idx = jnp.min(jnp.where(logits == mx, lane, VPAD), axis=-1, keepdims=True)
        best_oh = (lane == idx).astype(jnp.float32)

        # scalar teacher-forcing select (SMEM scalar read, step t = s + 1).
        tf = (tf_ref[s + 1] > 0).astype(jnp.float32)
        x_new = tf * tgt_ref[s + 1] + (1.0 - tf) * best_oh
        return (h_new, c_new, x_new)

    jax.lax.fori_loop(0, steps, dec_step, (h, c, tgt_ref[0]), unroll=True)


def run_seq2seq(src_gates, enc_whh, tgt_onehot, tf, dec_embp, dec_whh, fc_w, fc_b):
    t_len, n, v = tgt_onehot.shape
    steps = t_len - 1
    vmem = pl.BlockSpec(memory_space=pltpu.MemorySpace.VMEM)
    smem = pl.BlockSpec(memory_space=pltpu.MemorySpace.SMEM)
    return pl.pallas_call(
        seq2seq_kernel,
        in_specs=[vmem, vmem, vmem, smem, vmem, vmem, vmem, vmem],
        out_specs=vmem,
        out_shape=jax.ShapeDtypeStruct((steps, n, v), jnp.float32),
    )(src_gates, enc_whh, tgt_onehot, tf, dec_embp, dec_whh, fc_w, fc_b)


# ---------------------------------------------------------------------------
# Parameters (deterministic synthetic init)
# ---------------------------------------------------------------------------
def init_params(key):
    ks = jax.random.split(key, 10)
    u = lambda k, shape, s=0.1: jax.random.uniform(k, shape, jnp.float32, -s, s)
    return dict(
        enc_emb=u(ks[0], (SRC_VOCAB, EMBED)),
        enc_wih=u(ks[1], (EMBED, 4 * HIDDEN)),
        enc_whh=u(ks[2], (HIDDEN, 4 * HIDDEN)),
        enc_b=u(ks[3], (1, 4 * HIDDEN)),          # b_ih + b_hh fused
        dec_emb=u(ks[4], (TRG_VOCAB, EMBED)),
        dec_wih=u(ks[5], (EMBED, 4 * HIDDEN)),
        dec_whh=u(ks[6], (HIDDEN, 4 * HIDDEN)),
        dec_b=u(ks[7], (1, 4 * HIDDEN)),
        fc_w=u(ks[8], (HIDDEN, TRG_VOCAB)),
        fc_b=u(ks[9], (1, TRG_VOCAB)),
    )


def _pad_gate_cols(w, h=HIDDEN, vpad=VPAD):
    """(R, 4*h) -> (R, 4*vpad): gate k moves to columns [k*vpad, k*vpad + h)."""
    out = jnp.zeros((w.shape[0], 4 * vpad), w.dtype)
    for k in range(4):
        out = out.at[:, k * vpad:k * vpad + h].set(w[:, k * h:(k + 1) * h])
    return out


def _pad_rows(w, rows=VPAD):
    out = jnp.zeros((rows,) + w.shape[1:], w.dtype)
    return out.at[:w.shape[0]].set(w)


# ---------------------------------------------------------------------------
# Seq2Seq forward (matches the PyTorch module's semantics)
# ---------------------------------------------------------------------------
def seq2seq_forward(params, source, target, tf_key, teacher_forcing_ratio=0.5):
    trg_len, n = target.shape

    # ---- one-time per-call precompute (XLA glue: gathers + tiny matmuls) ----
    # Encoder: batch the time-independent input projection x_t @ Wih + b over all
    # steps; gate-block pad so each gate occupies its own 128-lane block.
    enc_proj = params['enc_emb'] @ _pad_gate_cols(params['enc_wih']) \
        + _pad_gate_cols(params['enc_b'])                              # (SRC_VOCAB, GPAD)
    src_gates = enc_proj[source]                                       # (SRC_LEN, N, GPAD)
    enc_whh = _pad_rows(_pad_gate_cols(params['enc_whh']))             # (VPAD, GPAD)

    # Decoder: fold embedding lookup + input projection + bias into one table,
    # padded on the vocab axis so the one-hot feedback matmul is lane-aligned.
    dec_proj = params['dec_emb'] @ _pad_gate_cols(params['dec_wih']) \
        + _pad_gate_cols(params['dec_b'])                              # (TRG_VOCAB, GPAD)
    dec_embp = _pad_rows(dec_proj)                                     # (VPAD, GPAD)
    dec_whh = _pad_rows(_pad_gate_cols(params['dec_whh']))             # (VPAD, GPAD)

    # Vocab projection, lane-dense padded; padded lanes get -1e9 bias (argmax-safe).
    fc_w = jnp.zeros((VPAD, VPAD), jnp.float32).at[:HIDDEN, :TRG_VOCAB].set(params['fc_w'])
    fc_b = jnp.full((1, VPAD), NEG, jnp.float32).at[:, :TRG_VOCAB].set(params['fc_b'])

    tgt_onehot = jax.nn.one_hot(target, VPAD, dtype=jnp.float32)       # (TRG_LEN, N, VPAD)

    # Deterministic stand-in for the per-step Python random.random() draw.
    # TODO(synk): the PyTorch module draws an independent Python random per step;
    # here the per-step flags come from a single JAX key (semantically deterministic).
    tf = (jax.random.uniform(tf_key, (trg_len,)) <
          teacher_forcing_ratio).astype(jnp.int32)                     # (TRG_LEN,) SMEM scalars

    # ---- single fused Pallas call: encoder + decoder feedback loop ----
    logits = run_seq2seq(src_gates, enc_whh, tgt_onehot, tf,
                         dec_embp, dec_whh, fc_w, fc_b)                # (TRG_LEN-1, N, VPAD)

    out0 = jnp.zeros((1, n, TRG_VOCAB), jnp.float32)   # outputs[0] stays zero (as in torch)
    return jnp.concatenate([out0, logits[:, :, :TRG_VOCAB]], axis=0)   # (TRG_LEN, N, V)


if __name__ == "__main__":
    key = jax.random.PRNGKey(0)
    k_param, k_src, k_trg, k_tf = jax.random.split(key, 4)

    params = init_params(k_param)
    source = jax.random.randint(k_src, (SRC_LEN, BATCH), 0, SRC_VOCAB, dtype=jnp.int32)
    target = jax.random.randint(k_trg, (TRG_LEN, BATCH), 0, TRG_VOCAB, dtype=jnp.int32)

    fwd = jax.jit(lambda p, s, t, k: seq2seq_forward(p, s, t, k, 0.5))
    out = jax.block_until_ready(fwd(params, source, target, k_tf))

    assert out.shape == (TRG_LEN, BATCH, TRG_VOCAB)
    assert bool(jnp.all(jnp.isfinite(out)))
    print("KERNEL_OK")
</pallas_src>

<mosaic_0001>
module attributes {stable_mosaic.version = 11 : i64} {
  func.func @seq2seq_kernel(%arg0: memref<8x2x512xf32, #tpu.memory_space<vmem>>, %arg1: memref<128x512xf32, #tpu.memory_space<vmem>>, %arg2: memref<8x2x128xf32, #tpu.memory_space<vmem>>, %arg3: memref<8xi32, #tpu.memory_space<smem>>, %arg4: memref<128x512xf32, #tpu.memory_space<vmem>>, %arg5: memref<128x512xf32, #tpu.memory_space<vmem>>, %arg6: memref<128x128xf32, #tpu.memory_space<vmem>>, %arg7: memref<1x128xf32, #tpu.memory_space<vmem>>, %arg8: memref<7x2x128xf32, #tpu.memory_space<vmem>>) attributes {dimension_semantics = [], scalar_prefetch = 0 : i64, scratch_operands = 0 : i64, tpu.core_type = #tpu.core_type<tc>} {
    %cst = arith.constant 0.000000e+00 : f32
    %0 = vector.broadcast %cst : f32 to vector<2x128xf32>
    %c0_i32 = arith.constant 0 : i32
    %1 = arith.index_cast %c0_i32 : i32 to index
    %c0 = arith.constant 0 : index
    %c0_0 = arith.constant 0 : index
    %2 = vector.load %arg0[%1, %c0, %c0_0] : memref<8x2x512xf32, #tpu.memory_space<vmem>>, vector<1x2x512xf32>
    %3 = vector.shape_cast %2 : vector<1x2x512xf32> to vector<2x512xf32>
    %c0_1 = arith.constant 0 : index
    %c0_2 = arith.constant 0 : index
    %4 = vector.load %arg1[%c0_1, %c0_2] : memref<128x512xf32, #tpu.memory_space<vmem>>, vector<128x512xf32>
    %cst_3 = arith.constant dense<0.000000e+00> : vector<2x512xf32>
    %5 = tpu.matmul %0, %4, %cst_3 {dimension_numbers = #tpu.dot_dimension_numbers<[1], [0], [0], [1], [0, 0, 1, 1], [], []>} : vector<2x128xf32>, vector<128x512xf32>, vector<2x512xf32> -> vector<2x512xf32>
    %6 = arith.addf %3, %5 : vector<2x512xf32>
    %7 = vector.extract_strided_slice %6 {offsets = [0, 0], sizes = [2, 128], strides = [1, 1]} : vector<2x512xf32> to vector<2x128xf32>
    %8 = arith.negf %7 : vector<2x128xf32>
    %9 = math.exp %8 : vector<2x128xf32>
    %cst_4 = arith.constant 1.000000e+00 : f32
    %10 = vector.broadcast %cst_4 : f32 to vector<2x128xf32>
    %11 = arith.addf %10, %9 : vector<2x128xf32>
    %12 = arith.divf %10, %11 : vector<2x128xf32>
    %13 = vector.extract_strided_slice %6 {offsets = [0, 128], sizes = [2, 128], strides = [1, 1]} : vector<2x512xf32> to vector<2x128xf32>
    %14 = arith.negf %13 : vector<2x128xf32>
    %15 = math.exp %14 : vector<2x128xf32>
    %cst_5 = arith.constant 1.000000e+00 : f32
    %16 = vector.broadcast %cst_5 : f32 to vector<2x128xf32>
    %17 = arith.addf %16, %15 : vector<2x128xf32>
    %18 = arith.divf %16, %17 : vector<2x128xf32>
    %19 = vector.extract_strided_slice %6 {offsets = [0, 256], sizes = [2, 128], strides = [1, 1]} : vector<2x512xf32> to vector<2x128xf32>
    %20 = math.tanh %19 : vector<2x128xf32>
    %21 = vector.extract_strided_slice %6 {offsets = [0, 384], sizes = [2, 128], strides = [1, 1]} : vector<2x512xf32> to vector<2x128xf32>
    %22 = arith.negf %21 : vector<2x128xf32>
    %23 = math.exp %22 : vector<2x128xf32>
    %cst_6 = arith.constant 1.000000e+00 : f32
    %24 = vector.broadcast %cst_6 : f32 to vector<2x128xf32>
    %25 = arith.addf %24, %23 : vector<2x128xf32>
    %26 = arith.divf %24, %25 : vector<2x128xf32>
    %27 = arith.mulf %18, %0 : vector<2x128xf32>
    %28 = arith.mulf %12, %20 : vector<2x128xf32>
    %29 = arith.addf %27, %28 : vector<2x128xf32>
    %30 = math.tanh %29 : vector<2x128xf32>
    %31 = arith.mulf %26, %30 : vector<2x128xf32>
    %c1_i32 = arith.constant 1 : i32
    %32 = arith.index_cast %c1_i32 : i32 to index
    %c0_7 = arith.constant 0 : index
    %c0_8 = arith.constant 0 : index
    %33 = vector.load %arg0[%32, %c0_7, %c0_8] : memref<8x2x512xf32, #tpu.memory_space<vmem>>, vector<1x2x512xf32>
    %34 = vector.shape_cast %33 : vector<1x2x512xf32> to vector<2x512xf32>
    %c0_9 = arith.constant 0 : index
    %c0_10 = arith.constant 0 : index
    %35 = vector.load %arg1[%c0_9, %c0_10] : memref<128x512xf32, #tpu.memory_space<vmem>>, vector<128x512xf32>
    %cst_11 = arith.constant dense<0.000000e+00> : vector<2x512xf32>
    %36 = tpu.matmul %31, %35, %cst_11 {dimension_numbers = #tpu.dot_dimension_numbers<[1], [0], [0], [1], [0, 0, 1, 1], [], []>} : vector<2x128xf32>, vector<128x512xf32>, vector<2x512xf32> -> vector<2x512xf32>
    %37 = arith.addf %34, %36 : vector<2x512xf32>
    %38 = vector.extract_strided_slice %37 {offsets = [0, 0], sizes = [2, 128], strides = [1, 1]} : vector<2x512xf32> to vector<2x128xf32>
    %39 = arith.negf %38 : vector<2x128xf32>
    %40 = math.exp %39 : vector<2x128xf32>
    %cst_12 = arith.constant 1.000000e+00 : f32
    %41 = vector.broadcast %cst_12 : f32 to vector<2x128xf32>
    %42 = arith.addf %41, %40 : vector<2x128xf32>
    %43 = arith.divf %41, %42 : vector<2x128xf32>
    %44 = vector.extract_strided_slice %37 {offsets = [0, 128], sizes = [2, 128], strides = [1, 1]} : vector<2x512xf32> to vector<2x128xf32>
    %45 = arith.negf %44 : vector<2x128xf32>
    %46 = math.exp %45 : vector<2x128xf32>
    %cst_13 = arith.constant 1.000000e+00 : f32
    %47 = vector.broadcast %cst_13 : f32 to vector<2x128xf32>
    %48 = arith.addf %47, %46 : vector<2x128xf32>
    %49 = arith.divf %47, %48 : vector<2x128xf32>
    %50 = vector.extract_strided_slice %37 {offsets = [0, 256], sizes = [2, 128], strides = [1, 1]} : vector<2x512xf32> to vector<2x128xf32>
    %51 = math.tanh %50 : vector<2x128xf32>
    %52 = vector.extract_strided_slice %37 {offsets = [0, 384], sizes = [2, 128], strides = [1, 1]} : vector<2x512xf32> to vector<2x128xf32>
    %53 = arith.negf %52 : vector<2x128xf32>
    %54 = math.exp %53 : vector<2x128xf32>
    %cst_14 = arith.constant 1.000000e+00 : f32
    %55 = vector.broadcast %cst_14 : f32 to vector<2x128xf32>
    %56 = arith.addf %55, %54 : vector<2x128xf32>
    %57 = arith.divf %55, %56 : vector<2x128xf32>
    %58 = arith.mulf %49, %29 : vector<2x128xf32>
    %59 = arith.mulf %43, %51 : vector<2x128xf32>
    %60 = arith.addf %58, %59 : vector<2x128xf32>
    %61 = math.tanh %60 : vector<2x128xf32>
    %62 = arith.mulf %57, %61 : vector<2x128xf32>
    %c2_i32 = arith.constant 2 : i32
    %63 = arith.index_cast %c2_i32 : i32 to index
    %c0_15 = arith.constant 0 : index
    %c0_16 = arith.constant 0 : index
    %64 = vector.load %arg0[%63, %c0_15, %c0_16] : memref<8x2x512xf32, #tpu.memory_space<vmem>>, vector<1x2x512xf32>
    %65 = vector.shape_cast %64 : vector<1x2x512xf32> to vector<2x512xf32>
    %c0_17 = arith.constant 0 : index
    %c0_18 = arith.constant 0 : index
    %66 = vector.load %arg1[%c0_17, %c0_18] : memref<128x512xf32, #tpu.memory_space<vmem>>, vector<128x512xf32>
    %cst_19 = arith.constant dense<0.000000e+00> : vector<2x512xf32>
    %67 = tpu.matmul %62, %66, %cst_19 {dimension_numbers = #tpu.dot_dimension_numbers<[1], [0], [0], [1], [0, 0, 1, 1], [], []>} : vector<2x128xf32>, vector<128x512xf32>, vector<2x512xf32> -> vector<2x512xf32>
    %68 = arith.addf %65, %67 : vector<2x512xf32>
    %69 = vector.extract_strided_slice %68 {offsets = [0, 0], sizes = [2, 128], strides = [1, 1]} : vector<2x512xf32> to vector<2x128xf32>
    %70 = arith.negf %69 : vector<2x128xf32>
    %71 = math.exp %70 : vector<2x128xf32>
    %cst_20 = arith.constant 1.000000e+00 : f32
    %72 = vector.broadcast %cst_20 : f32 to vector<2x128xf32>
    %73 = arith.addf %72, %71 : vector<2x128xf32>
    %74 = arith.divf %72, %73 : vector<2x128xf32>
    %75 = vector.extract_strided_slice %68 {offsets = [0, 128], sizes = [2, 128], strides = [1, 1]} : vector<2x512xf32> to vector<2x128xf32>
    %76 = arith.negf %75 : vector<2x128xf32>
    %77 = math.exp %76 : vector<2x128xf32>
    %cst_21 = arith.constant 1.000000e+00 : f32
    %78 = vector.broadcast %cst_21 : f32 to vector<2x128xf32>
    %79 = arith.addf %78, %77 : vector<2x128xf32>
    %80 = arith.divf %78, %79 : vector<2x128xf32>
    %81 = vector.extract_strided_slice %68 {offsets = [0, 256], sizes = [2, 128], strides = [1, 1]} : vector<2x512xf32> to vector<2x128xf32>
    %82 = math.tanh %81 : vector<2x128xf32>
    %83 = vector.extract_strided_slice %68 {offsets = [0, 384], sizes = [2, 128], strides = [1, 1]} : vector<2x512xf32> to vector<2x128xf32>
    %84 = arith.negf %83 : vector<2x128xf32>
    %85 = math.exp %84 : vector<2x128xf32>
    %cst_22 = arith.constant 1.000000e+00 : f32
    %86 = vector.broadcast %cst_22 : f32 to vector<2x128xf32>
    %87 = arith.addf %86, %85 : vector<2x128xf32>
    %88 = arith.divf %86, %87 : vector<2x128xf32>
    %89 = arith.mulf %80, %60 : vector<2x128xf32>
    %90 = arith.mulf %74, %82 : vector<2x128xf32>
    %91 = arith.addf %89, %90 : vector<2x128xf32>
    %92 = math.tanh %91 : vector<2x128xf32>
    %93 = arith.mulf %88, %92 : vector<2x128xf32>
    %c3_i32 = arith.constant 3 : i32
    %94 = arith.index_cast %c3_i32 : i32 to index
    %c0_23 = arith.constant 0 : index
    %c0_24 = arith.constant 0 : index
    %95 = vector.load %arg0[%94, %c0_23, %c0_24] : memref<8x2x512xf32, #tpu.memory_space<vmem>>, vector<1x2x512xf32>
    %96 = vector.shape_cast %95 : vector<1x2x512xf32> to vector<2x512xf32>
    %c0_25 = arith.constant 0 : index
    %c0_26 = arith.constant 0 : index
    %97 = vector.load %arg1[%c0_25, %c0_26] : memref<128x512xf32, #tpu.memory_space<vmem>>, vector<128x512xf32>
    %cst_27 = arith.constant dense<0.000000e+00> : vector<2x512xf32>
    %98 = tpu.matmul %93, %97, %cst_27 {dimension_numbers = #tpu.dot_dimension_numbers<[1], [0], [0], [1], [0, 0, 1, 1], [], []>} : vector<2x128xf32>, vector<128x512xf32>, vector<2x512xf32> -> vector<2x512xf32>
    %99 = arith.addf %96, %98 : vector<2x512xf32>
    %100 = vector.extract_strided_slice %99 {offsets = [0, 0], sizes = [2, 128], strides = [1, 1]} : vector<2x512xf32> to vector<2x128xf32>
    %101 = arith.negf %100 : vector<2x128xf32>
    %102 = math.exp %101 : vector<2x128xf32>
    %cst_28 = arith.constant 1.000000e+00 : f32
    %103 = vector.broadcast %cst_28 : f32 to vector<2x128xf32>
    %104 = arith.addf %103, %102 : vector<2x128xf32>
    %105 = arith.divf %103, %104 : vector<2x128xf32>
    %106 = vector.extract_strided_slice %99 {offsets = [0, 128], sizes = [2, 128], strides = [1, 1]} : vector<2x512xf32> to vector<2x128xf32>
    %107 = arith.negf %106 : vector<2x128xf32>
    %108 = math.exp %107 : vector<2x128xf32>
    %cst_29 = arith.constant 1.000000e+00 : f32
    %109 = vector.broadcast %cst_29 : f32 to vector<2x128xf32>
    %110 = arith.addf %109, %108 : vector<2x128xf32>
    %111 = arith.divf %109, %110 : vector<2x128xf32>
    %112 = vector.extract_strided_slice %99 {offsets = [0, 256], sizes = [2, 128], strides = [1, 1]} : vector<2x512xf32> to vector<2x128xf32>
    %113 = math.tanh %112 : vector<2x128xf32>
    %114 = vector.extract_strided_slice %99 {offsets = [0, 384], sizes = [2, 128], strides = [1, 1]} : vector<2x512xf32> to vector<2x128xf32>
    %115 = arith.negf %114 : vector<2x128xf32>
    %116 = math.exp %115 : vector<2x128xf32>
    %cst_30 = arith.constant 1.000000e+00 : f32
    %117 = vector.broadcast %cst_30 : f32 to vector<2x128xf32>
    %118 = arith.addf %117, %116 : vector<2x128xf32>
    %119 = arith.divf %117, %118 : vector<2x128xf32>
    %120 = arith.mulf %111, %91 : vector<2x128xf32>
    %121 = arith.mulf %105, %113 : vector<2x128xf32>
    %122 = arith.addf %120, %121 : vector<2x128xf32>
    %123 = math.tanh %122 : vector<2x128xf32>
    %124 = arith.mulf %119, %123 : vector<2x128xf32>
    %c4_i32 = arith.constant 4 : i32
    %125 = arith.index_cast %c4_i32 : i32 to index
    %c0_31 = arith.constant 0 : index
    %c0_32 = arith.constant 0 : index
    %126 = vector.load %arg0[%125, %c0_31, %c0_32] : memref<8x2x512xf32, #tpu.memory_space<vmem>>, vector<1x2x512xf32>
    %127 = vector.shape_cast %126 : vector<1x2x512xf32> to vector<2x512xf32>
    %c0_33 = arith.constant 0 : index
    %c0_34 = arith.constant 0 : index
    %128 = vector.load %arg1[%c0_33, %c0_34] : memref<128x512xf32, #tpu.memory_space<vmem>>, vector<128x512xf32>
    %cst_35 = arith.constant dense<0.000000e+00> : vector<2x512xf32>
    %129 = tpu.matmul %124, %128, %cst_35 {dimension_numbers = #tpu.dot_dimension_numbers<[1], [0], [0], [1], [0, 0, 1, 1], [], []>} : vector<2x128xf32>, vector<128x512xf32>, vector<2x512xf32> -> vector<2x512xf32>
    %130 = arith.addf %127, %129 : vector<2x512xf32>
    %131 = vector.extract_strided_slice %130 {offsets = [0, 0], sizes = [2, 128], strides = [1, 1]} : vector<2x512xf32> to vector<2x128xf32>
    %132 = arith.negf %131 : vector<2x128xf32>
    %133 = math.exp %132 : vector<2x128xf32>
    %cst_36 = arith.constant 1.000000e+00 : f32
    %134 = vector.broadcast %cst_36 : f32 to vector<2x128xf32>
    %135 = arith.addf %134, %133 : vector<2x128xf32>
    %136 = arith.divf %134, %135 : vector<2x128xf32>
    %137 = vector.extract_strided_slice %130 {offsets = [0, 128], sizes = [2, 128], strides = [1, 1]} : vector<2x512xf32> to vector<2x128xf32>
    %138 = arith.negf %137 : vector<2x128xf32>
    %139 = math.exp %138 : vector<2x128xf32>
    %cst_37 = arith.constant 1.000000e+00 : f32
    %140 = vector.broadcast %cst_37 : f32 to vector<2x128xf32>
    %141 = arith.addf %140, %139 : vector<2x128xf32>
    %142 = arith.divf %140, %141 : vector<2x128xf32>
    %143 = vector.extract_strided_slice %130 {offsets = [0, 256], sizes = [2, 128], strides = [1, 1]} : vector<2x512xf32> to vector<2x128xf32>
    %144 = math.tanh %143 : vector<2x128xf32>
    %145 = vector.extract_strided_slice %130 {offsets = [0, 384], sizes = [2, 128], strides = [1, 1]} : vector<2x512xf32> to vector<2x128xf32>
    %146 = arith.negf %145 : vector<2x128xf32>
    %147 = math.exp %146 : vector<2x128xf32>
    %cst_38 = arith.constant 1.000000e+00 : f32
    %148 = vector.broadcast %cst_38 : f32 to vector<2x128xf32>
    %149 = arith.addf %148, %147 : vector<2x128xf32>
    %150 = arith.divf %148, %149 : vector<2x128xf32>
    %151 = arith.mulf %142, %122 : vector<2x128xf32>
    %152 = arith.mulf %136, %144 : vector<2x128xf32>
    %153 = arith.addf %151, %152 : vector<2x128xf32>
    %154 = math.tanh %153 : vector<2x128xf32>
    %155 = arith.mulf %150, %154 : vector<2x128xf32>
    %c5_i32 = arith.constant 5 : i32
    %156 = arith.index_cast %c5_i32 : i32 to index
    %c0_39 = arith.constant 0 : index
    %c0_40 = arith.constant 0 : index
    %157 = vector.load %arg0[%156, %c0_39, %c0_40] : memref<8x2x512xf32, #tpu.memory_space<vmem>>, vector<1x2x512xf32>
    %158 = vector.shape_cast %157 : vector<1x2x512xf32> to vector<2x512xf32>
    %c0_41 = arith.constant 0 : index
    %c0_42 = arith.constant 0 : index
    %159 = vector.load %arg1[%c0_41, %c0_42] : memref<128x512xf32, #tpu.memory_space<vmem>>, vector<128x512xf32>
    %cst_43 = arith.constant dense<0.000000e+00> : vector<2x512xf32>
    %160 = tpu.matmul %155, %159, %cst_43 {dimension_numbers = #tpu.dot_dimension_numbers<[1], [0], [0], [1], [0, 0, 1, 1], [], []>} : vector<2x128xf32>, vector<128x512xf32>, vector<2x512xf32> -> vector<2x512xf32>
    %161 = arith.addf %158, %160 : vector<2x512xf32>
    %162 = vector.extract_strided_slice %161 {offsets = [0, 0], sizes = [2, 128], strides = [1, 1]} : vector<2x512xf32> to vector<2x128xf32>
    %163 = arith.negf %162 : vector<2x128xf32>
    %164 = math.exp %163 : vector<2x128xf32>
    %cst_44 = arith.constant 1.000000e+00 : f32
    %165 = vector.broadcast %cst_44 : f32 to vector<2x128xf32>
    %166 = arith.addf %165, %164 : vector<2x128xf32>
    %167 = arith.divf %165, %166 : vector<2x128xf32>
    %168 = vector.extract_strided_slice %161 {offsets = [0, 128], sizes = [2, 128], strides = [1, 1]} : vector<2x512xf32> to vector<2x128xf32>
    %169 = arith.negf %168 : vector<2x128xf32>
    %170 = math.exp %169 : vector<2x128xf32>
    %cst_45 = arith.constant 1.000000e+00 : f32
    %171 = vector.broadcast %cst_45 : f32 to vector<2x128xf32>
    %172 = arith.addf %171, %170 : vector<2x128xf32>
    %173 = arith.divf %171, %172 : vector<2x128xf32>
    %174 = vector.extract_strided_slice %161 {offsets = [0, 256], sizes = [2, 128], strides = [1, 1]} : vector<2x512xf32> to vector<2x128xf32>
    %175 = math.tanh %174 : vector<2x128xf32>
    %176 = vector.extract_strided_slice %161 {offsets = [0, 384], sizes = [2, 128], strides = [1, 1]} : vector<2x512xf32> to vector<2x128xf32>
    %177 = arith.negf %176 : vector<2x128xf32>
    %178 = math.exp %177 : vector<2x128xf32>
    %cst_46 = arith.constant 1.000000e+00 : f32
    %179 = vector.broadcast %cst_46 : f32 to vector<2x128xf32>
    %180 = arith.addf %179, %178 : vector<2x128xf32>
    %181 = arith.divf %179, %180 : vector<2x128xf32>
    %182 = arith.mulf %173, %153 : vector<2x128xf32>
    %183 = arith.mulf %167, %175 : vector<2x128xf32>
    %184 = arith.addf %182, %183 : vector<2x128xf32>
    %185 = math.tanh %184 : vector<2x128xf32>
    %186 = arith.mulf %181, %185 : vector<2x128xf32>
    %c6_i32 = arith.constant 6 : i32
    %187 = arith.index_cast %c6_i32 : i32 to index
    %c0_47 = arith.constant 0 : index
    %c0_48 = arith.constant 0 : index
    %188 = vector.load %arg0[%187, %c0_47, %c0_48] : memref<8x2x512xf32, #tpu.memory_space<vmem>>, vector<1x2x512xf32>
    %189 = vector.shape_cast %188 : vector<1x2x512xf32> to vector<2x512xf32>
    %c0_49 = arith.constant 0 : index
    %c0_50 = arith.constant 0 : index
    %190 = vector.load %arg1[%c0_49, %c0_50] : memref<128x512xf32, #tpu.memory_space<vmem>>, vector<128x512xf32>
    %cst_51 = arith.constant dense<0.000000e+00> : vector<2x512xf32>
    %191 = tpu.matmul %186, %190, %cst_51 {dimension_numbers = #tpu.dot_dimension_numbers<[1], [0], [0], [1], [0, 0, 1, 1], [], []>} : vector<2x128xf32>, vector<128x512xf32>, vector<2x512xf32> -> vector<2x512xf32>
    %192 = arith.addf %189, %191 : vector<2x512xf32>
    %193 = vector.extract_strided_slice %192 {offsets = [0, 0], sizes = [2, 128], strides = [1, 1]} : vector<2x512xf32> to vector<2x128xf32>
    %194 = arith.negf %193 : vector<2x128xf32>
    %195 = math.exp %194 : vector<2x128xf32>
    %cst_52 = arith.constant 1.000000e+00 : f32
    %196 = vector.broadcast %cst_52 : f32 to vector<2x128xf32>
    %197 = arith.addf %196, %195 : vector<2x128xf32>
    %198 = arith.divf %196, %197 : vector<2x128xf32>
    %199 = vector.extract_strided_slice %192 {offsets = [0, 128], sizes = [2, 128], strides = [1, 1]} : vector<2x512xf32> to vector<2x128xf32>
    %200 = arith.negf %199 : vector<2x128xf32>
    %201 = math.exp %200 : vector<2x128xf32>
    %cst_53 = arith.constant 1.000000e+00 : f32
    %202 = vector.broadcast %cst_53 : f32 to vector<2x128xf32>
    %203 = arith.addf %202, %201 : vector<2x128xf32>
    %204 = arith.divf %202, %203 : vector<2x128xf32>
    %205 = vector.extract_strided_slice %192 {offsets = [0, 256], sizes = [2, 128], strides = [1, 1]} : vector<2x512xf32> to vector<2x128xf32>
    %206 = math.tanh %205 : vector<2x128xf32>
    %207 = vector.extract_strided_slice %192 {offsets = [0, 384], sizes = [2, 128], strides = [1, 1]} : vector<2x512xf32> to vector<2x128xf32>
    %208 = arith.negf %207 : vector<2x128xf32>
    %209 = math.exp %208 : vector<2x128xf32>
    %cst_54 = arith.constant 1.000000e+00 : f32
    %210 = vector.broadcast %cst_54 : f32 to vector<2x128xf32>
    %211 = arith.addf %210, %209 : vector<2x128xf32>
    %212 = arith.divf %210, %211 : vector<2x128xf32>
    %213 = arith.mulf %204, %184 : vector<2x128xf32>
    %214 = arith.mulf %198, %206 : vector<2x128xf32>
    %215 = arith.addf %213, %214 : vector<2x128xf32>
    %216 = math.tanh %215 : vector<2x128xf32>
    %217 = arith.mulf %212, %216 : vector<2x128xf32>
    %c7_i32 = arith.constant 7 : i32
    %218 = arith.index_cast %c7_i32 : i32 to index
    %c0_55 = arith.constant 0 : index
    %c0_56 = arith.constant 0 : index
    %219 = vector.load %arg0[%218, %c0_55, %c0_56] : memref<8x2x512xf32, #tpu.memory_space<vmem>>, vector<1x2x512xf32>
    %220 = vector.shape_cast %219 : vector<1x2x512xf32> to vector<2x512xf32>
    %c0_57 = arith.constant 0 : index
    %c0_58 = arith.constant 0 : index
    %221 = vector.load %arg1[%c0_57, %c0_58] : memref<128x512xf32, #tpu.memory_space<vmem>>, vector<128x512xf32>
    %cst_59 = arith.constant dense<0.000000e+00> : vector<2x512xf32>
    %222 = tpu.matmul %217, %221, %cst_59 {dimension_numbers = #tpu.dot_dimension_numbers<[1], [0], [0], [1], [0, 0, 1, 1], [], []>} : vector<2x128xf32>, vector<128x512xf32>, vector<2x512xf32> -> vector<2x512xf32>
    %223 = arith.addf %220, %222 : vector<2x512xf32>
    %224 = vector.extract_strided_slice %223 {offsets = [0, 0], sizes = [2, 128], strides = [1, 1]} : vector<2x512xf32> to vector<2x128xf32>
    %225 = arith.negf %224 : vector<2x128xf32>
    %226 = math.exp %225 : vector<2x128xf32>
    %cst_60 = arith.constant 1.000000e+00 : f32
    %227 = vector.broadcast %cst_60 : f32 to vector<2x128xf32>
    %228 = arith.addf %227, %226 : vector<2x128xf32>
    %229 = arith.divf %227, %228 : vector<2x128xf32>
    %230 = vector.extract_strided_slice %223 {offsets = [0, 128], sizes = [2, 128], strides = [1, 1]} : vector<2x512xf32> to vector<2x128xf32>
    %231 = arith.negf %230 : vector<2x128xf32>
    %232 = math.exp %231 : vector<2x128xf32>
    %cst_61 = arith.constant 1.000000e+00 : f32
    %233 = vector.broadcast %cst_61 : f32 to vector<2x128xf32>
    %234 = arith.addf %233, %232 : vector<2x128xf32>
    %235 = arith.divf %233, %234 : vector<2x128xf32>
    %236 = vector.extract_strided_slice %223 {offsets = [0, 256], sizes = [2, 128], strides = [1, 1]} : vector<2x512xf32> to vector<2x128xf32>
    %237 = math.tanh %236 : vector<2x128xf32>
    %238 = vector.extract_strided_slice %223 {offsets = [0, 384], sizes = [2, 128], strides = [1, 1]} : vector<2x512xf32> to vector<2x128xf32>
    %239 = arith.negf %238 : vector<2x128xf32>
    %240 = math.exp %239 : vector<2x128xf32>
    %cst_62 = arith.constant 1.000000e+00 : f32
    %241 = vector.broadcast %cst_62 : f32 to vector<2x128xf32>
    %242 = arith.addf %241, %240 : vector<2x128xf32>
    %243 = arith.divf %241, %242 : vector<2x128xf32>
    %244 = arith.mulf %235, %215 : vector<2x128xf32>
    %245 = arith.mulf %229, %237 : vector<2x128xf32>
    %246 = arith.addf %244, %245 : vector<2x128xf32>
    %247 = math.tanh %246 : vector<2x128xf32>
    %248 = arith.mulf %243, %247 : vector<2x128xf32>
    %c8_i32 = arith.constant 8 : i32
    %249 = tpu.iota {dimensions = array<i32: 1>} : vector<2x128xi32>
    %c0_63 = arith.constant 0 : index
    %c0_64 = arith.constant 0 : index
    %c0_65 = arith.constant 0 : index
    %250 = vector.load %arg2[%c0_63, %c0_64, %c0_65] : memref<8x2x128xf32, #tpu.memory_space<vmem>>, vector<1x2x128xf32>
    %251 = vector.shape_cast %250 : vector<1x2x128xf32> to vector<2x128xf32>
    %c0_i32_66 = arith.constant 0 : i32
    %c0_67 = arith.constant 0 : index
    %c0_68 = arith.constant 0 : index
    %252 = vector.load %arg4[%c0_67, %c0_68] : memref<128x512xf32, #tpu.memory_space<vmem>>, vector<128x512xf32>
    %cst_69 = arith.constant dense<0.000000e+00> : vector<2x512xf32>
    %253 = tpu.matmul %251, %252, %cst_69 {dimension_numbers = #tpu.dot_dimension_numbers<[1], [0], [0], [1], [0, 0, 1, 1], [], []>} : vector<2x128xf32>, vector<128x512xf32>, vector<2x512xf32> -> vector<2x512xf32>
    %c0_70 = arith.constant 0 : index
    %c0_71 = arith.constant 0 : index
    %254 = vector.load %arg5[%c0_70, %c0_71] : memref<128x512xf32, #tpu.memory_space<vmem>>, vector<128x512xf32>
    %cst_72 = arith.constant dense<0.000000e+00> : vector<2x512xf32>
    %255 = tpu.matmul %248, %254, %cst_72 {dimension_numbers = #tpu.dot_dimension_numbers<[1], [0], [0], [1], [0, 0, 1, 1], [], []>} : vector<2x128xf32>, vector<128x512xf32>, vector<2x512xf32> -> vector<2x512xf32>
    %256 = arith.addf %253, %255 : vector<2x512xf32>
    %257 = vector.extract_strided_slice %256 {offsets = [0, 0], sizes = [2, 128], strides = [1, 1]} : vector<2x512xf32> to vector<2x128xf32>
    %258 = arith.negf %257 : vector<2x128xf32>
    %259 = math.exp %258 : vector<2x128xf32>
    %cst_73 = arith.constant 1.000000e+00 : f32
    %260 = vector.broadcast %cst_73 : f32 to vector<2x128xf32>
    %261 = arith.addf %260, %259 : vector<2x128xf32>
    %262 = arith.divf %260, %261 : vector<2x128xf32>
    %263 = vector.extract_strided_slice %256 {offsets = [0, 128], sizes = [2, 128], strides = [1, 1]} : vector<2x512xf32> to vector<2x128xf32>
    %264 = arith.negf %263 : vector<2x128xf32>
    %265 = math.exp %264 : vector<2x128xf32>
    %cst_74 = arith.constant 1.000000e+00 : f32
    %266 = vector.broadcast %cst_74 : f32 to vector<2x128xf32>
    %267 = arith.addf %266, %265 : vector<2x128xf32>
    %268 = arith.divf %266, %267 : vector<2x128xf32>
    %269 = vector.extract_strided_slice %256 {offsets = [0, 256], sizes = [2, 128], strides = [1, 1]} : vector<2x512xf32> to vector<2x128xf32>
    %270 = math.tanh %269 : vector<2x128xf32>
    %271 = vector.extract_strided_slice %256 {offsets = [0, 384], sizes = [2, 128], strides = [1, 1]} : vector<2x512xf32> to vector<2x128xf32>
    %272 = arith.negf %271 : vector<2x128xf32>
    %273 = math.exp %272 : vector<2x128xf32>
    %cst_75 = arith.constant 1.000000e+00 : f32
    %274 = vector.broadcast %cst_75 : f32 to vector<2x128xf32>
    %275 = arith.addf %274, %273 : vector<2x128xf32>
    %276 = arith.divf %274, %275 : vector<2x128xf32>
    %277 = arith.mulf %268, %246 : vector<2x128xf32>
    %278 = arith.mulf %262, %270 : vector<2x128xf32>
    %279 = arith.addf %277, %278 : vector<2x128xf32>
    %280 = math.tanh %279 : vector<2x128xf32>
    %281 = arith.mulf %276, %280 : vector<2x128xf32>
    %c0_76 = arith.constant 0 : index
    %c0_77 = arith.constant 0 : index
    %282 = vector.load %arg6[%c0_76, %c0_77] : memref<128x128xf32, #tpu.memory_space<vmem>>, vector<128x128xf32>
    %cst_78 = arith.constant dense<0.000000e+00> : vector<2x128xf32>
    %283 = tpu.matmul %281, %282, %cst_78 {dimension_numbers = #tpu.dot_dimension_numbers<[1], [0], [0], [1], [0, 0, 1, 1], [], []>} : vector<2x128xf32>, vector<128x128xf32>, vector<2x128xf32> -> vector<2x128xf32>
    %c0_79 = arith.constant 0 : index
    %c0_80 = arith.constant 0 : index
    %284 = vector.load %arg7[%c0_79, %c0_80] : memref<1x128xf32, #tpu.memory_space<vmem>>, vector<1x128xf32>
    %285 = vector.broadcast %284 : vector<1x128xf32> to vector<2x128xf32>
    %286 = arith.addf %283, %285 : vector<2x128xf32>
    %287 = arith.index_cast %c0_i32_66 : i32 to index
    %c0_81 = arith.constant 0 : index
    %c0_82 = arith.constant 0 : index
    %288 = vector.load %arg8[%287, %c0_81, %c0_82] : memref<7x2x128xf32, #tpu.memory_space<vmem>>, vector<1x2x128xf32>
    %289 = vector.shape_cast %288 : vector<1x2x128xf32> to vector<2x128xf32>
    %290 = vector.shape_cast %286 : vector<2x128xf32> to vector<1x2x128xf32>
    tpu.vector_store %arg8[%287, %c0_81, %c0_82], %290 {strides = array<i32>} : memref<7x2x128xf32, #tpu.memory_space<vmem>>, vector<1x2x128xf32>,
    %cst_83 = arith.constant dense<0xFF800000> : vector<2xf32>
    %291 = vector.multi_reduction <maximumf>, %286, %cst_83 [1] : vector<2x128xf32> to vector<2xf32>
    %292 = vector.shape_cast %291 : vector<2xf32> to vector<2x1xf32>
    %293 = vector.broadcast %292 : vector<2x1xf32> to vector<2x128xf32>
    %294 = arith.cmpf oeq, %286, %293 : vector<2x128xf32>
    %c128_i32 = arith.constant 128 : i32
    %295 = vector.broadcast %c128_i32 : i32 to vector<2x128xi32>
    %296 = arith.select %294, %249, %295 : vector<2x128xi1>, vector<2x128xi32>
    %cst_84 = arith.constant dense<2147483647> : vector<2xi32>
    %297 = vector.multi_reduction <minsi>, %296, %cst_84 [1] : vector<2x128xi32> to vector<2xi32>
    %298 = vector.shape_cast %297 : vector<2xi32> to vector<2x1xi32>
    %299 = vector.broadcast %298 : vector<2x1xi32> to vector<2x128xi32>
    %300 = arith.cmpi eq, %249, %299 : vector<2x128xi32>
    %301 = arith.extui %300 : vector<2x128xi1> to vector<2x128xi32>
    %302 = arith.sitofp %301 : vector<2x128xi32> to vector<2x128xf32>
    %c1_i32_85 = arith.constant 1 : i32
    %303 = arith.addi %c0_i32_66, %c1_i32_85 : i32
    %304 = arith.index_cast %303 : i32 to index
    %305 = memref.load %arg3[%304] : memref<8xi32, #tpu.memory_space<smem>>
    %c0_i32_86 = arith.constant 0 : i32
    %306 = arith.cmpi sgt, %305, %c0_i32_86 : i32
    %307 = arith.extui %306 : i1 to i32
    %308 = arith.sitofp %307 : i32 to f32
    %c1_i32_87 = arith.constant 1 : i32
    %309 = arith.addi %c0_i32_66, %c1_i32_87 : i32
    %310 = arith.index_cast %309 : i32 to index
    %c0_88 = arith.constant 0 : index
    %c0_89 = arith.constant 0 : index
    %311 = vector.load %arg2[%310, %c0_88, %c0_89] : memref<8x2x128xf32, #tpu.memory_space<vmem>>, vector<1x2x128xf32>
    %312 = vector.shape_cast %311 : vector<1x2x128xf32> to vector<2x128xf32>
    %313 = vector.broadcast %308 : f32 to vector<2x128xf32>
    %314 = arith.mulf %313, %312 : vector<2x128xf32>
    %cst_90 = arith.constant 1.000000e+00 : f32
    %315 = arith.subf %cst_90, %308 : f32
    %316 = vector.broadcast %315 : f32 to vector<2x128xf32>
    %317 = arith.mulf %316, %302 : vector<2x128xf32>
    %318 = arith.addf %314, %317 : vector<2x128xf32>
    %c1_i32_91 = arith.constant 1 : i32
    %c0_92 = arith.constant 0 : index
    %c0_93 = arith.constant 0 : index
    %319 = vector.load %arg4[%c0_92, %c0_93] : memref<128x512xf32, #tpu.memory_space<vmem>>, vector<128x512xf32>
    %cst_94 = arith.constant dense<0.000000e+00> : vector<2x512xf32>
    %320 = tpu.matmul %318, %319, %cst_94 {dimension_numbers = #tpu.dot_dimension_numbers<[1], [0], [0], [1], [0, 0, 1, 1], [], []>} : vector<2x128xf32>, vector<128x512xf32>, vector<2x512xf32> -> vector<2x512xf32>
    %c0_95 = arith.constant 0 : index
    %c0_96 = arith.constant 0 : index
    %321 = vector.load %arg5[%c0_95, %c0_96] : memref<128x512xf32, #tpu.memory_space<vmem>>, vector<128x512xf32>
    %cst_97 = arith.constant dense<0.000000e+00> : vector<2x512xf32>
    %322 = tpu.matmul %281, %321, %cst_97 {dimension_numbers = #tpu.dot_dimension_numbers<[1], [0], [0], [1], [0, 0, 1, 1], [], []>} : vector<2x128xf32>, vector<128x512xf32>, vector<2x512xf32> -> vector<2x512xf32>
    %323 = arith.addf %320, %322 : vector<2x512xf32>
    %324 = vector.extract_strided_slice %323 {offsets = [0, 0], sizes = [2, 128], strides = [1, 1]} : vector<2x512xf32> to vector<2x128xf32>
    %325 = arith.negf %324 : vector<2x128xf32>
    %326 = math.exp %325 : vector<2x128xf32>
    %cst_98 = arith.constant 1.000000e+00 : f32
    %327 = vector.broadcast %cst_98 : f32 to vector<2x128xf32>
    %328 = arith.addf %327, %326 : vector<2x128xf32>
    %329 = arith.divf %327, %328 : vector<2x128xf32>
    %330 = vector.extract_strided_slice %323 {offsets = [0, 128], sizes = [2, 128], strides = [1, 1]} : vector<2x512xf32> to vector<2x128xf32>
    %331 = arith.negf %330 : vector<2x128xf32>
    %332 = math.exp %331 : vector<2x128xf32>
    %cst_99 = arith.constant 1.000000e+00 : f32
    %333 = vector.broadcast %cst_99 : f32 to vector<2x128xf32>
    %334 = arith.addf %333, %332 : vector<2x128xf32>
    %335 = arith.divf %333, %334 : vector<2x128xf32>
    %336 = vector.extract_strided_slice %323 {offsets = [0, 256], sizes = [2, 128], strides = [1, 1]} : vector<2x512xf32> to vector<2x128xf32>
    %337 = math.tanh %336 : vector<2x128xf32>
    %338 = vector.extract_strided_slice %323 {offsets = [0, 384], sizes = [2, 128], strides = [1, 1]} : vector<2x512xf32> to vector<2x128xf32>
    %339 = arith.negf %338 : vector<2x128xf32>
    %340 = math.exp %339 : vector<2x128xf32>
    %cst_100 = arith.constant 1.000000e+00 : f32
    %341 = vector.broadcast %cst_100 : f32 to vector<2x128xf32>
    %342 = arith.addf %341, %340 : vector<2x128xf32>
    %343 = arith.divf %341, %342 : vector<2x128xf32>
    %344 = arith.mulf %335, %279 : vector<2x128xf32>
    %345 = arith.mulf %329, %337 : vector<2x128xf32>
    %346 = arith.addf %344, %345 : vector<2x128xf32>
    %347 = math.tanh %346 : vector<2x128xf32>
    %348 = arith.mulf %343, %347 : vector<2x128xf32>
    %c0_101 = arith.constant 0 : index
    %c0_102 = arith.constant 0 : index
    %349 = vector.load %arg6[%c0_101, %c0_102] : memref<128x128xf32, #tpu.memory_space<vmem>>, vector<128x128xf32>
    %cst_103 = arith.constant dense<0.000000e+00> : vector<2x128xf32>
    %350 = tpu.matmul %348, %349, %cst_103 {dimension_numbers = #tpu.dot_dimension_numbers<[1], [0], [0], [1], [0, 0, 1, 1], [], []>} : vector<2x128xf32>, vector<128x128xf32>, vector<2x128xf32> -> vector<2x128xf32>
    %c0_104 = arith.constant 0 : index
    %c0_105 = arith.constant 0 : index
    %351 = vector.load %arg7[%c0_104, %c0_105] : memref<1x128xf32, #tpu.memory_space<vmem>>, vector<1x128xf32>
    %352 = vector.broadcast %351 : vector<1x128xf32> to vector<2x128xf32>
    %353 = arith.addf %350, %352 : vector<2x128xf32>
    %354 = arith.index_cast %c1_i32_91 : i32 to index
    %c0_106 = arith.constant 0 : index
    %c0_107 = arith.constant 0 : index
    %355 = vector.load %arg8[%354, %c0_106, %c0_107] : memref<7x2x128xf32, #tpu.memory_space<vmem>>, vector<1x2x128xf32>
    %356 = vector.shape_cast %355 : vector<1x2x128xf32> to vector<2x128xf32>
    %357 = vector.shape_cast %353 : vector<2x128xf32> to vector<1x2x128xf32>
    tpu.vector_store %arg8[%354, %c0_106, %c0_107], %357 {strides = array<i32>} : memref<7x2x128xf32, #tpu.memory_space<vmem>>, vector<1x2x128xf32>,
    %cst_108 = arith.constant dense<0xFF800000> : vector<2xf32>
    %358 = vector.multi_reduction <maximumf>, %353, %cst_108 [1] : vector<2x128xf32> to vector<2xf32>
    %359 = vector.shape_cast %358 : vector<2xf32> to vector<2x1xf32>
    %360 = vector.broadcast %359 : vector<2x1xf32> to vector<2x128xf32>
    %361 = arith.cmpf oeq, %353, %360 : vector<2x128xf32>
    %c128_i32_109 = arith.constant 128 : i32
    %362 = vector.broadcast %c128_i32_109 : i32 to vector<2x128xi32>
    %363 = arith.select %361, %249, %362 : vector<2x128xi1>, vector<2x128xi32>
    %cst_110 = arith.constant dense<2147483647> : vector<2xi32>
    %364 = vector.multi_reduction <minsi>, %363, %cst_110 [1] : vector<2x128xi32> to vector<2xi32>
    %365 = vector.shape_cast %364 : vector<2xi32> to vector<2x1xi32>
    %366 = vector.broadcast %365 : vector<2x1xi32> to vector<2x128xi32>
    %367 = arith.cmpi eq, %249, %366 : vector<2x128xi32>
    %368 = arith.extui %367 : vector<2x128xi1> to vector<2x128xi32>
    %369 = arith.sitofp %368 : vector<2x128xi32> to vector<2x128xf32>
    %c1_i32_111 = arith.constant 1 : i32
    %370 = arith.addi %c1_i32_91, %c1_i32_111 : i32
    %371 = arith.index_cast %370 : i32 to index
    %372 = memref.load %arg3[%371] : memref<8xi32, #tpu.memory_space<smem>>
    %c0_i32_112 = arith.constant 0 : i32
    %373 = arith.cmpi sgt, %372, %c0_i32_112 : i32
    %374 = arith.extui %373 : i1 to i32
    %375 = arith.sitofp %374 : i32 to f32
    %c1_i32_113 = arith.constant 1 : i32
    %376 = arith.addi %c1_i32_91, %c1_i32_113 : i32
    %377 = arith.index_cast %376 : i32 to index
    %c0_114 = arith.constant 0 : index
    %c0_115 = arith.constant 0 : index
    %378 = vector.load %arg2[%377, %c0_114, %c0_115] : memref<8x2x128xf32, #tpu.memory_space<vmem>>, vector<1x2x128xf32>
    %379 = vector.shape_cast %378 : vector<1x2x128xf32> to vector<2x128xf32>
    %380 = vector.broadcast %375 : f32 to vector<2x128xf32>
    %381 = arith.mulf %380, %379 : vector<2x128xf32>
    %cst_116 = arith.constant 1.000000e+00 : f32
    %382 = arith.subf %cst_116, %375 : f32
    %383 = vector.broadcast %382 : f32 to vector<2x128xf32>
    %384 = arith.mulf %383, %369 : vector<2x128xf32>
    %385 = arith.addf %381, %384 : vector<2x128xf32>
    %c2_i32_117 = arith.constant 2 : i32
    %c0_118 = arith.constant 0 : index
    %c0_119 = arith.constant 0 : index
    %386 = vector.load %arg4[%c0_118, %c0_119] : memref<128x512xf32, #tpu.memory_space<vmem>>, vector<128x512xf32>
    %cst_120 = arith.constant dense<0.000000e+00> : vector<2x512xf32>
    %387 = tpu.matmul %385, %386, %cst_120 {dimension_numbers = #tpu.dot_dimension_numbers<[1], [0], [0], [1], [0, 0, 1, 1], [], []>} : vector<2x128xf32>, vector<128x512xf32>, vector<2x512xf32> -> vector<2x512xf32>
    %c0_121 = arith.constant 0 : index
    %c0_122 = arith.constant 0 : index
    %388 = vector.load %arg5[%c0_121, %c0_122] : memref<128x512xf32, #tpu.memory_space<vmem>>, vector<128x512xf32>
    %cst_123 = arith.constant dense<0.000000e+00> : vector<2x512xf32>
    %389 = tpu.matmul %348, %388, %cst_123 {dimension_numbers = #tpu.dot_dimension_numbers<[1], [0], [0], [1], [0, 0, 1, 1], [], []>} : vector<2x128xf32>, vector<128x512xf32>, vector<2x512xf32> -> vector<2x512xf32>
    %390 = arith.addf %387, %389 : vector<2x512xf32>
    %391 = vector.extract_strided_slice %390 {offsets = [0, 0], sizes = [2, 128], strides = [1, 1]} : vector<2x512xf32> to vector<2x128xf32>
    %392 = arith.negf %391 : vector<2x128xf32>
    %393 = math.exp %392 : vector<2x128xf32>
    %cst_124 = arith.constant 1.000000e+00 : f32
    %394 = vector.broadcast %cst_124 : f32 to vector<2x128xf32>
    %395 = arith.addf %394, %393 : vector<2x128xf32>
    %396 = arith.divf %394, %395 : vector<2x128xf32>
    %397 = vector.extract_strided_slice %390 {offsets = [0, 128], sizes = [2, 128], strides = [1, 1]} : vector<2x512xf32> to vector<2x128xf32>
    %398 = arith.negf %397 : vector<2x128xf32>
    %399 = math.exp %398 : vector<2x128xf32>
    %cst_125 = arith.constant 1.000000e+00 : f32
    %400 = vector.broadcast %cst_125 : f32 to vector<2x128xf32>
    %401 = arith.addf %400, %399 : vector<2x128xf32>
    %402 = arith.divf %400, %401 : vector<2x128xf32>
    %403 = vector.extract_strided_slice %390 {offsets = [0, 256], sizes = [2, 128], strides = [1, 1]} : vector<2x512xf32> to vector<2x128xf32>
    %404 = math.tanh %403 : vector<2x128xf32>
    %405 = vector.extract_strided_slice %390 {offsets = [0, 384], sizes = [2, 128], strides = [1, 1]} : vector<2x512xf32> to vector<2x128xf32>
    %406 = arith.negf %405 : vector<2x128xf32>
    %407 = math.exp %406 : vector<2x128xf32>
    %cst_126 = arith.constant 1.000000e+00 : f32
    %408 = vector.broadcast %cst_126 : f32 to vector<2x128xf32>
    %409 = arith.addf %408, %407 : vector<2x128xf32>
    %410 = arith.divf %408, %409 : vector<2x128xf32>
    %411 = arith.mulf %402, %346 : vector<2x128xf32>
    %412 = arith.mulf %396, %404 : vector<2x128xf32>
    %413 = arith.addf %411, %412 : vector<2x128xf32>
    %414 = math.tanh %413 : vector<2x128xf32>
    %415 = arith.mulf %410, %414 : vector<2x128xf32>
    %c0_127 = arith.constant 0 : index
    %c0_128 = arith.constant 0 : index
    %416 = vector.load %arg6[%c0_127, %c0_128] : memref<128x128xf32, #tpu.memory_space<vmem>>, vector<128x128xf32>
    %cst_129 = arith.constant dense<0.000000e+00> : vector<2x128xf32>
    %417 = tpu.matmul %415, %416, %cst_129 {dimension_numbers = #tpu.dot_dimension_numbers<[1], [0], [0], [1], [0, 0, 1, 1], [], []>} : vector<2x128xf32>, vector<128x128xf32>, vector<2x128xf32> -> vector<2x128xf32>
    %c0_130 = arith.constant 0 : index
    %c0_131 = arith.constant 0 : index
    %418 = vector.load %arg7[%c0_130, %c0_131] : memref<1x128xf32, #tpu.memory_space<vmem>>, vector<1x128xf32>
    %419 = vector.broadcast %418 : vector<1x128xf32> to vector<2x128xf32>
    %420 = arith.addf %417, %419 : vector<2x128xf32>
    %421 = arith.index_cast %c2_i32_117 : i32 to index
    %c0_132 = arith.constant 0 : index
    %c0_133 = arith.constant 0 : index
    %422 = vector.load %arg8[%421, %c0_132, %c0_133] : memref<7x2x128xf32, #tpu.memory_space<vmem>>, vector<1x2x128xf32>
    %423 = vector.shape_cast %422 : vector<1x2x128xf32> to vector<2x128xf32>
    %424 = vector.shape_cast %420 : vector<2x128xf32> to vector<1x2x128xf32>
    tpu.vector_store %arg8[%421, %c0_132, %c0_133], %424 {strides = array<i32>} : memref<7x2x128xf32, #tpu.memory_space<vmem>>, vector<1x2x128xf32>,
    %cst_134 = arith.constant dense<0xFF800000> : vector<2xf32>
    %425 = vector.multi_reduction <maximumf>, %420, %cst_134 [1] : vector<2x128xf32> to vector<2xf32>
    %426 = vector.shape_cast %425 : vector<2xf32> to vector<2x1xf32>
    %427 = vector.broadcast %426 : vector<2x1xf32> to vector<2x128xf32>
    %428 = arith.cmpf oeq, %420, %427 : vector<2x128xf32>
    %c128_i32_135 = arith.constant 128 : i32
    %429 = vector.broadcast %c128_i32_135 : i32 to vector<2x128xi32>
    %430 = arith.select %428, %249, %429 : vector<2x128xi1>, vector<2x128xi32>
    %cst_136 = arith.constant dense<2147483647> : vector<2xi32>
    %431 = vector.multi_reduction <minsi>, %430, %cst_136 [1] : vector<2x128xi32> to vector<2xi32>
    %432 = vector.shape_cast %431 : vector<2xi32> to vector<2x1xi32>
    %433 = vector.broadcast %432 : vector<2x1xi32> to vector<2x128xi32>
    %434 = arith.cmpi eq, %249, %433 : vector<2x128xi32>
    %435 = arith.extui %434 : vector<2x128xi1> to vector<2x128xi32>
    %436 = arith.sitofp %435 : vector<2x128xi32> to vector<2x128xf32>
    %c1_i32_137 = arith.constant 1 : i32
    %437 = arith.addi %c2_i32_117, %c1_i32_137 : i32
    %438 = arith.index_cast %437 : i32 to index
    %439 = memref.load %arg3[%438] : memref<8xi32, #tpu.memory_space<smem>>
    %c0_i32_138 = arith.constant 0 : i32
    %440 = arith.cmpi sgt, %439, %c0_i32_138 : i32
    %441 = arith.extui %440 : i1 to i32
    %442 = arith.sitofp %441 : i32 to f32
    %c1_i32_139 = arith.constant 1 : i32
    %443 = arith.addi %c2_i32_117, %c1_i32_139 : i32
    %444 = arith.index_cast %443 : i32 to index
    %c0_140 = arith.constant 0 : index
    %c0_141 = arith.constant 0 : index
    %445 = vector.load %arg2[%444, %c0_140, %c0_141] : memref<8x2x128xf32, #tpu.memory_space<vmem>>, vector<1x2x128xf32>
    %446 = vector.shape_cast %445 : vector<1x2x128xf32> to vector<2x128xf32>
    %447 = vector.broadcast %442 : f32 to vector<2x128xf32>
    %448 = arith.mulf %447, %446 : vector<2x128xf32>
    %cst_142 = arith.constant 1.000000e+00 : f32
    %449 = arith.subf %cst_142, %442 : f32
    %450 = vector.broadcast %449 : f32 to vector<2x128xf32>
    %451 = arith.mulf %450, %436 : vector<2x128xf32>
    %452 = arith.addf %448, %451 : vector<2x128xf32>
    %c3_i32_143 = arith.constant 3 : i32
    %c0_144 = arith.constant 0 : index
    %c0_145 = arith.constant 0 : index
    %453 = vector.load %arg4[%c0_144, %c0_145] : memref<128x512xf32, #tpu.memory_space<vmem>>, vector<128x512xf32>
    %cst_146 = arith.constant dense<0.000000e+00> : vector<2x512xf32>
    %454 = tpu.matmul %452, %453, %cst_146 {dimension_numbers = #tpu.dot_dimension_numbers<[1], [0], [0], [1], [0, 0, 1, 1], [], []>} : vector<2x128xf32>, vector<128x512xf32>, vector<2x512xf32> -> vector<2x512xf32>
    %c0_147 = arith.constant 0 : index
    %c0_148 = arith.constant 0 : index
    %455 = vector.load %arg5[%c0_147, %c0_148] : memref<128x512xf32, #tpu.memory_space<vmem>>, vector<128x512xf32>
    %cst_149 = arith.constant dense<0.000000e+00> : vector<2x512xf32>
    %456 = tpu.matmul %415, %455, %cst_149 {dimension_numbers = #tpu.dot_dimension_numbers<[1], [0], [0], [1], [0, 0, 1, 1], [], []>} : vector<2x128xf32>, vector<128x512xf32>, vector<2x512xf32> -> vector<2x512xf32>
    %457 = arith.addf %454, %456 : vector<2x512xf32>
    %458 = vector.extract_strided_slice %457 {offsets = [0, 0], sizes = [2, 128], strides = [1, 1]} : vector<2x512xf32> to vector<2x128xf32>
    %459 = arith.negf %458 : vector<2x128xf32>
    %460 = math.exp %459 : vector<2x128xf32>
    %cst_150 = arith.constant 1.000000e+00 : f32
    %461 = vector.broadcast %cst_150 : f32 to vector<2x128xf32>
    %462 = arith.addf %461, %460 : vector<2x128xf32>
    %463 = arith.divf %461, %462 : vector<2x128xf32>
    %464 = vector.extract_strided_slice %457 {offsets = [0, 128], sizes = [2, 128], strides = [1, 1]} : vector<2x512xf32> to vector<2x128xf32>
    %465 = arith.negf %464 : vector<2x128xf32>
    %466 = math.exp %465 : vector<2x128xf32>
    %cst_151 = arith.constant 1.000000e+00 : f32
    %467 = vector.broadcast %cst_151 : f32 to vector<2x128xf32>
    %468 = arith.addf %467, %466 : vector<2x128xf32>
    %469 = arith.divf %467, %468 : vector<2x128xf32>
    %470 = vector.extract_strided_slice %457 {offsets = [0, 256], sizes = [2, 128], strides = [1, 1]} : vector<2x512xf32> to vector<2x128xf32>
    %471 = math.tanh %470 : vector<2x128xf32>
    %472 = vector.extract_strided_slice %457 {offsets = [0, 384], sizes = [2, 128], strides = [1, 1]} : vector<2x512xf32> to vector<2x128xf32>
    %473 = arith.negf %472 : vector<2x128xf32>
    %474 = math.exp %473 : vector<2x128xf32>
    %cst_152 = arith.constant 1.000000e+00 : f32
    %475 = vector.broadcast %cst_152 : f32 to vector<2x128xf32>
    %476 = arith.addf %475, %474 : vector<2x128xf32>
    %477 = arith.divf %475, %476 : vector<2x128xf32>
    %478 = arith.mulf %469, %413 : vector<2x128xf32>
    %479 = arith.mulf %463, %471 : vector<2x128xf32>
    %480 = arith.addf %478, %479 : vector<2x128xf32>
    %481 = math.tanh %480 : vector<2x128xf32>
    %482 = arith.mulf %477, %481 : vector<2x128xf32>
    %c0_153 = arith.constant 0 : index
    %c0_154 = arith.constant 0 : index
    %483 = vector.load %arg6[%c0_153, %c0_154] : memref<128x128xf32, #tpu.memory_space<vmem>>, vector<128x128xf32>
    %cst_155 = arith.constant dense<0.000000e+00> : vector<2x128xf32>
    %484 = tpu.matmul %482, %483, %cst_155 {dimension_numbers = #tpu.dot_dimension_numbers<[1], [0], [0], [1], [0, 0, 1, 1], [], []>} : vector<2x128xf32>, vector<128x128xf32>, vector<2x128xf32> -> vector<2x128xf32>
    %c0_156 = arith.constant 0 : index
    %c0_157 = arith.constant 0 : index
    %485 = vector.load %arg7[%c0_156, %c0_157] : memref<1x128xf32, #tpu.memory_space<vmem>>, vector<1x128xf32>
    %486 = vector.broadcast %485 : vector<1x128xf32> to vector<2x128xf32>
    %487 = arith.addf %484, %486 : vector<2x128xf32>
    %488 = arith.index_cast %c3_i32_143 : i32 to index
    %c0_158 = arith.constant 0 : index
    %c0_159 = arith.constant 0 : index
    %489 = vector.load %arg8[%488, %c0_158, %c0_159] : memref<7x2x128xf32, #tpu.memory_space<vmem>>, vector<1x2x128xf32>
    %490 = vector.shape_cast %489 : vector<1x2x128xf32> to vector<2x128xf32>
    %491 = vector.shape_cast %487 : vector<2x128xf32> to vector<1x2x128xf32>
    tpu.vector_store %arg8[%488, %c0_158, %c0_159], %491 {strides = array<i32>} : memref<7x2x128xf32, #tpu.memory_space<vmem>>, vector<1x2x128xf32>,
    %cst_160 = arith.constant dense<0xFF800000> : vector<2xf32>
    %492 = vector.multi_reduction <maximumf>, %487, %cst_160 [1] : vector<2x128xf32> to vector<2xf32>
    %493 = vector.shape_cast %492 : vector<2xf32> to vector<2x1xf32>
    %494 = vector.broadcast %493 : vector<2x1xf32> to vector<2x128xf32>
    %495 = arith.cmpf oeq, %487, %494 : vector<2x128xf32>
    %c128_i32_161 = arith.constant 128 : i32
    %496 = vector.broadcast %c128_i32_161 : i32 to vector<2x128xi32>
    %497 = arith.select %495, %249, %496 : vector<2x128xi1>, vector<2x128xi32>
    %cst_162 = arith.constant dense<2147483647> : vector<2xi32>
    %498 = vector.multi_reduction <minsi>, %497, %cst_162 [1] : vector<2x128xi32> to vector<2xi32>
    %499 = vector.shape_cast %498 : vector<2xi32> to vector<2x1xi32>
    %500 = vector.broadcast %499 : vector<2x1xi32> to vector<2x128xi32>
    %501 = arith.cmpi eq, %249, %500 : vector<2x128xi32>
    %502 = arith.extui %501 : vector<2x128xi1> to vector<2x128xi32>
    %503 = arith.sitofp %502 : vector<2x128xi32> to vector<2x128xf32>
    %c1_i32_163 = arith.constant 1 : i32
    %504 = arith.addi %c3_i32_143, %c1_i32_163 : i32
    %505 = arith.index_cast %504 : i32 to index
    %506 = memref.load %arg3[%505] : memref<8xi32, #tpu.memory_space<smem>>
    %c0_i32_164 = arith.constant 0 : i32
    %507 = arith.cmpi sgt, %506, %c0_i32_164 : i32
    %508 = arith.extui %507 : i1 to i32
    %509 = arith.sitofp %508 : i32 to f32
    %c1_i32_165 = arith.constant 1 : i32
    %510 = arith.addi %c3_i32_143, %c1_i32_165 : i32
    %511 = arith.index_cast %510 : i32 to index
    %c0_166 = arith.constant 0 : index
    %c0_167 = arith.constant 0 : index
    %512 = vector.load %arg2[%511, %c0_166, %c0_167] : memref<8x2x128xf32, #tpu.memory_space<vmem>>, vector<1x2x128xf32>
    %513 = vector.shape_cast %512 : vector<1x2x128xf32> to vector<2x128xf32>
    %514 = vector.broadcast %509 : f32 to vector<2x128xf32>
    %515 = arith.mulf %514, %513 : vector<2x128xf32>
    %cst_168 = arith.constant 1.000000e+00 : f32
    %516 = arith.subf %cst_168, %509 : f32
    %517 = vector.broadcast %516 : f32 to vector<2x128xf32>
    %518 = arith.mulf %517, %503 : vector<2x128xf32>
    %519 = arith.addf %515, %518 : vector<2x128xf32>
    %c4_i32_169 = arith.constant 4 : i32
    %c0_170 = arith.constant 0 : index
    %c0_171 = arith.constant 0 : index
    %520 = vector.load %arg4[%c0_170, %c0_171] : memref<128x512xf32, #tpu.memory_space<vmem>>, vector<128x512xf32>
    %cst_172 = arith.constant dense<0.000000e+00> : vector<2x512xf32>
    %521 = tpu.matmul %519, %520, %cst_172 {dimension_numbers = #tpu.dot_dimension_numbers<[1], [0], [0], [1], [0, 0, 1, 1], [], []>} : vector<2x128xf32>, vector<128x512xf32>, vector<2x512xf32> -> vector<2x512xf32>
    %c0_173 = arith.constant 0 : index
    %c0_174 = arith.constant 0 : index
    %522 = vector.load %arg5[%c0_173, %c0_174] : memref<128x512xf32, #tpu.memory_space<vmem>>, vector<128x512xf32>
    %cst_175 = arith.constant dense<0.000000e+00> : vector<2x512xf32>
    %523 = tpu.matmul %482, %522, %cst_175 {dimension_numbers = #tpu.dot_dimension_numbers<[1], [0], [0], [1], [0, 0, 1, 1], [], []>} : vector<2x128xf32>, vector<128x512xf32>, vector<2x512xf32> -> vector<2x512xf32>
    %524 = arith.addf %521, %523 : vector<2x512xf32>
    %525 = vector.extract_strided_slice %524 {offsets = [0, 0], sizes = [2, 128], strides = [1, 1]} : vector<2x512xf32> to vector<2x128xf32>
    %526 = arith.negf %525 : vector<2x128xf32>
    %527 = math.exp %526 : vector<2x128xf32>
    %cst_176 = arith.constant 1.000000e+00 : f32
    %528 = vector.broadcast %cst_176 : f32 to vector<2x128xf32>
    %529 = arith.addf %528, %527 : vector<2x128xf32>
    %530 = arith.divf %528, %529 : vector<2x128xf32>
    %531 = vector.extract_strided_slice %524 {offsets = [0, 128], sizes = [2, 128], strides = [1, 1]} : vector<2x512xf32> to vector<2x128xf32>
    %532 = arith.negf %531 : vector<2x128xf32>
    %533 = math.exp %532 : vector<2x128xf32>
    %cst_177 = arith.constant 1.000000e+00 : f32
    %534 = vector.broadcast %cst_177 : f32 to vector<2x128xf32>
    %535 = arith.addf %534, %533 : vector<2x128xf32>
    %536 = arith.divf %534, %535 : vector<2x128xf32>
    %537 = vector.extract_strided_slice %524 {offsets = [0, 256], sizes = [2, 128], strides = [1, 1]} : vector<2x512xf32> to vector<2x128xf32>
    %538 = math.tanh %537 : vector<2x128xf32>
    %539 = vector.extract_strided_slice %524 {offsets = [0, 384], sizes = [2, 128], strides = [1, 1]} : vector<2x512xf32> to vector<2x128xf32>
    %540 = arith.negf %539 : vector<2x128xf32>
    %541 = math.exp %540 : vector<2x128xf32>
    %cst_178 = arith.constant 1.000000e+00 : f32
    %542 = vector.broadcast %cst_178 : f32 to vector<2x128xf32>
    %543 = arith.addf %542, %541 : vector<2x128xf32>
    %544 = arith.divf %542, %543 : vector<2x128xf32>
    %545 = arith.mulf %536, %480 : vector<2x128xf32>
    %546 = arith.mulf %530, %538 : vector<2x128xf32>
    %547 = arith.addf %545, %546 : vector<2x128xf32>
    %548 = math.tanh %547 : vector<2x128xf32>
    %549 = arith.mulf %544, %548 : vector<2x128xf32>
    %c0_179 = arith.constant 0 : index
    %c0_180 = arith.constant 0 : index
    %550 = vector.load %arg6[%c0_179, %c0_180] : memref<128x128xf32, #tpu.memory_space<vmem>>, vector<128x128xf32>
    %cst_181 = arith.constant dense<0.000000e+00> : vector<2x128xf32>
    %551 = tpu.matmul %549, %550, %cst_181 {dimension_numbers = #tpu.dot_dimension_numbers<[1], [0], [0], [1], [0, 0, 1, 1], [], []>} : vector<2x128xf32>, vector<128x128xf32>, vector<2x128xf32> -> vector<2x128xf32>
    %c0_182 = arith.constant 0 : index
    %c0_183 = arith.constant 0 : index
    %552 = vector.load %arg7[%c0_182, %c0_183] : memref<1x128xf32, #tpu.memory_space<vmem>>, vector<1x128xf32>
    %553 = vector.broadcast %552 : vector<1x128xf32> to vector<2x128xf32>
    %554 = arith.addf %551, %553 : vector<2x128xf32>
    %555 = arith.index_cast %c4_i32_169 : i32 to index
    %c0_184 = arith.constant 0 : index
    %c0_185 = arith.constant 0 : index
    %556 = vector.load %arg8[%555, %c0_184, %c0_185] : memref<7x2x128xf32, #tpu.memory_space<vmem>>, vector<1x2x128xf32>
    %557 = vector.shape_cast %556 : vector<1x2x128xf32> to vector<2x128xf32>
    %558 = vector.shape_cast %554 : vector<2x128xf32> to vector<1x2x128xf32>
    tpu.vector_store %arg8[%555, %c0_184, %c0_185], %558 {strides = array<i32>} : memref<7x2x128xf32, #tpu.memory_space<vmem>>, vector<1x2x128xf32>,
    %cst_186 = arith.constant dense<0xFF800000> : vector<2xf32>
    %559 = vector.multi_reduction <maximumf>, %554, %cst_186 [1] : vector<2x128xf32> to vector<2xf32>
    %560 = vector.shape_cast %559 : vector<2xf32> to vector<2x1xf32>
    %561 = vector.broadcast %560 : vector<2x1xf32> to vector<2x128xf32>
    %562 = arith.cmpf oeq, %554, %561 : vector<2x128xf32>
    %c128_i32_187 = arith.constant 128 : i32
    %563 = vector.broadcast %c128_i32_187 : i32 to vector<2x128xi32>
    %564 = arith.select %562, %249, %563 : vector<2x128xi1>, vector<2x128xi32>
    %cst_188 = arith.constant dense<2147483647> : vector<2xi32>
    %565 = vector.multi_reduction <minsi>, %564, %cst_188 [1] : vector<2x128xi32> to vector<2xi32>
    %566 = vector.shape_cast %565 : vector<2xi32> to vector<2x1xi32>
    %567 = vector.broadcast %566 : vector<2x1xi32> to vector<2x128xi32>
    %568 = arith.cmpi eq, %249, %567 : vector<2x128xi32>
    %569 = arith.extui %568 : vector<2x128xi1> to vector<2x128xi32>
    %570 = arith.sitofp %569 : vector<2x128xi32> to vector<2x128xf32>
    %c1_i32_189 = arith.constant 1 : i32
    %571 = arith.addi %c4_i32_169, %c1_i32_189 : i32
    %572 = arith.index_cast %571 : i32 to index
    %573 = memref.load %arg3[%572] : memref<8xi32, #tpu.memory_space<smem>>
    %c0_i32_190 = arith.constant 0 : i32
    %574 = arith.cmpi sgt, %573, %c0_i32_190 : i32
    %575 = arith.extui %574 : i1 to i32
    %576 = arith.sitofp %575 : i32 to f32
    %c1_i32_191 = arith.constant 1 : i32
    %577 = arith.addi %c4_i32_169, %c1_i32_191 : i32
    %578 = arith.index_cast %577 : i32 to index
    %c0_192 = arith.constant 0 : index
    %c0_193 = arith.constant 0 : index
    %579 = vector.load %arg2[%578, %c0_192, %c0_193] : memref<8x2x128xf32, #tpu.memory_space<vmem>>, vector<1x2x128xf32>
    %580 = vector.shape_cast %579 : vector<1x2x128xf32> to vector<2x128xf32>
    %581 = vector.broadcast %576 : f32 to vector<2x128xf32>
    %582 = arith.mulf %581, %580 : vector<2x128xf32>
    %cst_194 = arith.constant 1.000000e+00 : f32
    %583 = arith.subf %cst_194, %576 : f32
    %584 = vector.broadcast %583 : f32 to vector<2x128xf32>
    %585 = arith.mulf %584, %570 : vector<2x128xf32>
    %586 = arith.addf %582, %585 : vector<2x128xf32>
    %c5_i32_195 = arith.constant 5 : i32
    %c0_196 = arith.constant 0 : index
    %c0_197 = arith.constant 0 : index
    %587 = vector.load %arg4[%c0_196, %c0_197] : memref<128x512xf32, #tpu.memory_space<vmem>>, vector<128x512xf32>
    %cst_198 = arith.constant dense<0.000000e+00> : vector<2x512xf32>
    %588 = tpu.matmul %586, %587, %cst_198 {dimension_numbers = #tpu.dot_dimension_numbers<[1], [0], [0], [1], [0, 0, 1, 1], [], []>} : vector<2x128xf32>, vector<128x512xf32>, vector<2x512xf32> -> vector<2x512xf32>
    %c0_199 = arith.constant 0 : index
    %c0_200 = arith.constant 0 : index
    %589 = vector.load %arg5[%c0_199, %c0_200] : memref<128x512xf32, #tpu.memory_space<vmem>>, vector<128x512xf32>
    %cst_201 = arith.constant dense<0.000000e+00> : vector<2x512xf32>
    %590 = tpu.matmul %549, %589, %cst_201 {dimension_numbers = #tpu.dot_dimension_numbers<[1], [0], [0], [1], [0, 0, 1, 1], [], []>} : vector<2x128xf32>, vector<128x512xf32>, vector<2x512xf32> -> vector<2x512xf32>
    %591 = arith.addf %588, %590 : vector<2x512xf32>
    %592 = vector.extract_strided_slice %591 {offsets = [0, 0], sizes = [2, 128], strides = [1, 1]} : vector<2x512xf32> to vector<2x128xf32>
    %593 = arith.negf %592 : vector<2x128xf32>
    %594 = math.exp %593 : vector<2x128xf32>
    %cst_202 = arith.constant 1.000000e+00 : f32
    %595 = vector.broadcast %cst_202 : f32 to vector<2x128xf32>
    %596 = arith.addf %595, %594 : vector<2x128xf32>
    %597 = arith.divf %595, %596 : vector<2x128xf32>
    %598 = vector.extract_strided_slice %591 {offsets = [0, 128], sizes = [2, 128], strides = [1, 1]} : vector<2x512xf32> to vector<2x128xf32>
    %599 = arith.negf %598 : vector<2x128xf32>
    %600 = math.exp %599 : vector<2x128xf32>
    %cst_203 = arith.constant 1.000000e+00 : f32
    %601 = vector.broadcast %cst_203 : f32 to vector<2x128xf32>
    %602 = arith.addf %601, %600 : vector<2x128xf32>
    %603 = arith.divf %601, %602 : vector<2x128xf32>
    %604 = vector.extract_strided_slice %591 {offsets = [0, 256], sizes = [2, 128], strides = [1, 1]} : vector<2x512xf32> to vector<2x128xf32>
    %605 = math.tanh %604 : vector<2x128xf32>
    %606 = vector.extract_strided_slice %591 {offsets = [0, 384], sizes = [2, 128], strides = [1, 1]} : vector<2x512xf32> to vector<2x128xf32>
    %607 = arith.negf %606 : vector<2x128xf32>
    %608 = math.exp %607 : vector<2x128xf32>
    %cst_204 = arith.constant 1.000000e+00 : f32
    %609 = vector.broadcast %cst_204 : f32 to vector<2x128xf32>
    %610 = arith.addf %609, %608 : vector<2x128xf32>
    %611 = arith.divf %609, %610 : vector<2x128xf32>
    %612 = arith.mulf %603, %547 : vector<2x128xf32>
    %613 = arith.mulf %597, %605 : vector<2x128xf32>
    %614 = arith.addf %612, %613 : vector<2x128xf32>
    %615 = math.tanh %614 : vector<2x128xf32>
    %616 = arith.mulf %611, %615 : vector<2x128xf32>
    %c0_205 = arith.constant 0 : index
    %c0_206 = arith.constant 0 : index
    %617 = vector.load %arg6[%c0_205, %c0_206] : memref<128x128xf32, #tpu.memory_space<vmem>>, vector<128x128xf32>
    %cst_207 = arith.constant dense<0.000000e+00> : vector<2x128xf32>
    %618 = tpu.matmul %616, %617, %cst_207 {dimension_numbers = #tpu.dot_dimension_numbers<[1], [0], [0], [1], [0, 0, 1, 1], [], []>} : vector<2x128xf32>, vector<128x128xf32>, vector<2x128xf32> -> vector<2x128xf32>
    %c0_208 = arith.constant 0 : index
    %c0_209 = arith.constant 0 : index
    %619 = vector.load %arg7[%c0_208, %c0_209] : memref<1x128xf32, #tpu.memory_space<vmem>>, vector<1x128xf32>
    %620 = vector.broadcast %619 : vector<1x128xf32> to vector<2x128xf32>
    %621 = arith.addf %618, %620 : vector<2x128xf32>
    %622 = arith.index_cast %c5_i32_195 : i32 to index
    %c0_210 = arith.constant 0 : index
    %c0_211 = arith.constant 0 : index
    %623 = vector.load %arg8[%622, %c0_210, %c0_211] : memref<7x2x128xf32, #tpu.memory_space<vmem>>, vector<1x2x128xf32>
    %624 = vector.shape_cast %623 : vector<1x2x128xf32> to vector<2x128xf32>
    %625 = vector.shape_cast %621 : vector<2x128xf32> to vector<1x2x128xf32>
    tpu.vector_store %arg8[%622, %c0_210, %c0_211], %625 {strides = array<i32>} : memref<7x2x128xf32, #tpu.memory_space<vmem>>, vector<1x2x128xf32>,
    %cst_212 = arith.constant dense<0xFF800000> : vector<2xf32>
    %626 = vector.multi_reduction <maximumf>, %621, %cst_212 [1] : vector<2x128xf32> to vector<2xf32>
    %627 = vector.shape_cast %626 : vector<2xf32> to vector<2x1xf32>
    %628 = vector.broadcast %627 : vector<2x1xf32> to vector<2x128xf32>
    %629 = arith.cmpf oeq, %621, %628 : vector<2x128xf32>
    %c128_i32_213 = arith.constant 128 : i32
    %630 = vector.broadcast %c128_i32_213 : i32 to vector<2x128xi32>
    %631 = arith.select %629, %249, %630 : vector<2x128xi1>, vector<2x128xi32>
    %cst_214 = arith.constant dense<2147483647> : vector<2xi32>
    %632 = vector.multi_reduction <minsi>, %631, %cst_214 [1] : vector<2x128xi32> to vector<2xi32>
    %633 = vector.shape_cast %632 : vector<2xi32> to vector<2x1xi32>
    %634 = vector.broadcast %633 : vector<2x1xi32> to vector<2x128xi32>
    %635 = arith.cmpi eq, %249, %634 : vector<2x128xi32>
    %636 = arith.extui %635 : vector<2x128xi1> to vector<2x128xi32>
    %637 = arith.sitofp %636 : vector<2x128xi32> to vector<2x128xf32>
    %c1_i32_215 = arith.constant 1 : i32
    %638 = arith.addi %c5_i32_195, %c1_i32_215 : i32
    %639 = arith.index_cast %638 : i32 to index
    %640 = memref.load %arg3[%639] : memref<8xi32, #tpu.memory_space<smem>>
    %c0_i32_216 = arith.constant 0 : i32
    %641 = arith.cmpi sgt, %640, %c0_i32_216 : i32
    %642 = arith.extui %641 : i1 to i32
    %643 = arith.sitofp %642 : i32 to f32
    %c1_i32_217 = arith.constant 1 : i32
    %644 = arith.addi %c5_i32_195, %c1_i32_217 : i32
    %645 = arith.index_cast %644 : i32 to index
    %c0_218 = arith.constant 0 : index
    %c0_219 = arith.constant 0 : index
    %646 = vector.load %arg2[%645, %c0_218, %c0_219] : memref<8x2x128xf32, #tpu.memory_space<vmem>>, vector<1x2x128xf32>
    %647 = vector.shape_cast %646 : vector<1x2x128xf32> to vector<2x128xf32>
    %648 = vector.broadcast %643 : f32 to vector<2x128xf32>
    %649 = arith.mulf %648, %647 : vector<2x128xf32>
    %cst_220 = arith.constant 1.000000e+00 : f32
    %650 = arith.subf %cst_220, %643 : f32
    %651 = vector.broadcast %650 : f32 to vector<2x128xf32>
    %652 = arith.mulf %651, %637 : vector<2x128xf32>
    %653 = arith.addf %649, %652 : vector<2x128xf32>
    %c6_i32_221 = arith.constant 6 : i32
    %c0_222 = arith.constant 0 : index
    %c0_223 = arith.constant 0 : index
    %654 = vector.load %arg4[%c0_222, %c0_223] : memref<128x512xf32, #tpu.memory_space<vmem>>, vector<128x512xf32>
    %cst_224 = arith.constant dense<0.000000e+00> : vector<2x512xf32>
    %655 = tpu.matmul %653, %654, %cst_224 {dimension_numbers = #tpu.dot_dimension_numbers<[1], [0], [0], [1], [0, 0, 1, 1], [], []>} : vector<2x128xf32>, vector<128x512xf32>, vector<2x512xf32> -> vector<2x512xf32>
    %c0_225 = arith.constant 0 : index
    %c0_226 = arith.constant 0 : index
    %656 = vector.load %arg5[%c0_225, %c0_226] : memref<128x512xf32, #tpu.memory_space<vmem>>, vector<128x512xf32>
    %cst_227 = arith.constant dense<0.000000e+00> : vector<2x512xf32>
    %657 = tpu.matmul %616, %656, %cst_227 {dimension_numbers = #tpu.dot_dimension_numbers<[1], [0], [0], [1], [0, 0, 1, 1], [], []>} : vector<2x128xf32>, vector<128x512xf32>, vector<2x512xf32> -> vector<2x512xf32>
    %658 = arith.addf %655, %657 : vector<2x512xf32>
    %659 = vector.extract_strided_slice %658 {offsets = [0, 0], sizes = [2, 128], strides = [1, 1]} : vector<2x512xf32> to vector<2x128xf32>
    %660 = arith.negf %659 : vector<2x128xf32>
    %661 = math.exp %660 : vector<2x128xf32>
    %cst_228 = arith.constant 1.000000e+00 : f32
    %662 = vector.broadcast %cst_228 : f32 to vector<2x128xf32>
    %663 = arith.addf %662, %661 : vector<2x128xf32>
    %664 = arith.divf %662, %663 : vector<2x128xf32>
    %665 = vector.extract_strided_slice %658 {offsets = [0, 128], sizes = [2, 128], strides = [1, 1]} : vector<2x512xf32> to vector<2x128xf32>
    %666 = arith.negf %665 : vector<2x128xf32>
    %667 = math.exp %666 : vector<2x128xf32>
    %cst_229 = arith.constant 1.000000e+00 : f32
    %668 = vector.broadcast %cst_229 : f32 to vector<2x128xf32>
    %669 = arith.addf %668, %667 : vector<2x128xf32>
    %670 = arith.divf %668, %669 : vector<2x128xf32>
    %671 = vector.extract_strided_slice %658 {offsets = [0, 256], sizes = [2, 128], strides = [1, 1]} : vector<2x512xf32> to vector<2x128xf32>
    %672 = math.tanh %671 : vector<2x128xf32>
    %673 = vector.extract_strided_slice %658 {offsets = [0, 384], sizes = [2, 128], strides = [1, 1]} : vector<2x512xf32> to vector<2x128xf32>
    %674 = arith.negf %673 : vector<2x128xf32>
    %675 = math.exp %674 : vector<2x128xf32>
    %cst_230 = arith.constant 1.000000e+00 : f32
    %676 = vector.broadcast %cst_230 : f32 to vector<2x128xf32>
    %677 = arith.addf %676, %675 : vector<2x128xf32>
    %678 = arith.divf %676, %677 : vector<2x128xf32>
    %679 = arith.mulf %670, %614 : vector<2x128xf32>
    %680 = arith.mulf %664, %672 : vector<2x128xf32>
    %681 = arith.addf %679, %680 : vector<2x128xf32>
    %682 = math.tanh %681 : vector<2x128xf32>
    %683 = arith.mulf %678, %682 : vector<2x128xf32>
    %c0_231 = arith.constant 0 : index
    %c0_232 = arith.constant 0 : index
    %684 = vector.load %arg6[%c0_231, %c0_232] : memref<128x128xf32, #tpu.memory_space<vmem>>, vector<128x128xf32>
    %cst_233 = arith.constant dense<0.000000e+00> : vector<2x128xf32>
    %685 = tpu.matmul %683, %684, %cst_233 {dimension_numbers = #tpu.dot_dimension_numbers<[1], [0], [0], [1], [0, 0, 1, 1], [], []>} : vector<2x128xf32>, vector<128x128xf32>, vector<2x128xf32> -> vector<2x128xf32>
    %c0_234 = arith.constant 0 : index
    %c0_235 = arith.constant 0 : index
    %686 = vector.load %arg7[%c0_234, %c0_235] : memref<1x128xf32, #tpu.memory_space<vmem>>, vector<1x128xf32>
    %687 = vector.broadcast %686 : vector<1x128xf32> to vector<2x128xf32>
    %688 = arith.addf %685, %687 : vector<2x128xf32>
    %689 = arith.index_cast %c6_i32_221 : i32 to index
    %c0_236 = arith.constant 0 : index
    %c0_237 = arith.constant 0 : index
    %690 = vector.load %arg8[%689, %c0_236, %c0_237] : memref<7x2x128xf32, #tpu.memory_space<vmem>>, vector<1x2x128xf32>
    %691 = vector.shape_cast %690 : vector<1x2x128xf32> to vector<2x128xf32>
    %692 = vector.shape_cast %688 : vector<2x128xf32> to vector<1x2x128xf32>
    tpu.vector_store %arg8[%689, %c0_236, %c0_237], %692 {strides = array<i32>} : memref<7x2x128xf32, #tpu.memory_space<vmem>>, vector<1x2x128xf32>,
    %cst_238 = arith.constant dense<0xFF800000> : vector<2xf32>
    %693 = vector.multi_reduction <maximumf>, %688, %cst_238 [1] : vector<2x128xf32> to vector<2xf32>
    %694 = vector.shape_cast %693 : vector<2xf32> to vector<2x1xf32>
    %695 = vector.broadcast %694 : vector<2x1xf32> to vector<2x128xf32>
    %696 = arith.cmpf oeq, %688, %695 : vector<2x128xf32>
    %c128_i32_239 = arith.constant 128 : i32
    %697 = vector.broadcast %c128_i32_239 : i32 to vector<2x128xi32>
    %698 = arith.select %696, %249, %697 : vector<2x128xi1>, vector<2x128xi32>
    %cst_240 = arith.constant dense<2147483647> : vector<2xi32>
    %699 = vector.multi_reduction <minsi>, %698, %cst_240 [1] : vector<2x128xi32> to vector<2xi32>
    %700 = vector.shape_cast %699 : vector<2xi32> to vector<2x1xi32>
    %701 = vector.broadcast %700 : vector<2x1xi32> to vector<2x128xi32>
    %702 = arith.cmpi eq, %249, %701 : vector<2x128xi32>
    %703 = arith.extui %702 : vector<2x128xi1> to vector<2x128xi32>
    %704 = arith.sitofp %703 : vector<2x128xi32> to vector<2x128xf32>
    %c1_i32_241 = arith.constant 1 : i32
    %705 = arith.addi %c6_i32_221, %c1_i32_241 : i32
    %706 = arith.index_cast %705 : i32 to index
    %707 = memref.load %arg3[%706] : memref<8xi32, #tpu.memory_space<smem>>
    %c0_i32_242 = arith.constant 0 : i32
    %708 = arith.cmpi sgt, %707, %c0_i32_242 : i32
    %709 = arith.extui %708 : i1 to i32
    %710 = arith.sitofp %709 : i32 to f32
    %c1_i32_243 = arith.constant 1 : i32
    %711 = arith.addi %c6_i32_221, %c1_i32_243 : i32
    %712 = arith.index_cast %711 : i32 to index
    %c0_244 = arith.constant 0 : index
    %c0_245 = arith.constant 0 : index
    %713 = vector.load %arg2[%712, %c0_244, %c0_245] : memref<8x2x128xf32, #tpu.memory_space<vmem>>, vector<1x2x128xf32>
    %714 = vector.shape_cast %713 : vector<1x2x128xf32> to vector<2x128xf32>
    %715 = vector.broadcast %710 : f32 to vector<2x128xf32>
    %716 = arith.mulf %715, %714 : vector<2x128xf32>
    %cst_246 = arith.constant 1.000000e+00 : f32
    %717 = arith.subf %cst_246, %710 : f32
    %718 = vector.broadcast %717 : f32 to vector<2x128xf32>
    %719 = arith.mulf %718, %704 : vector<2x128xf32>
    %720 = arith.addf %716, %719 : vector<2x128xf32>
    %c7_i32_247 = arith.constant 7 : i32
    return
  }
}

</mosaic_0001>

<bundles_post_ra>
// kernel: _lambda_.1
= control target key start
LH: loop header
LB: loop body
LE: loop exit
PB: predicated region body
PF: predicated region fallthrough
CT: control target
= control target key end

     0   :  { %13 = vsyncpa [#allocation3], 0  ;;  %s11429_s0 = inlined_call_operand.vmem [shape: f32[8,2,512], index: 0, kind: input, shape index: {}]   ;;  %s11430_s1 = inlined_call_operand.vmem [shape: f32[128,512], index: 1, kind: input, shape index: {}]   ;;  %s11431_s2 = inlined_call_operand.vmem [shape: f32[8,2,128], index: 2, kind: input, shape index: {}]   ;;  %s11432_s3 = inlined_call_operand.vmem [shape: s32[8], index: 3, kind: input, shape index: {}]   ;;  %s11433_s4 = inlined_call_operand.vmem [shape: f32[128,512], index: 4, kind: input, shape index: {}]   ;;  %s11434_s5 = inlined_call_operand.vmem [shape: f32[128,512], index: 5, kind: input, shape index: {}]   ;;  %s11435_s6 = inlined_call_operand.vmem [shape: f32[128,128], index: 6, kind: input, shape index: {}]   ;;  %s11436_s7 = inlined_call_operand.vmem [shape: f32[1,128], index: 7, kind: input, shape index: {}]   ;;  %s11437_s8 = inlined_call_operand.vmem [shape: f32[7,2,128], index: 8, kind: output, shape index: {}]  }
   0x1   :  { %s26_s29 = sshll.u32 %s11432_s3, 4  ;;  %s27_s29 = int_to_ptr.vmem [resolvable:$true] %s26_s29 }
   0x2   :  { %s7920_s30 = scalar_lea.vmem %s27_s29, 16  ;;  %p7925_p1 = scmp.lt.s32.totalorder %s27_s29, %s27_s29 }
   0x3   :  { %p7921_p0 = scmp.ne.s32.totalorder %s27_s29, %s7920_s30  ;;  %p7926_p2 = scmp.lt.s32.totalorder %s7920_s30, %s7920_s30 }
   0x5   :  { %p7927_p3 = por %p7926_p2, %p7925_p1 }
   0x7   :  { %p7928_p4 = pnand %p7927_p3, %p7921_p0 }
   0x9   :  { %7931 = shalt.err (!%p7928_p4)
}
   0xa   :  { %s7934_s9 = smov [#allocation2]  }
   0xb   :  { %29 = dma.vmem_to_smem %s27_s29, 16, %s7934_s9, [#allocation3]  }
   0xc   :  { %7932 = dma.done.wait [#allocation3], 16  }
   0xd   :  { %7933 = vsyncadd [#allocation3], 4294967280 }
   0xe   :  { %41 = sfence }
   0xf   :  { %v44_v0 = vld [vmem:[%s11430_s1 + $0x8] sm:$0xff]  ;;  %v46_v2 = vld [vmem:[%s11430_s1 + $0x18] sm:$0xff]  ;;  %v43_v5 = vld [vmem:[%s11430_s1] sm:$0xff]  ;;  %v11439_v7 = vmov 0.0   ;;  %vm7938_vm0 = vmmov 0   ;;  %vm2222_vm1 = vcmask 1041408  }
  0x10   :  { %v48_v1 = vld [vmem:[%s11430_s1 + $0x28] sm:$0xff]  ;;  %v50_v4 = vld [vmem:[%s11430_s1 + $0x38] sm:$0xff]  ;;  %v47_v6 = vld [vmem:[%s11430_s1 + $0x20] sm:$0xff]  ;;  %171 = vmatprep.mubr.f32.mxu0 %v11439_v7  ;;  %242 = vmatprep.mubr.f32.mxu1 %v11439_v7  ;;  %s5660_s3 = sld [smem:[#allocation2 + $0x1]]  ;;  %s5668_s26 = sld [smem:[#allocation2 + $0x2]] }
  0x11   :  { %v7996_v3 = vpack.c.bf16 %v48_v1, %v44_v0  ;;  %v8009_v8 = vpack.c.bf16 %v50_v4, %v46_v2  ;;  %v8011_v9 = vpack.c.bf16 %v47_v6, %v43_v5  ;;  %v45_v10 = vld [vmem:[%s11430_s1 + $0x10] sm:$0xff]  ;;  %v52_v12 = vld [vmem:[%s11430_s1 + $0x48] sm:$0xff]  ;;  %v54_v15 = vld [vmem:[%s11430_s1 + $0x58] sm:$0xff]  ;;  %s5676_s19 = sld [smem:[#allocation2 + $0x3]]  ;;  %s5684_s9 = sld [smem:[#allocation2 + $0x4]] }
  0x12   :  { %v49_v11 = vld [vmem:[%s11430_s1 + $0x30] sm:$0xff]  ;;  %v56_v14 = vld [vmem:[%s11430_s1 + $0x68] sm:$0xff]  ;;  %v58_v16 = vld [vmem:[%s11430_s1 + $0x78] sm:$0xff]  ;;  %s5692_s24 = sld [smem:[#allocation2 + $0x5]] }
  0x13   :  { %6072 = vmatprep.subr.bf16.mxu0 %v7996_v3  ;;  %v8023_v13 = vpack.c.bf16 %v49_v11, %v45_v10  ;;  %6104 = vmatprep.subr.bf16.mxu1 %v8009_v8  ;;  %v8036_v17 = vpack.c.bf16 %v56_v14, %v52_v12  ;;  %v8038_v18 = vpack.c.bf16 %v58_v16, %v54_v15  ;;  %v51_v19 = vld [vmem:[%s11430_s1 + $0x40] sm:$0xff]  ;;  %v53_v21 = vld [vmem:[%s11430_s1 + $0x50] sm:$0xff]  ;;  %v60_v24 = vld [vmem:[%s11430_s1 + $0x88] sm:$0xff] }
  0x14   :  { %6074 = vmatpush1.bf16.msra.mxu0 %v8011_v9  ;;  %v55_v20 = vld [vmem:[%s11430_s1 + $0x60] sm:$0xff]  ;;  %v57_v23 = vld [vmem:[%s11430_s1 + $0x70] sm:$0xff]  ;;  %v64_v25 = vld [vmem:[%s11430_s1 + $0xa8] sm:$0xff] }
  0x15   :  { %6106 = vmatpush1.bf16.msra.mxu1 %v8023_v13  ;;  %v8050_v22 = vpack.c.bf16 %v55_v20, %v51_v19  ;;  %6076 = vmatprep.subr.bf16.mxu0 %v8036_v17  ;;  %v8063_v26 = vpack.c.bf16 %v57_v23, %v53_v21  ;;  %v8065_v27 = vpack.c.bf16 %v64_v25, %v60_v24  ;;  %v62_v28 = vld [vmem:[%s11430_s1 + $0x98] sm:$0xff]  ;;  %v59_v30 = vld [vmem:[%s11430_s1 + $0x80] sm:$0xff]  ;;  %v61_v33 = vld [vmem:[%s11430_s1 + $0x90] sm:$0xff] }
  0x16   :  { %6108 = vmatprep.subr.bf16.mxu1 %v8038_v18  ;;  %v66_v29 = vld [vmem:[%s11430_s1 + $0xb8] sm:$0xff]  ;;  %v63_v32 = vld [vmem:[%s11430_s1 + $0xa0] sm:$0xff]  ;;  %v65_v34 = vld [vmem:[%s11430_s1 + $0xb0] sm:$0xff]  ;;  %p2247_p5 = scmp.gt.s32.totalorder %s5660_s3, 0  ;;  %p2813_p6 = scmp.gt.s32.totalorder %s5668_s26, 0 }
  0x17   :  { %v8076_v31 = vpack.c.bf16 %v66_v29, %v62_v28  ;;  %v8088_v35 = vpack.c.bf16 %v63_v32, %v59_v30  ;;  %v68_v36 = vld [vmem:[%s11430_s1 + $0xc8] sm:$0xff]  ;;  %v70_v38 = vld [vmem:[%s11430_s1 + $0xd8] sm:$0xff]  ;;  %v8101_v39 = vpack.c.bf16 %v65_v34, %v61_v33  ;;  %v67_v42 = vld [vmem:[%s11430_s1 + $0xc0] sm:$0xff]  ;;  %p3379_p7 = scmp.gt.s32.totalorder %s5676_s19, 0  ;;  %p3945_p8 = scmp.gt.s32.totalorder %s5684_s9, 0 }
  0x18   :  { %6078 = vmatpush1.bf16.msra.mxu0 %v8050_v22  ;;  %v72_v37 = vld [vmem:[%s11430_s1 + $0xe8] sm:$0xff]  ;;  %v74_v41 = vld [vmem:[%s11430_s1 + $0xf8] sm:$0xff]  ;;  %v71_v43 = vld [vmem:[%s11430_s1 + $0xe0] sm:$0xff]  ;;  %s2248_s14 = scalar_select %p2247_p5, 1, 0 }
  0x19   :  { %6110 = vmatpush1.bf16.msra.mxu1 %v8063_v26  ;;  %6080 = vmatprep.subr.bf16.mxu0 %v8065_v27  ;;  %v8103_v40 = vpack.c.bf16 %v72_v37, %v68_v36  ;;  %v8115_v44 = vpack.c.bf16 %v74_v41, %v70_v38  ;;  %v69_v45 = vld [vmem:[%s11430_s1 + $0xd0] sm:$0xff]  ;;  %v76_v47 = vld [vmem:[%s11430_s1 + $0x108] sm:$0xff]  ;;  %v78_v49 = vld [vmem:[%s11430_s1 + $0x118] sm:$0xff]  ;;  %v8136_v51 = vpack.c.bf16 %v71_v43, %v67_v42  ;;  %s2814_s27 = scalar_select %p2813_p6, 1, 0 }
  0x1a   :  { %6112 = vmatprep.subr.bf16.mxu1 %v8076_v31  ;;  %v73_v46 = vld [vmem:[%s11430_s1 + $0xf0] sm:$0xff]  ;;  %v80_v48 = vld [vmem:[%s11430_s1 + $0x128] sm:$0xff]  ;;  %v82_v50 = vld [vmem:[%s11430_s1 + $0x138] sm:$0xff]  ;;  %s2249_s15 = scvt.s32.f32 %s2248_s14  ;;  %p4511_p9 = scmp.gt.s32.totalorder %s5692_s24, 0 }
  0x1b   :  { %v8140_v52 = vpack.c.bf16 %v73_v46, %v69_v45  ;;  %v8142_v53 = vpack.c.bf16 %v80_v48, %v76_v47  ;;  %v75_v54 = vld [vmem:[%s11430_s1 + $0x100] sm:$0xff]  ;;  %v77_v56 = vld [vmem:[%s11430_s1 + $0x110] sm:$0xff]  ;;  %v8154_v57 = vpack.c.bf16 %v82_v50, %v78_v49  ;;  %v84_v59 = vld [vmem:[%s11430_s1 + $0x148] sm:$0xff]  ;;  %v7936_v48 = vmov 1983009808   ;;  %s2815_s28 = scvt.s32.f32 %s2814_s27 }
  0x1c   :  { %6082 = vmatpush1.bf16.msra.mxu0 %v8088_v35  ;;  %v79_v55 = vld [vmem:[%s11430_s1 + $0x120] sm:$0xff]  ;;  %v81_v58 = vld [vmem:[%s11430_s1 + $0x130] sm:$0xff]  ;;  %v88_v60 = vld [vmem:[%s11430_s1 + $0x168] sm:$0xff]  ;;  %v256_v49 = vunpack.c.l.s4 %v7936_v48  ;;  %v11438_v50 = vlaneseq  ;;  %s2254_s16 = ssub.f32 1.0, %s2249_s15 }
  0x1d   :  { %6114 = vmatpush1.bf16.msra.mxu1 %v8101_v39  ;;  %6084 = vmatprep.subr.bf16.mxu0 %v8103_v40  ;;  %v86_v61 = vld [vmem:[%s11430_s1 + $0x158] sm:$0xff]  ;;  %v8172_v63 = vpack.c.bf16 %v79_v55, %v75_v54  ;;  %v8176_v0 = vpack.c.bf16 %v81_v58, %v77_v56  ;;  %v8178_v1 = vpack.c.bf16 %v88_v60, %v84_v59  ;;  %v83_v2 = vld [vmem:[%s11430_s1 + $0x140] sm:$0xff]  ;;  %v85_v5 = vld [vmem:[%s11430_s1 + $0x150] sm:$0xff]  ;;  %s3380_s20 = scalar_select %p3379_p7, 1, 0 }
  0x1e   :  { %6116 = vmatprep.subr.bf16.mxu1 %v8115_v44  ;;  %v90_v62 = vld [vmem:[%s11430_s1 + $0x178] sm:$0xff]  ;;  %v87_v4 = vld [vmem:[%s11430_s1 + $0x160] sm:$0xff]  ;;  %v89_v10 = vld [vmem:[%s11430_s1 + $0x170] sm:$0xff]  ;;  %v257_v54 = vunpack.c.0.s8 %v256_v49  ;;  %v259_v55 = vshrl.u32 %v11438_v50, 7  ;;  %s3946_s10 = scalar_select %p3945_p8, 1, 0 }
  0x1f   :  { %v8190_v6 = vpack.c.bf16 %v90_v62, %v86_v61  ;;  %v92_v11 = vld [vmem:[%s11430_s1 + $0x188] sm:$0xff]  ;;  %v94_v14 = vld [vmem:[%s11430_s1 + $0x198] sm:$0xff]  ;;  %v8208_v16 = vpack.c.bf16 %v87_v4, %v83_v2  ;;  %v8212_v19 = vpack.c.bf16 %v89_v10, %v85_v5  ;;  %v91_v21 = vld [vmem:[%s11430_s1 + $0x180] sm:$0xff]  ;;  %s3381_s21 = scvt.s32.f32 %s3380_s20 }
  0x20   :  { %6086 = vmatpush1.bf16.msra.mxu0 %v8136_v51  ;;  %v96_v12 = vld [vmem:[%s11430_s1 + $0x1a8] sm:$0xff]  ;;  %v98_v15 = vld [vmem:[%s11430_s1 + $0x1b8] sm:$0xff]  ;;  %v95_v23 = vld [vmem:[%s11430_s1 + $0x1a0] sm:$0xff]  ;;  %v8316_v58 = vsub.s32 %v257_v54, %v259_v55  ;;  %s3947_s11 = scvt.s32.f32 %s3946_s10  ;;  %s5700_s10 = sld [smem:[#allocation2 + $0x6]] }
  0x21   :  { %6118 = vmatpush1.bf16.msra.mxu1 %v8140_v52  ;;  %6088 = vmatprep.subr.bf16.mxu0 %v8142_v53  ;;  %v8214_v20 = vpack.c.bf16 %v96_v12, %v92_v11  ;;  %v93_v24 = vld [vmem:[%s11430_s1 + $0x190] sm:$0xff]  ;;  %v8226_v25 = vpack.c.bf16 %v98_v15, %v94_v14  ;;  %v100_v29 = vld [vmem:[%s11430_s1 + $0x1c8] sm:$0xff]  ;;  %v102_v32 = vld [vmem:[%s11430_s1 + $0x1d8] sm:$0xff]  ;;  %v8244_v34 = vpack.c.bf16 %v95_v23, %v91_v21  ;;  %s4512_s25 = scalar_select %p4511_p9, 1, 0 }
  0x22   :  { %6120 = vmatprep.subr.bf16.mxu1 %v8154_v57  ;;  %v97_v28 = vld [vmem:[%s11430_s1 + $0x1b0] sm:$0xff]  ;;  %v104_v30 = vld [vmem:[%s11430_s1 + $0x1e8] sm:$0xff]  ;;  %v106_v33 = vld [vmem:[%s11430_s1 + $0x1f8] sm:$0xff]  ;;  %s3952_s12 = ssub.f32 1.0, %s3947_s11 }
  0x23   :  { %v8248_v36 = vpack.c.bf16 %v97_v28, %v93_v24  ;;  %v8250_v37 = vpack.c.bf16 %v104_v30, %v100_v29  ;;  %v99_v38 = vld [vmem:[%s11430_s1 + $0x1c0] sm:$0xff]  ;;  %v8259_v42 = vpack.c.bf16 %v106_v33, %v102_v32  ;;  %v101_v43 = vld [vmem:[%s11430_s1 + $0x1d0] sm:$0xff]  ;;  %s4513_s26 = scvt.s32.f32 %s4512_s25 }
  0x24   :  { %6090 = vmatpush1.bf16.msra.mxu0 %v8172_v63  ;;  %v103_v41 = vld [vmem:[%s11430_s1 + $0x1e0] sm:$0xff]  ;;  %v105_v45 = vld [vmem:[%s11430_s1 + $0x1f0] sm:$0xff]  ;;  %s3386_s1 = ssub.f32 1.0, %s3381_s21 }
  0x25   :  { %6122 = vmatpush1.bf16.msra.mxu1 %v8176_v0  ;;  %6092 = vmatprep.subr.bf16.mxu0 %v8178_v1  ;;  %v8268_v46 = vpack.c.bf16 %v103_v41, %v99_v38  ;;  %v8272_v47 = vpack.c.bf16 %v105_v45, %v101_v43  ;;  %v42_v10 = vld [vmem:[%s11429_s0] sm:$0xff]  ;;  %s4518_s27 = ssub.f32 1.0, %s4513_s26 }
  0x26   :  { %6124 = vmatprep.subr.bf16.mxu1 %v8190_v6  ;;  %v1736_v50 = vld [vmem:[%s11433_s4 + $0x160] sm:$0xff]  ;;  %p5077_p10 = scmp.gt.s32.totalorder %s5700_s10, 0 }
  0x28   :  { %6094 = vmatpush1.bf16.msra.mxu0 %v8208_v16 }
  0x29   :  { %6126 = vmatpush1.bf16.msra.mxu1 %v8212_v19  ;;  %6096 = vmatprep.subr.bf16.mxu0 %v8214_v20 }
  0x2a   :  { %6128 = vmatprep.subr.bf16.mxu1 %v8226_v25 }
  0x2c   :  { %6098 = vmatpush1.bf16.msra.mxu0 %v8244_v34 }
  0x2d   :  { %6130 = vmatpush1.bf16.msra.mxu1 %v8248_v36  ;;  %6100 = vmatprep.subr.bf16.mxu0 %v8250_v37 }
  0x2e   :  { %6132 = vmatprep.subr.bf16.mxu1 %v8259_v42 }
  0x30   :  { %6102 = vmatpush1.bf16.msra.mxu0 %v8268_v46 }
  0x31   :  { %6134 = vmatpush1.bf16.msra.mxu1 %v8272_v47  ;;  %6136 = vmatprep.subr.bf16.mxu0 %v7996_v3 }
  0x32   :  { %6168 = vmatprep.subr.bf16.mxu1 %v8009_v8 }
  0x33   :  { %172 = vmatmul.mubr.f32.vlgmr.msra.gmra.mrb[0].mxu0 %v11439_v7 }
  0x34   :  { %243 = vmatmul.mubr.f32.vlgmr.msra.gmra.mrb[0].mxu1 %v11439_v7  ;;  %6138 = vmatpush1.bf16.msra.mxu0 %v8011_v9 }
  0x35   :  { %6170 = vmatpush1.bf16.msra.mxu1 %v8023_v13  ;;  %6140 = vmatprep.subr.bf16.mxu0 %v8036_v17 }
  0x36   :  { %6172 = vmatprep.subr.bf16.mxu1 %v8038_v18  ;;  %369 = vmatprep.mubr.f32.mxu0 %v11439_v7 }
  0x37   :  { %440 = vmatprep.mubr.f32.mxu1 %v11439_v7 }
  0x38   :  { %6142 = vmatpush1.bf16.msra.mxu0 %v8050_v22 }
  0x39   :  { %6174 = vmatpush1.bf16.msra.mxu1 %v8063_v26  ;;  %6144 = vmatprep.subr.bf16.mxu0 %v8065_v27 }
  0x3a   :  { %6176 = vmatprep.subr.bf16.mxu1 %v8076_v31 }
  0x3c   :  { %6146 = vmatpush1.bf16.msra.mxu0 %v8088_v35 }
  0x3d   :  { %6178 = vmatpush1.bf16.msra.mxu1 %v8101_v39  ;;  %6148 = vmatprep.subr.bf16.mxu0 %v8103_v40 }
  0x3e   :  { %6180 = vmatprep.subr.bf16.mxu1 %v8115_v44 }
  0x40   :  { %6150 = vmatpush1.bf16.msra.mxu0 %v8136_v51 }
  0x41   :  { %6182 = vmatpush1.bf16.msra.mxu1 %v8140_v52  ;;  %6152 = vmatprep.subr.bf16.mxu0 %v8142_v53 }
  0x42   :  { %6184 = vmatprep.subr.bf16.mxu1 %v8154_v57 }
  0x44   :  { %6154 = vmatpush1.bf16.msra.mxu0 %v8172_v63 }
  0x45   :  { %6186 = vmatpush1.bf16.msra.mxu1 %v8176_v0  ;;  %6156 = vmatprep.subr.bf16.mxu0 %v8178_v1 }
  0x46   :  { %6188 = vmatprep.subr.bf16.mxu1 %v8190_v6 }
  0x48   :  { %6158 = vmatpush1.bf16.msra.mxu0 %v8208_v16 }
  0x49   :  { %6190 = vmatpush1.bf16.msra.mxu1 %v8212_v19  ;;  %6160 = vmatprep.subr.bf16.mxu0 %v8214_v20 }
  0x4a   :  { %6192 = vmatprep.subr.bf16.mxu1 %v8226_v25 }
  0x4c   :  { %6162 = vmatpush1.bf16.msra.mxu0 %v8244_v34 }
  0x4d   :  { %6194 = vmatpush1.bf16.msra.mxu1 %v8248_v36  ;;  %6164 = vmatprep.subr.bf16.mxu0 %v8250_v37 }
  0x4e   :  { %6196 = vmatprep.subr.bf16.mxu1 %v8259_v42 }
  0x50   :  { %6166 = vmatpush1.bf16.msra.mxu0 %v8268_v46 }
  0x51   :  { %6198 = vmatpush1.bf16.msra.mxu1 %v8272_v47  ;;  %6200 = vmatprep.subr.bf16.mxu0 %v7996_v3 }
  0x52   :  { %6232 = vmatprep.subr.bf16.mxu1 %v8009_v8 }
 0x106   :  { %v173_v56 = vpop.f32.mrb[0].mxu0 }
 0x107   :  { %v244_v59 = vpop.f32.mrb[0].mxu1  ;;  %v175_v60 = vpop.f32.mrb[1].mxu0 }
 0x108   :  { %v253_v61 = vcombine.low %v173_v56, %v175_v60  ;;  %v246_v62 = vpop.f32.mrb[1].mxu1 }
 0x109   :  { %v254_v2 = vcombine.low %v244_v59, %v246_v62 }
 0x10a   :  { %v261_v4 = vrot.slane %v253_v61, %v8316_v58 }
 0x10b   :  { %v268_v5 = vrot.slane %v254_v2, %v8316_v58 }
 0x10d   :  { %v269_v11 = vcombine.low %v261_v4, %v268_v5 }
 0x10f   :  { %v271_v12 = vadd.f32 %v269_v11, %v42_v10 }
 0x111   :  { %v5624_v14 = vmul.f32 -1.442695, %v271_v12  ;;  %v279_v15 = vrot.slane %v271_v12, 2  ;;  %v290_v23 = vrot.slane %v271_v12, 6  ;;  %v287_v29 = vrot.slane %v271_v12, 4 }
 0x113   :  { %7680 = vpow2.f32 %v5624_v14  ;;  %v5625_v21 = vmul.f32 -1.442695, %v279_v15  ;;  %v5626_v24 = vmul.f32 -1.442695, %v290_v23  ;;  %v5627_v14 = vld [vmem:[%s11429_s0 + $0x8] sm:$0xff] }
 0x115   :  { %7682 = vpow2.f32 %v5625_v21 }
 0x116   :  { %7684 = vpow2.f32 %v5626_v24 }
 0x11d   :  { %v7681_v28 = vpop.eup %7680 }
 0x11e   :  { %v275_v30 = vadd.f32 1.0, %v7681_v28 }
 0x11f   :  { %v7683_v32 = vpop.eup %7682 }
 0x120   :  { %7686 = vrcp.f32 %v275_v30  ;;  %v284_v33 = vadd.f32 1.0, %v7683_v32  ;;  %v7685_v38 = vpop.eup %7684 }
 0x121   :  { %7688 = vtanh.f32 %v287_v29  ;;  %v295_v48 = vadd.f32 1.0, %v7685_v38 }
 0x122   :  { %7690 = vrcp.f32 %v284_v33 }
 0x123   :  { %7692 = vrcp.f32 %v295_v48 }
 0x12a   :  { %v7687_v41 = vpop.eup %7686 }
 0x12b   :  { %v7689_v43 = vpop.eup %7688 }
 0x12c   :  { %v7691_v45 = vpop.eup %7690  ;;  %v299_v54 = vmul.f32 %v7689_v43, %v7687_v41 }
 0x12d   :  { %v298_v49 = vmul.f32 0.0, %v7691_v45  ;;  %v7693_v56 = vpop.eup %7692 }
 0x12f   :  { %v8323_v55 = vadd.f32 %v299_v54, %v298_v49 }
 0x131   :  { %7694 = vtanh.f32 %v8323_v55 }
 0x13b   :  { %v7695_v59 = vpop.eup %7694 }
 0x13c   :  { %v302_v60 = vmul.f32 %v7695_v59, %v7693_v56 }
 0x13e   :  { %370 = vmatmul.mubr.f32.vlgmr.msra.gmra.mrb[2].mxu0 %v302_v60  ;;  %441 = vmatmul.mubr.f32.vlgmr.msra.gmra.mrb[2].mxu1 %v302_v60 }
 0x13f   :  { %6202 = vmatpush1.bf16.msra.mxu0 %v8011_v9  ;;  %6234 = vmatpush1.bf16.msra.mxu1 %v8023_v13 }
 0x140   :  { %6204 = vmatprep.subr.bf16.mxu0 %v8036_v17  ;;  %6236 = vmatprep.subr.bf16.mxu1 %v8038_v18 }
 0x141   :  { %567 = vmatprep.mubr.f32.mxu0 %v11439_v7  ;;  %638 = vmatprep.mubr.f32.mxu1 %v11439_v7 }
 0x143   :  { %6206 = vmatpush1.bf16.msra.mxu0 %v8050_v22  ;;  %6238 = vmatpush1.bf16.msra.mxu1 %v8063_v26 }
 0x144   :  { %6208 = vmatprep.subr.bf16.mxu0 %v8065_v27  ;;  %6240 = vmatprep.subr.bf16.mxu1 %v8076_v31 }
 0x147   :  { %6210 = vmatpush1.bf16.msra.mxu0 %v8088_v35  ;;  %6242 = vmatpush1.bf16.msra.mxu1 %v8101_v39 }
 0x148   :  { %6212 = vmatprep.subr.bf16.mxu0 %v8103_v40  ;;  %6244 = vmatprep.subr.bf16.mxu1 %v8115_v44 }
 0x14b   :  { %6214 = vmatpush1.bf16.msra.mxu0 %v8136_v51  ;;  %6246 = vmatpush1.bf16.msra.mxu1 %v8140_v52 }
 0x14c   :  { %6216 = vmatprep.subr.bf16.mxu0 %v8142_v53  ;;  %6248 = vmatprep.subr.bf16.mxu1 %v8154_v57 }
 0x14f   :  { %6218 = vmatpush1.bf16.msra.mxu0 %v8172_v63  ;;  %6250 = vmatpush1.bf16.msra.mxu1 %v8176_v0 }
 0x150   :  { %6220 = vmatprep.subr.bf16.mxu0 %v8178_v1  ;;  %6252 = vmatprep.subr.bf16.mxu1 %v8190_v6 }
 0x153   :  { %6222 = vmatpush1.bf16.msra.mxu0 %v8208_v16  ;;  %6254 = vmatpush1.bf16.msra.mxu1 %v8212_v19 }
 0x154   :  { %6224 = vmatprep.subr.bf16.mxu0 %v8214_v20  ;;  %6256 = vmatprep.subr.bf16.mxu1 %v8226_v25 }
 0x157   :  { %6226 = vmatpush1.bf16.msra.mxu0 %v8244_v34  ;;  %6258 = vmatpush1.bf16.msra.mxu1 %v8248_v36 }
 0x158   :  { %6228 = vmatprep.subr.bf16.mxu0 %v8250_v37  ;;  %6260 = vmatprep.subr.bf16.mxu1 %v8259_v42 }
 0x15b   :  { %6230 = vmatpush1.bf16.msra.mxu0 %v8268_v46  ;;  %6262 = vmatpush1.bf16.msra.mxu1 %v8272_v47 }
 0x15c   :  { %6264 = vmatprep.subr.bf16.mxu0 %v7996_v3  ;;  %6296 = vmatprep.subr.bf16.mxu1 %v8009_v8 }
 0x211   :  { %v371_v61 = vpop.f32.mrb[2].mxu0  ;;  %v442_v62 = vpop.f32.mrb[2].mxu1 }
 0x212   :  { %v373_v2 = vpop.f32.mrb[3].mxu0  ;;  %v444_v4 = vpop.f32.mrb[3].mxu1 }
 0x213   :  { %v451_v5 = vcombine.low %v371_v61, %v373_v2  ;;  %v452_v10 = vcombine.low %v442_v62, %v444_v4 }
 0x215   :  { %v459_v11 = vrot.slane %v451_v5, %v8316_v58  ;;  %v466_v12 = vrot.slane %v452_v10, %v8316_v58 }
 0x217   :  { %v467_v15 = vcombine.low %v459_v11, %v466_v12 }
 0x219   :  { %v469_v21 = vadd.f32 %v5627_v14, %v467_v15 }
 0x21b   :  { %v5628_v23 = vmul.f32 -1.442695, %v469_v21  ;;  %v477_v24 = vrot.slane %v469_v21, 2  ;;  %v488_v29 = vrot.slane %v469_v21, 6  ;;  %v485_v33 = vrot.slane %v469_v21, 4 }
 0x21d   :  { %7696 = vpow2.f32 %v5628_v23  ;;  %v5629_v28 = vmul.f32 -1.442695, %v477_v24  ;;  %v5630_v30 = vmul.f32 -1.442695, %v488_v29  ;;  %v5631_v23 = vld [vmem:[%s11429_s0 + $0x10] sm:$0xff] }
 0x21f   :  { %7698 = vpow2.f32 %v5629_v28 }
 0x220   :  { %7700 = vpow2.f32 %v5630_v30 }
 0x227   :  { %v7697_v32 = vpop.eup %7696 }
 0x228   :  { %v473_v38 = vadd.f32 1.0, %v7697_v32 }
 0x229   :  { %v7699_v41 = vpop.eup %7698 }
 0x22a   :  { %7702 = vrcp.f32 %v473_v38  ;;  %v482_v43 = vadd.f32 1.0, %v7699_v41  ;;  %v7701_v45 = vpop.eup %7700 }
 0x22b   :  { %7704 = vtanh.f32 %v485_v33  ;;  %v493_v56 = vadd.f32 1.0, %v7701_v45 }
 0x22c   :  { %7706 = vrcp.f32 %v482_v43 }
 0x22d   :  { %7708 = vrcp.f32 %v493_v56 }
 0x234   :  { %v7703_v48 = vpop.eup %7702 }
 0x235   :  { %v7705_v49 = vpop.eup %7704 }
 0x236   :  { %v7707_v54 = vpop.eup %7706  ;;  %v497_v60 = vmul.f32 %v7705_v49, %v7703_v48 }
 0x237   :  { %v496_v59 = vmul.f32 %v7707_v54, %v8323_v55  ;;  %v7709_v62 = vpop.eup %7708 }
 0x239   :  { %v8366_v61 = vadd.f32 %v497_v60, %v496_v59 }
 0x23b   :  { %7710 = vtanh.f32 %v8366_v61 }
 0x245   :  { %v7711_v2 = vpop.eup %7710 }
 0x246   :  { %v500_v4 = vmul.f32 %v7711_v2, %v7709_v62 }
 0x248   :  { %568 = vmatmul.mubr.f32.vlgmr.msra.gmra.mrb[4].mxu0 %v500_v4  ;;  %639 = vmatmul.mubr.f32.vlgmr.msra.gmra.mrb[4].mxu1 %v500_v4 }
 0x249   :  { %6266 = vmatpush1.bf16.msra.mxu0 %v8011_v9  ;;  %6298 = vmatpush1.bf16.msra.mxu1 %v8023_v13 }
 0x24a   :  { %6268 = vmatprep.subr.bf16.mxu0 %v8036_v17  ;;  %6300 = vmatprep.subr.bf16.mxu1 %v8038_v18 }
 0x24b   :  { %765 = vmatprep.mubr.f32.mxu0 %v11439_v7  ;;  %836 = vmatprep.mubr.f32.mxu1 %v11439_v7 }
 0x24d   :  { %6270 = vmatpush1.bf16.msra.mxu0 %v8050_v22  ;;  %6302 = vmatpush1.bf16.msra.mxu1 %v8063_v26 }
 0x24e   :  { %6272 = vmatprep.subr.bf16.mxu0 %v8065_v27  ;;  %6304 = vmatprep.subr.bf16.mxu1 %v8076_v31 }
 0x251   :  { %6274 = vmatpush1.bf16.msra.mxu0 %v8088_v35  ;;  %6306 = vmatpush1.bf16.msra.mxu1 %v8101_v39 }
 0x252   :  { %6276 = vmatprep.subr.bf16.mxu0 %v8103_v40  ;;  %6308 = vmatprep.subr.bf16.mxu1 %v8115_v44 }
 0x255   :  { %6278 = vmatpush1.bf16.msra.mxu0 %v8136_v51  ;;  %6310 = vmatpush1.bf16.msra.mxu1 %v8140_v52 }
 0x256   :  { %6280 = vmatprep.subr.bf16.mxu0 %v8142_v53  ;;  %6312 = vmatprep.subr.bf16.mxu1 %v8154_v57 }
 0x259   :  { %6282 = vmatpush1.bf16.msra.mxu0 %v8172_v63  ;;  %6314 = vmatpush1.bf16.msra.mxu1 %v8176_v0 }
 0x25a   :  { %6284 = vmatprep.subr.bf16.mxu0 %v8178_v1  ;;  %6316 = vmatprep.subr.bf16.mxu1 %v8190_v6 }
 0x25d   :  { %6286 = vmatpush1.bf16.msra.mxu0 %v8208_v16  ;;  %6318 = vmatpush1.bf16.msra.mxu1 %v8212_v19 }
 0x25e   :  { %6288 = vmatprep.subr.bf16.mxu0 %v8214_v20  ;;  %6320 = vmatprep.subr.bf16.mxu1 %v8226_v25 }
 0x261   :  { %6290 = vmatpush1.bf16.msra.mxu0 %v8244_v34  ;;  %6322 = vmatpush1.bf16.msra.mxu1 %v8248_v36 }
 0x262   :  { %6292 = vmatprep.subr.bf16.mxu0 %v8250_v37  ;;  %6324 = vmatprep.subr.bf16.mxu1 %v8259_v42 }
 0x265   :  { %6294 = vmatpush1.bf16.msra.mxu0 %v8268_v46  ;;  %6326 = vmatpush1.bf16.msra.mxu1 %v8272_v47 }
 0x266   :  { %6328 = vmatprep.subr.bf16.mxu0 %v7996_v3  ;;  %6360 = vmatprep.subr.bf16.mxu1 %v8009_v8 }
 0x31b   :  { %v569_v55 = vpop.f32.mrb[4].mxu0  ;;  %v640_v5 = vpop.f32.mrb[4].mxu1 }
 0x31c   :  { %v571_v10 = vpop.f32.mrb[5].mxu0  ;;  %v642_v11 = vpop.f32.mrb[5].mxu1 }
 0x31d   :  { %v649_v12 = vcombine.low %v569_v55, %v571_v10  ;;  %v650_v14 = vcombine.low %v640_v5, %v642_v11 }
 0x31f   :  { %v657_v15 = vrot.slane %v649_v12, %v8316_v58  ;;  %v664_v21 = vrot.slane %v650_v14, %v8316_v58 }
 0x321   :  { %v665_v24 = vcombine.low %v657_v15, %v664_v21 }
 0x323   :  { %v667_v28 = vadd.f32 %v5631_v23, %v665_v24 }
 0x325   :  { %v5632_v29 = vmul.f32 -1.442695, %v667_v28  ;;  %v675_v30 = vrot.slane %v667_v28, 2  ;;  %v686_v33 = vrot.slane %v667_v28, 6  ;;  %v683_v43 = vrot.slane %v667_v28, 4 }
 0x327   :  { %7712 = vpow2.f32 %v5632_v29  ;;  %v5633_v32 = vmul.f32 -1.442695, %v675_v30  ;;  %v5634_v38 = vmul.f32 -1.442695, %v686_v33  ;;  %v5635_v29 = vld [vmem:[%s11429_s0 + $0x18] sm:$0xff] }
 0x329   :  { %7714 = vpow2.f32 %v5633_v32 }
 0x32a   :  { %7716 = vpow2.f32 %v5634_v38 }
 0x331   :  { %v7713_v41 = vpop.eup %7712 }
 0x332   :  { %v671_v45 = vadd.f32 1.0, %v7713_v41 }
 0x333   :  { %v7715_v48 = vpop.eup %7714 }
 0x334   :  { %7718 = vrcp.f32 %v671_v45  ;;  %v680_v49 = vadd.f32 1.0, %v7715_v48  ;;  %v7717_v54 = vpop.eup %7716 }
 0x335   :  { %7720 = vtanh.f32 %v683_v43  ;;  %v691_v62 = vadd.f32 1.0, %v7717_v54 }
 0x336   :  { %7722 = vrcp.f32 %v680_v49 }
 0x337   :  { %7724 = vrcp.f32 %v691_v62 }
 0x33e   :  { %v7719_v56 = vpop.eup %7718 }
 0x33f   :  { %v7721_v59 = vpop.eup %7720 }
 0x340   :  { %v7723_v60 = vpop.eup %7722  ;;  %v695_v4 = vmul.f32 %v7721_v59, %v7719_v56 }
 0x341   :  { %v694_v2 = vmul.f32 %v7723_v60, %v8366_v61  ;;  %v7725_v5 = vpop.eup %7724 }
 0x343   :  { %v8409_v55 = vadd.f32 %v695_v4, %v694_v2 }
 0x345   :  { %7726 = vtanh.f32 %v8409_v55 }
 0x34f   :  { %v7727_v10 = vpop.eup %7726 }
 0x350   :  { %v698_v11 = vmul.f32 %v7727_v10, %v7725_v5 }
 0x352   :  { %766 = vmatmul.mubr.f32.vlgmr.msra.gmra.mrb[6].mxu0 %v698_v11  ;;  %837 = vmatmul.mubr.f32.vlgmr.msra.gmra.mrb[6].mxu1 %v698_v11 }
 0x353   :  { %6330 = vmatpush1.bf16.msra.mxu0 %v8011_v9  ;;  %6362 = vmatpush1.bf16.msra.mxu1 %v8023_v13 }
 0x354   :  { %6332 = vmatprep.subr.bf16.mxu0 %v8036_v17  ;;  %6364 = vmatprep.subr.bf16.mxu1 %v8038_v18 }
 0x355   :  { %963 = vmatprep.mubr.f32.mxu0 %v11439_v7  ;;  %1034 = vmatprep.mubr.f32.mxu1 %v11439_v7 }
 0x357   :  { %6334 = vmatpush1.bf16.msra.mxu0 %v8050_v22  ;;  %6366 = vmatpush1.bf16.msra.mxu1 %v8063_v26 }
 0x358   :  { %6336 = vmatprep.subr.bf16.mxu0 %v8065_v27  ;;  %6368 = vmatprep.subr.bf16.mxu1 %v8076_v31 }
 0x35b   :  { %6338 = vmatpush1.bf16.msra.mxu0 %v8088_v35  ;;  %6370 = vmatpush1.bf16.msra.mxu1 %v8101_v39 }
 0x35c   :  { %6340 = vmatprep.subr.bf16.mxu0 %v8103_v40  ;;  %6372 = vmatprep.subr.bf16.mxu1 %v8115_v44 }
 0x35f   :  { %6342 = vmatpush1.bf16.msra.mxu0 %v8136_v51  ;;  %6374 = vmatpush1.bf16.msra.mxu1 %v8140_v52 }
 0x360   :  { %6344 = vmatprep.subr.bf16.mxu0 %v8142_v53  ;;  %6376 = vmatprep.subr.bf16.mxu1 %v8154_v57 }
 0x363   :  { %6346 = vmatpush1.bf16.msra.mxu0 %v8172_v63  ;;  %6378 = vmatpush1.bf16.msra.mxu1 %v8176_v0 }
 0x364   :  { %6348 = vmatprep.subr.bf16.mxu0 %v8178_v1  ;;  %6380 = vmatprep.subr.bf16.mxu1 %v8190_v6 }
 0x367   :  { %6350 = vmatpush1.bf16.msra.mxu0 %v8208_v16  ;;  %6382 = vmatpush1.bf16.msra.mxu1 %v8212_v19 }
 0x368   :  { %6352 = vmatprep.subr.bf16.mxu0 %v8214_v20  ;;  %6384 = vmatprep.subr.bf16.mxu1 %v8226_v25 }
 0x36b   :  { %6354 = vmatpush1.bf16.msra.mxu0 %v8244_v34  ;;  %6386 = vmatpush1.bf16.msra.mxu1 %v8248_v36 }
 0x36c   :  { %6356 = vmatprep.subr.bf16.mxu0 %v8250_v37  ;;  %6388 = vmatprep.subr.bf16.mxu1 %v8259_v42 }
 0x36f   :  { %6358 = vmatpush1.bf16.msra.mxu0 %v8268_v46  ;;  %6390 = vmatpush1.bf16.msra.mxu1 %v8272_v47 }
 0x370   :  { %6392 = vmatprep.subr.bf16.mxu0 %v7996_v3  ;;  %6424 = vmatprep.subr.bf16.mxu1 %v8009_v8 }
 0x425   :  { %v767_v61 = vpop.f32.mrb[6].mxu0  ;;  %v838_v12 = vpop.f32.mrb[6].mxu1 }
 0x426   :  { %v769_v14 = vpop.f32.mrb[7].mxu0  ;;  %v840_v15 = vpop.f32.mrb[7].mxu1 }
 0x427   :  { %v847_v21 = vcombine.low %v767_v61, %v769_v14  ;;  %v848_v23 = vcombine.low %v838_v12, %v840_v15 }
 0x429   :  { %v855_v24 = vrot.slane %v847_v21, %v8316_v58  ;;  %v862_v28 = vrot.slane %v848_v23, %v8316_v58 }
 0x42b   :  { %v863_v30 = vcombine.low %v855_v24, %v862_v28 }
 0x42d   :  { %v865_v32 = vadd.f32 %v5635_v29, %v863_v30 }
 0x42f   :  { %v5636_v33 = vmul.f32 -1.442695, %v865_v32  ;;  %v873_v38 = vrot.slane %v865_v32, 2  ;;  %v884_v43 = vrot.slane %v865_v32, 6  ;;  %v881_v49 = vrot.slane %v865_v32, 4 }
 0x431   :  { %7728 = vpow2.f32 %v5636_v33  ;;  %v5637_v41 = vmul.f32 -1.442695, %v873_v38  ;;  %v5638_v45 = vmul.f32 -1.442695, %v884_v43  ;;  %v5639_v33 = vld [vmem:[%s11429_s0 + $0x20] sm:$0xff] }
 0x433   :  { %7730 = vpow2.f32 %v5637_v41 }
 0x434   :  { %7732 = vpow2.f32 %v5638_v45 }
 0x43b   :  { %v7729_v48 = vpop.eup %7728 }
 0x43c   :  { %v869_v54 = vadd.f32 1.0, %v7729_v48 }
 0x43d   :  { %v7731_v56 = vpop.eup %7730 }
 0x43e   :  { %7734 = vrcp.f32 %v869_v54  ;;  %v878_v59 = vadd.f32 1.0, %v7731_v56  ;;  %v7733_v60 = vpop.eup %7732 }
 0x43f   :  { %7736 = vtanh.f32 %v881_v49  ;;  %v889_v5 = vadd.f32 1.0, %v7733_v60 }
 0x440   :  { %7738 = vrcp.f32 %v878_v59 }
 0x441   :  { %7740 = vrcp.f32 %v889_v5 }
 0x448   :  { %v7735_v62 = vpop.eup %7734 }
 0x449   :  { %v7737_v2 = vpop.eup %7736 }
 0x44a   :  { %v7739_v4 = vpop.eup %7738  ;;  %v893_v11 = vmul.f32 %v7737_v2, %v7735_v62 }
 0x44b   :  { %v892_v10 = vmul.f32 %v7739_v4, %v8409_v55  ;;  %v7741_v12 = vpop.eup %7740 }
 0x44d   :  { %v8452_v61 = vadd.f32 %v893_v11, %v892_v10 }
 0x44f   :  { %7742 = vtanh.f32 %v8452_v61 }
 0x459   :  { %v7743_v14 = vpop.eup %7742 }
 0x45a   :  { %v896_v15 = vmul.f32 %v7743_v14, %v7741_v12 }
 0x45c   :  { %964 = vmatmul.mubr.f32.vlgmr.msra.gmra.mrb[8].mxu0 %v896_v15  ;;  %1035 = vmatmul.mubr.f32.vlgmr.msra.gmra.mrb[8].mxu1 %v896_v15 }
 0x45d   :  { %6394 = vmatpush1.bf16.msra.mxu0 %v8011_v9  ;;  %6426 = vmatpush1.bf16.msra.mxu1 %v8023_v13 }
 0x45e   :  { %6396 = vmatprep.subr.bf16.mxu0 %v8036_v17  ;;  %6428 = vmatprep.subr.bf16.mxu1 %v8038_v18 }
 0x45f   :  { %1161 = vmatprep.mubr.f32.mxu0 %v11439_v7  ;;  %1232 = vmatprep.mubr.f32.mxu1 %v11439_v7 }
 0x461   :  { %6398 = vmatpush1.bf16.msra.mxu0 %v8050_v22  ;;  %6430 = vmatpush1.bf16.msra.mxu1 %v8063_v26 }
 0x462   :  { %6400 = vmatprep.subr.bf16.mxu0 %v8065_v27  ;;  %6432 = vmatprep.subr.bf16.mxu1 %v8076_v31 }
 0x465   :  { %6402 = vmatpush1.bf16.msra.mxu0 %v8088_v35  ;;  %6434 = vmatpush1.bf16.msra.mxu1 %v8101_v39 }
 0x466   :  { %6404 = vmatprep.subr.bf16.mxu0 %v8103_v40  ;;  %6436 = vmatprep.subr.bf16.mxu1 %v8115_v44 }
 0x469   :  { %6406 = vmatpush1.bf16.msra.mxu0 %v8136_v51  ;;  %6438 = vmatpush1.bf16.msra.mxu1 %v8140_v52 }
 0x46a   :  { %6408 = vmatprep.subr.bf16.mxu0 %v8142_v53  ;;  %6440 = vmatprep.subr.bf16.mxu1 %v8154_v57 }
 0x46d   :  { %6410 = vmatpush1.bf16.msra.mxu0 %v8172_v63  ;;  %6442 = vmatpush1.bf16.msra.mxu1 %v8176_v0 }
 0x46e   :  { %6412 = vmatprep.subr.bf16.mxu0 %v8178_v1  ;;  %6444 = vmatprep.subr.bf16.mxu1 %v8190_v6 }
 0x471   :  { %6414 = vmatpush1.bf16.msra.mxu0 %v8208_v16  ;;  %6446 = vmatpush1.bf16.msra.mxu1 %v8212_v19 }
 0x472   :  { %6416 = vmatprep.subr.bf16.mxu0 %v8214_v20  ;;  %6448 = vmatprep.subr.bf16.mxu1 %v8226_v25 }
 0x475   :  { %6418 = vmatpush1.bf16.msra.mxu0 %v8244_v34  ;;  %6450 = vmatpush1.bf16.msra.mxu1 %v8248_v36 }
 0x476   :  { %6420 = vmatprep.subr.bf16.mxu0 %v8250_v37  ;;  %6452 = vmatprep.subr.bf16.mxu1 %v8259_v42 }
 0x479   :  { %6422 = vmatpush1.bf16.msra.mxu0 %v8268_v46  ;;  %6454 = vmatpush1.bf16.msra.mxu1 %v8272_v47 }
 0x47a   :  { %6456 = vmatprep.subr.bf16.mxu0 %v7996_v3  ;;  %6488 = vmatprep.subr.bf16.mxu1 %v8009_v8 }
 0x52f   :  { %v965_v55 = vpop.f32.mrb[8].mxu0  ;;  %v1036_v21 = vpop.f32.mrb[8].mxu1 }
 0x530   :  { %v967_v23 = vpop.f32.mrb[9].mxu0  ;;  %v1038_v24 = vpop.f32.mrb[9].mxu1 }
 0x531   :  { %v1045_v28 = vcombine.low %v965_v55, %v967_v23  ;;  %v1046_v29 = vcombine.low %v1036_v21, %v1038_v24 }
 0x533   :  { %v1053_v30 = vrot.slane %v1045_v28, %v8316_v58  ;;  %v1060_v32 = vrot.slane %v1046_v29, %v8316_v58 }
 0x535   :  { %v1061_v38 = vcombine.low %v1053_v30, %v1060_v32 }
 0x537   :  { %v1063_v41 = vadd.f32 %v5639_v33, %v1061_v38 }
 0x539   :  { %v5640_v43 = vmul.f32 -1.442695, %v1063_v41  ;;  %v1071_v45 = vrot.slane %v1063_v41, 2  ;;  %v1082_v49 = vrot.slane %v1063_v41, 6  ;;  %v1079_v59 = vrot.slane %v1063_v41, 4 }
 0x53b   :  { %7744 = vpow2.f32 %v5640_v43  ;;  %v5641_v48 = vmul.f32 -1.442695, %v1071_v45  ;;  %v5642_v54 = vmul.f32 -1.442695, %v1082_v49  ;;  %v5643_v43 = vld [vmem:[%s11429_s0 + $0x28] sm:$0xff] }
 0x53d   :  { %7746 = vpow2.f32 %v5641_v48 }
 0x53e   :  { %7748 = vpow2.f32 %v5642_v54 }
 0x545   :  { %v7745_v56 = vpop.eup %7744 }
 0x546   :  { %v1067_v60 = vadd.f32 1.0, %v7745_v56 }
 0x547   :  { %v7747_v62 = vpop.eup %7746 }
 0x548   :  { %7750 = vrcp.f32 %v1067_v60  ;;  %v1076_v2 = vadd.f32 1.0, %v7747_v62  ;;  %v7749_v4 = vpop.eup %7748 }
 0x549   :  { %7752 = vtanh.f32 %v1079_v59  ;;  %v1087_v12 = vadd.f32 1.0, %v7749_v4 }
 0x54a   :  { %7754 = vrcp.f32 %v1076_v2 }
 0x54b   :  { %7756 = vrcp.f32 %v1087_v12 }
 0x552   :  { %v7751_v5 = vpop.eup %7750 }
 0x553   :  { %v7753_v10 = vpop.eup %7752 }
 0x554   :  { %v7755_v11 = vpop.eup %7754  ;;  %v1091_v15 = vmul.f32 %v7753_v10, %v7751_v5 }
 0x555   :  { %v1090_v14 = vmul.f32 %v7755_v11, %v8452_v61  ;;  %v7757_v21 = vpop.eup %7756 }
 0x557   :  { %v8495_v55 = vadd.f32 %v1091_v15, %v1090_v14 }
 0x559   :  { %7758 = vtanh.f32 %v8495_v55 }
 0x563   :  { %v7759_v23 = vpop.eup %7758 }
 0x564   :  { %v1094_v24 = vmul.f32 %v7759_v23, %v7757_v21 }
 0x566   :  { %1162 = vmatmul.mubr.f32.vlgmr.msra.gmra.mrb[10].mxu0 %v1094_v24  ;;  %1233 = vmatmul.mubr.f32.vlgmr.msra.gmra.mrb[10].mxu1 %v1094_v24 }
 0x567   :  { %6458 = vmatpush1.bf16.msra.mxu0 %v8011_v9  ;;  %6490 = vmatpush1.bf16.msra.mxu1 %v8023_v13 }
 0x568   :  { %6460 = vmatprep.subr.bf16.mxu0 %v8036_v17  ;;  %6492 = vmatprep.subr.bf16.mxu1 %v8038_v18 }
 0x569   :  { %1359 = vmatprep.mubr.f32.mxu0 %v11439_v7  ;;  %1430 = vmatprep.mubr.f32.mxu1 %v11439_v7 }
 0x56b   :  { %6462 = vmatpush1.bf16.msra.mxu0 %v8050_v22  ;;  %6494 = vmatpush1.bf16.msra.mxu1 %v8063_v26 }
 0x56c   :  { %6464 = vmatprep.subr.bf16.mxu0 %v8065_v27  ;;  %6496 = vmatprep.subr.bf16.mxu1 %v8076_v31 }
 0x56f   :  { %6466 = vmatpush1.bf16.msra.mxu0 %v8088_v35  ;;  %6498 = vmatpush1.bf16.msra.mxu1 %v8101_v39 }
 0x570   :  { %6468 = vmatprep.subr.bf16.mxu0 %v8103_v40  ;;  %6500 = vmatprep.subr.bf16.mxu1 %v8115_v44 }
 0x573   :  { %6470 = vmatpush1.bf16.msra.mxu0 %v8136_v51  ;;  %6502 = vmatpush1.bf16.msra.mxu1 %v8140_v52 }
 0x574   :  { %6472 = vmatprep.subr.bf16.mxu0 %v8142_v53  ;;  %6504 = vmatprep.subr.bf16.mxu1 %v8154_v57 }
 0x577   :  { %6474 = vmatpush1.bf16.msra.mxu0 %v8172_v63  ;;  %6506 = vmatpush1.bf16.msra.mxu1 %v8176_v0 }
 0x578   :  { %6476 = vmatprep.subr.bf16.mxu0 %v8178_v1  ;;  %6508 = vmatprep.subr.bf16.mxu1 %v8190_v6 }
 0x57b   :  { %6478 = vmatpush1.bf16.msra.mxu0 %v8208_v16  ;;  %6510 = vmatpush1.bf16.msra.mxu1 %v8212_v19 }
 0x57c   :  { %6480 = vmatprep.subr.bf16.mxu0 %v8214_v20  ;;  %6512 = vmatprep.subr.bf16.mxu1 %v8226_v25 }
 0x57f   :  { %6482 = vmatpush1.bf16.msra.mxu0 %v8244_v34  ;;  %6514 = vmatpush1.bf16.msra.mxu1 %v8248_v36 }
 0x580   :  { %6484 = vmatprep.subr.bf16.mxu0 %v8250_v37  ;;  %6516 = vmatprep.subr.bf16.mxu1 %v8259_v42 }
 0x583   :  { %6486 = vmatpush1.bf16.msra.mxu0 %v8268_v46  ;;  %6518 = vmatpush1.bf16.msra.mxu1 %v8272_v47 }
 0x584   :  { %6520 = vmatprep.subr.bf16.mxu0 %v7996_v3  ;;  %6552 = vmatprep.subr.bf16.mxu1 %v8009_v8 }
 0x639   :  { %v1163_v61 = vpop.f32.mrb[10].mxu0  ;;  %v1234_v28 = vpop.f32.mrb[10].mxu1 }
 0x63a   :  { %v1165_v29 = vpop.f32.mrb[11].mxu0  ;;  %v1236_v30 = vpop.f32.mrb[11].mxu1 }
 0x63b   :  { %v1243_v32 = vcombine.low %v1163_v61, %v1165_v29  ;;  %v1244_v33 = vcombine.low %v1234_v28, %v1236_v30  ;;  %v1757_v30 = vld [vmem:[%s11434_s5 + $0x8] sm:$0xff] }
 0x63d   :  { %v1251_v38 = vrot.slane %v1243_v32, %v8316_v58  ;;  %v1258_v41 = vrot.slane %v1244_v33, %v8316_v58  ;;  %v1761_v32 = vld [vmem:[%s11434_s5 + $0x28] sm:$0xff]  ;;  %v1759_v33 = vld [vmem:[%s11434_s5 + $0x18] sm:$0xff] }
 0x63f   :  { %v1259_v45 = vcombine.low %v1251_v38, %v1258_v41  ;;  %v8593_v38 = vpack.c.bf16 %v1761_v32, %v1757_v30  ;;  %v1763_v41 = vld [vmem:[%s11434_s5 + $0x38] sm:$0xff] }
 0x640   :  { %v1799_v30 = vld [vmem:[%s11434_s5 + $0x158] sm:$0xff] }
 0x641   :  { %v1261_v48 = vadd.f32 %v5643_v43, %v1259_v45  ;;  %v1756_v43 = vld [vmem:[%s11434_s5] sm:$0xff] }
 0x642   :  { %v1760_v45 = vld [vmem:[%s11434_s5 + $0x20] sm:$0xff] }
 0x643   :  { %v5644_v49 = vmul.f32 -1.442695, %v1261_v48  ;;  %v1269_v3 = vrot.slane %v1261_v48, 2  ;;  %v1280_v54 = vrot.slane %v1261_v48, 6  ;;  %v1277_v60 = vrot.slane %v1261_v48, 4 }
 0x644   :  { %v8604_v48 = vpack.c.bf16 %v1763_v41, %v1759_v33  ;;  %v1803_v33 = vld [vmem:[%s11434_s5 + $0x178] sm:$0xff] }
 0x645   :  { %7760 = vpow2.f32 %v5644_v49  ;;  %v5645_v8 = vmul.f32 -1.442695, %v1269_v3  ;;  %v5646_v56 = vmul.f32 -1.442695, %v1280_v54  ;;  %v8606_v49 = vpack.c.bf16 %v1760_v45, %v1756_v43  ;;  %v1758_v3 = vld [vmem:[%s11434_s5 + $0x10] sm:$0xff]  ;;  %v1796_v45 = vld [vmem:[%s11434_s5 + $0x140] sm:$0xff] }
 0x647   :  { %7762 = vpow2.f32 %v5645_v8  ;;  %v1762_v8 = vld [vmem:[%s11434_s5 + $0x30] sm:$0xff] }
 0x648   :  { %7764 = vpow2.f32 %v5646_v56  ;;  %v8615_v54 = vpack.c.bf16 %v1762_v8, %v1758_v3  ;;  %v1765_v56 = vld [vmem:[%s11434_s5 + $0x48] sm:$0xff]  ;;  %v1800_v3 = vld [vmem:[%s11434_s5 + $0x160] sm:$0xff]  ;;  %v1798_v8 = vld [vmem:[%s11434_s5 + $0x150] sm:$0xff] }
 0x64f   :  { %v7761_v59 = vpop.eup %7760 }
 0x650   :  { %v1265_v62 = vadd.f32 1.0, %v7761_v59  ;;  %v1769_v59 = vld [vmem:[%s11434_s5 + $0x68] sm:$0xff] }
 0x651   :  { %v7763_v2 = vpop.eup %7762 }
 0x652   :  { %7766 = vrcp.f32 %v1265_v62  ;;  %v1274_v4 = vadd.f32 1.0, %v7763_v2  ;;  %v7765_v5 = vpop.eup %7764  ;;  %v8629_v62 = vpack.c.bf16 %v1769_v59, %v1765_v56  ;;  %v1771_v2 = vld [vmem:[%s11434_s5 + $0x78] sm:$0xff]  ;;  %v8785_v56 = vpack.c.bf16 %v1803_v33, %v1799_v30  ;;  %v1802_v59 = vld [vmem:[%s11434_s5 + $0x170] sm:$0xff] }
 0x653   :  { %7768 = vtanh.f32 %v1277_v60  ;;  %v1285_v14 = vadd.f32 1.0, %v7765_v5  ;;  %v1767_v60 = vld [vmem:[%s11434_s5 + $0x58] sm:$0xff]  ;;  %v1768_v5 = vld [vmem:[%s11434_s5 + $0x60] sm:$0xff] }
 0x654   :  { %7770 = vrcp.f32 %v1274_v4  ;;  %v1764_v4 = vld [vmem:[%s11434_s5 + $0x40] sm:$0xff] }
 0x655   :  { %7772 = vrcp.f32 %v1285_v14  ;;  %v1770_v14 = vld [vmem:[%s11434_s5 + $0x70] sm:$0xff] }
 0x65c   :  { %v7767_v10 = vpop.eup %7766 }
 0x65d   :  { %v7769_v11 = vpop.eup %7768 }
 0x65e   :  { %v7771_v12 = vpop.eup %7770  ;;  %v1289_v21 = vmul.f32 %v7769_v11, %v7767_v10  ;;  %v8640_v10 = vpack.c.bf16 %v1771_v2, %v1767_v60  ;;  %v8642_v11 = vpack.c.bf16 %v1768_v5, %v1764_v4  ;;  %v1805_v60 = vld [vmem:[%s11434_s5 + $0x188] sm:$0xff]  ;;  %v1807_v4 = vld [vmem:[%s11434_s5 + $0x198] sm:$0xff] }
 0x65f   :  { %v1288_v15 = vmul.f32 %v7771_v12, %v8495_v55  ;;  %v7773_v24 = vpop.eup %7772  ;;  %v1766_v12 = vld [vmem:[%s11434_s5 + $0x50] sm:$0xff]  ;;  %v1809_v2 = vld [vmem:[%s11434_s5 + $0x1a8] sm:$0xff]  ;;  %v1811_v5 = vld [vmem:[%s11434_s5 + $0x1b8] sm:$0xff] }
 0x661   :  { %v8538_v23 = vadd.f32 %v1289_v21, %v1288_v15  ;;  %v8651_v15 = vpack.c.bf16 %v1770_v14, %v1766_v12  ;;  %v1773_v21 = vld [vmem:[%s11434_s5 + $0x88] sm:$0xff]  ;;  %v8803_v12 = vpack.c.bf16 %v1800_v3, %v1796_v45  ;;  %v8807_v14 = vpack.c.bf16 %v1802_v59, %v1798_v8 }
 0x663   :  { %7774 = vtanh.f32 %v8538_v23 }
 0x66d   :  { %v7775_v61 = vpop.eup %7774 }
 0x66e   :  { %v1292_v28 = vmul.f32 %v7775_v61, %v7773_v24  ;;  %v1775_v24 = vld [vmem:[%s11434_s5 + $0x98] sm:$0xff] }
 0x670   :  { %1360 = vmatmul.mubr.f32.vlgmr.msra.gmra.mrb[12].mxu0 %v1292_v28  ;;  %1431 = vmatmul.mubr.f32.vlgmr.msra.gmra.mrb[12].mxu1 %v1292_v28  ;;  %v1779_v28 = vld [vmem:[%s11434_s5 + $0xb8] sm:$0xff] }
 0x671   :  { %6522 = vmatpush1.bf16.msra.mxu0 %v8011_v9  ;;  %6554 = vmatpush1.bf16.msra.mxu1 %v8023_v13 }
 0x672   :  { %6524 = vmatprep.subr.bf16.mxu0 %v8036_v17  ;;  %6556 = vmatprep.subr.bf16.mxu1 %v8038_v18 }
 0x673   :  { %1557 = vmatprep.mubr.f32.mxu0 %v11439_v7  ;;  %1628 = vmatprep.mubr.f32.mxu1 %v11439_v7 }
 0x675   :  { %6526 = vmatpush1.bf16.msra.mxu0 %v8050_v22  ;;  %6558 = vmatpush1.bf16.msra.mxu1 %v8063_v26 }
 0x676   :  { %6528 = vmatprep.subr.bf16.mxu0 %v8065_v27  ;;  %6560 = vmatprep.subr.bf16.mxu1 %v8076_v31 }
 0x679   :  { %6530 = vmatpush1.bf16.msra.mxu0 %v8088_v35  ;;  %6562 = vmatpush1.bf16.msra.mxu1 %v8101_v39  ;;  %v5647_v35 = vld [vmem:[%s11429_s0 + $0x30] sm:$0xff] }
 0x67a   :  { %6532 = vmatprep.subr.bf16.mxu0 %v8103_v40  ;;  %6564 = vmatprep.subr.bf16.mxu1 %v8115_v44 }
 0x67d   :  { %6534 = vmatpush1.bf16.msra.mxu0 %v8136_v51  ;;  %6566 = vmatpush1.bf16.msra.mxu1 %v8140_v52 }
 0x67e   :  { %6536 = vmatprep.subr.bf16.mxu0 %v8142_v53  ;;  %6568 = vmatprep.subr.bf16.mxu1 %v8154_v57 }
 0x681   :  { %6538 = vmatpush1.bf16.msra.mxu0 %v8172_v63  ;;  %6570 = vmatpush1.bf16.msra.mxu1 %v8176_v0 }
 0x682   :  { %6540 = vmatprep.subr.bf16.mxu0 %v8178_v1  ;;  %6572 = vmatprep.subr.bf16.mxu1 %v8190_v6 }
 0x685   :  { %6542 = vmatpush1.bf16.msra.mxu0 %v8208_v16  ;;  %6574 = vmatpush1.bf16.msra.mxu1 %v8212_v19 }
 0x686   :  { %6544 = vmatprep.subr.bf16.mxu0 %v8214_v20  ;;  %6576 = vmatprep.subr.bf16.mxu1 %v8226_v25 }
 0x689   :  { %6546 = vmatpush1.bf16.msra.mxu0 %v8244_v34  ;;  %6578 = vmatpush1.bf16.msra.mxu1 %v8248_v36 }
 0x68a   :  { %6548 = vmatprep.subr.bf16.mxu0 %v8250_v37  ;;  %6580 = vmatprep.subr.bf16.mxu1 %v8259_v42 }
 0x68d   :  { %6550 = vmatpush1.bf16.msra.mxu0 %v8268_v46  ;;  %6582 = vmatpush1.bf16.msra.mxu1 %v8272_v47 }
 0x68e   :  { %6584 = vmatprep.subr.bf16.mxu0 %v8593_v38  ;;  %6616 = vmatprep.subr.bf16.mxu1 %v8604_v48 }
 0x743   :  { %v1361_v9 = vpop.f32.mrb[12].mxu0  ;;  %v1432_v13 = vpop.f32.mrb[12].mxu1 }
 0x744   :  { %v1363_v17 = vpop.f32.mrb[13].mxu0  ;;  %v1434_v18 = vpop.f32.mrb[13].mxu1 }
 0x745   :  { %v1441_v22 = vcombine.low %v1361_v9, %v1363_v17  ;;  %v1442_v26 = vcombine.low %v1432_v13, %v1434_v18  ;;  %v1772_v9 = vld [vmem:[%s11434_s5 + $0x80] sm:$0xff]  ;;  %v8676_v17 = vpack.c.bf16 %v1779_v28, %v1775_v24  ;;  %v1806_v28 = vld [vmem:[%s11434_s5 + $0x190] sm:$0xff] }
 0x746   :  { %v1776_v13 = vld [vmem:[%s11434_s5 + $0xa0] sm:$0xff] }
 0x747   :  { %v1449_v27 = vrot.slane %v1441_v22, %v8316_v58  ;;  %v1456_v31 = vrot.slane %v1442_v26, %v8316_v58  ;;  %v8678_v18 = vpack.c.bf16 %v1776_v13, %v1772_v9  ;;  %v1774_v22 = vld [vmem:[%s11434_s5 + $0x90] sm:$0xff]  ;;  %v1808_v24 = vld [vmem:[%s11434_s5 + $0x1a0] sm:$0xff]  ;;  %v8821_v9 = vpack.c.bf16 %v1811_v5, %v1807_v4  ;;  %v5651_v4 = vld [vmem:[%s11429_s0 + $0x38] sm:$0xff]  ;;  %s2820_s0 = ssub.f32 1.0, %s2815_s28 }
 0x748   :  { %v1778_v26 = vld [vmem:[%s11434_s5 + $0xb0] sm:$0xff] }
 0x749   :  { %v1457_v39 = vcombine.low %v1449_v27, %v1456_v31  ;;  %v1781_v27 = vld [vmem:[%s11434_s5 + $0xc8] sm:$0xff]  ;;  %v8690_v31 = vpack.c.bf16 %v1778_v26, %v1774_v22  ;;  %v1810_v13 = vld [vmem:[%s11434_s5 + $0x1b0] sm:$0xff] }
 0x74a   :  { %v1813_v22 = vld [vmem:[%s11434_s5 + $0x1c8] sm:$0xff] }
 0x74b   :  { %v1459_v40 = vadd.f32 %v5647_v35, %v1457_v39  ;;  %v1785_v35 = vld [vmem:[%s11434_s5 + $0xe8] sm:$0xff]  ;;  %v1783_v39 = vld [vmem:[%s11434_s5 + $0xd8] sm:$0xff] }
 0x74c   :  { %v1817_v26 = vld [vmem:[%s11434_s5 + $0x1e8] sm:$0xff] }
 0x74d   :  { %v5648_v44 = vmul.f32 -1.442695, %v1459_v40  ;;  %v1467_v51 = vrot.slane %v1459_v40, 2  ;;  %v1478_v53 = vrot.slane %v1459_v40, 6  ;;  %v1475_v0 = vrot.slane %v1459_v40, 4  ;;  %v1787_v40 = vld [vmem:[%s11434_s5 + $0xf8] sm:$0xff] }
 0x74f   :  { %7776 = vpow2.f32 %v5648_v44  ;;  %v5649_v52 = vmul.f32 -1.442695, %v1467_v51  ;;  %v5650_v57 = vmul.f32 -1.442695, %v1478_v53  ;;  %v8702_v44 = vpack.c.bf16 %v1785_v35, %v1781_v27  ;;  %v1784_v53 = vld [vmem:[%s11434_s5 + $0xe0] sm:$0xff]  ;;  %v1815_v27 = vld [vmem:[%s11434_s5 + $0x1d8] sm:$0xff] }
 0x750   :  { %v8704_v51 = vpack.c.bf16 %v1787_v40, %v1783_v39  ;;  %v1819_v35 = vld [vmem:[%s11434_s5 + $0x1f8] sm:$0xff]  ;;  %v8843_v40 = vpack.c.bf16 %v1810_v13, %v1806_v28 }
 0x751   :  { %7778 = vpow2.f32 %v5649_v52  ;;  %v1780_v52 = vld [vmem:[%s11434_s5 + $0xc0] sm:$0xff] }
 0x752   :  { %7780 = vpow2.f32 %v5650_v57  ;;  %v1782_v57 = vld [vmem:[%s11434_s5 + $0xd0] sm:$0xff] }
 0x759   :  { %v7777_v63 = vpop.eup %7776 }
 0x75a   :  { %v1463_v1 = vadd.f32 1.0, %v7777_v63  ;;  %v8716_v63 = vpack.c.bf16 %v1784_v53, %v1780_v52  ;;  %v8845_v52 = vpack.c.bf16 %v1817_v26, %v1813_v22  ;;  %v1812_v53 = vld [vmem:[%s11434_s5 + $0x1c0] sm:$0xff] }
 0x75b   :  { %v7779_v6 = vpop.eup %7778 }
 0x75c   :  { %7782 = vrcp.f32 %v1463_v1  ;;  %v1472_v16 = vadd.f32 1.0, %v7779_v6  ;;  %v7781_v19 = vpop.eup %7780  ;;  %v1789_v1 = vld [vmem:[%s11434_s5 + $0x108] sm:$0xff] }
 0x75d   :  { %7784 = vtanh.f32 %v1475_v0  ;;  %v1483_v36 = vadd.f32 1.0, %v7781_v19  ;;  %v1786_v0 = vld [vmem:[%s11434_s5 + $0xf0] sm:$0xff]  ;;  %v1793_v6 = vld [vmem:[%s11434_s5 + $0x128] sm:$0xff] }
 0x75e   :  { %7786 = vrcp.f32 %v1472_v16  ;;  %v8729_v16 = vpack.c.bf16 %v1786_v0, %v1782_v57  ;;  %v8731_v19 = vpack.c.bf16 %v1793_v6, %v1789_v1  ;;  %v1816_v57 = vld [vmem:[%s11434_s5 + $0x1e0] sm:$0xff]  ;;  %v1814_v0 = vld [vmem:[%s11434_s5 + $0x1d0] sm:$0xff]  ;;  %v8857_v1 = vpack.c.bf16 %v1819_v35, %v1815_v27 }
 0x75f   :  { %7788 = vrcp.f32 %v1483_v36  ;;  %v1818_v6 = vld [vmem:[%s11434_s5 + $0x1f0] sm:$0xff] }
 0x766   :  { %v7783_v20 = vpop.eup %7782 }
 0x767   :  { %v7785_v25 = vpop.eup %7784 }
 0x768   :  { %v7787_v34 = vpop.eup %7786  ;;  %v1487_v42 = vmul.f32 %v7785_v25, %v7783_v20  ;;  %v1791_v20 = vld [vmem:[%s11434_s5 + $0x118] sm:$0xff] }
 0x769   :  { %v1486_v37 = vmul.f32 %v7787_v34, %v8538_v23  ;;  %v7789_v47 = vpop.eup %7788  ;;  %v1777_v23 = vld [vmem:[%s11434_s5 + $0xa8] sm:$0xff]  ;;  %v1795_v25 = vld [vmem:[%s11434_s5 + $0x138] sm:$0xff]  ;;  %v1788_v34 = vld [vmem:[%s11434_s5 + $0x100] sm:$0xff] }
 0x76a   :  { %v8664_v61 = vpack.c.bf16 %v1777_v23, %v1773_v21  ;;  %v8743_v36 = vpack.c.bf16 %v1795_v25, %v1791_v20  ;;  %v8809_v21 = vpack.c.bf16 %v1809_v2, %v1805_v60  ;;  %v1804_v23 = vld [vmem:[%s11434_s5 + $0x180] sm:$0xff]  ;;  %v1693_v20 = vld [vmem:[%s11433_s4 + $0x8] sm:$0xff] }
 0x76b   :  { %v8579_v46 = vadd.f32 %v1487_v42, %v1486_v37  ;;  %v1792_v37 = vld [vmem:[%s11434_s5 + $0x120] sm:$0xff]  ;;  %v1790_v42 = vld [vmem:[%s11434_s5 + $0x110] sm:$0xff]  ;;  %v8839_v39 = vpack.c.bf16 %v1808_v24, %v1804_v23  ;;  %v1697_v25 = vld [vmem:[%s11433_s4 + $0x28] sm:$0xff] }
 0x76c   :  { %v8764_v32 = vpack.c.bf16 %v1792_v37, %v1788_v34  ;;  %v1695_v34 = vld [vmem:[%s11433_s4 + $0x18] sm:$0xff] }
 0x76d   :  { %7790 = vtanh.f32 %v8579_v46  ;;  %v1699_v37 = vld [vmem:[%s11433_s4 + $0x38] sm:$0xff] }
 0x777   :  { %v7791_v55 = vpop.eup %7790 }
 0x778   :  { %v1490_v29 = vmul.f32 %v7791_v55, %v7789_v47  ;;  %v1794_v47 = vld [vmem:[%s11434_s5 + $0x130] sm:$0xff]  ;;  %v1797_v55 = vld [vmem:[%s11434_s5 + $0x148] sm:$0xff] }
 0x779   :  { %v8771_v41 = vpack.c.bf16 %v1794_v47, %v1790_v42  ;;  %v8875_v42 = vpack.c.bf16 %v1816_v57, %v1812_v53  ;;  %v8879_v47 = vpack.c.bf16 %v1818_v6, %v1814_v0 }
 0x77a   :  { %1558 = vmatmul.mubr.f32.vlgmr.msra.gmra.mrb[14].mxu0 %v1490_v29  ;;  %1629 = vmatmul.mubr.f32.vlgmr.msra.gmra.mrb[14].mxu1 %v1490_v29  ;;  %v1801_v29 = vld [vmem:[%s11434_s5 + $0x168] sm:$0xff] }
 0x77b   :  { %1884 = vmatprep.mubr.f32.mxu0 %v11439_v7  ;;  %1955 = vmatprep.mubr.f32.mxu1 %v11439_v7  ;;  %v8773_v43 = vpack.c.bf16 %v1801_v29, %v1797_v55  ;;  %v8881_v55 = vpack.c.bf16 %v1697_v25, %v1693_v20  ;;  %v8884_v29 = vpack.c.bf16 %v1699_v37, %v1695_v34 }
 0x77c   :  { %6586 = vmatpush1.bf16.msra.mxu0 %v8606_v49  ;;  %6618 = vmatpush1.bf16.msra.mxu1 %v8615_v54 }
 0x77d   :  { %6588 = vmatprep.subr.bf16.mxu0 %v8629_v62  ;;  %6620 = vmatprep.subr.bf16.mxu1 %v8640_v10 }
 0x780   :  { %6590 = vmatpush1.bf16.msra.mxu0 %v8642_v11  ;;  %6622 = vmatpush1.bf16.msra.mxu1 %v8651_v15 }
 0x781   :  { %6592 = vmatprep.subr.bf16.mxu0 %v8664_v61  ;;  %6624 = vmatprep.subr.bf16.mxu1 %v8676_v17 }
 0x784   :  { %6594 = vmatpush1.bf16.msra.mxu0 %v8678_v18  ;;  %6626 = vmatpush1.bf16.msra.mxu1 %v8690_v31 }
 0x785   :  { %6596 = vmatprep.subr.bf16.mxu0 %v8702_v44  ;;  %6628 = vmatprep.subr.bf16.mxu1 %v8704_v51 }
 0x788   :  { %6598 = vmatpush1.bf16.msra.mxu0 %v8716_v63  ;;  %6630 = vmatpush1.bf16.msra.mxu1 %v8729_v16 }
 0x789   :  { %6600 = vmatprep.subr.bf16.mxu0 %v8731_v19  ;;  %6632 = vmatprep.subr.bf16.mxu1 %v8743_v36 }
 0x78c   :  { %6602 = vmatpush1.bf16.msra.mxu0 %v8764_v32  ;;  %6634 = vmatpush1.bf16.msra.mxu1 %v8771_v41 }
 0x78d   :  { %6604 = vmatprep.subr.bf16.mxu0 %v8773_v43  ;;  %6636 = vmatprep.subr.bf16.mxu1 %v8785_v56 }
 0x790   :  { %6606 = vmatpush1.bf16.msra.mxu0 %v8803_v12  ;;  %6638 = vmatpush1.bf16.msra.mxu1 %v8807_v14 }
 0x791   :  { %6608 = vmatprep.subr.bf16.mxu0 %v8809_v21  ;;  %6640 = vmatprep.subr.bf16.mxu1 %v8821_v9 }
 0x794   :  { %6610 = vmatpush1.bf16.msra.mxu0 %v8839_v39  ;;  %6642 = vmatpush1.bf16.msra.mxu1 %v8843_v40 }
 0x795   :  { %6612 = vmatprep.subr.bf16.mxu0 %v8845_v52  ;;  %6644 = vmatprep.subr.bf16.mxu1 %v8857_v1 }
 0x798   :  { %6614 = vmatpush1.bf16.msra.mxu0 %v8875_v42  ;;  %6646 = vmatpush1.bf16.msra.mxu1 %v8879_v47 }
 0x799   :  { %6648 = vmatprep.subr.bf16.mxu0 %v8881_v55  ;;  %6680 = vmatprep.subr.bf16.mxu1 %v8884_v29 }
 0x84d   :  { %v1559_v30 = vpop.f32.mrb[14].mxu0  ;;  %v1630_v33 = vpop.f32.mrb[14].mxu1 }
 0x84e   :  { %v1561_v45 = vpop.f32.mrb[15].mxu0  ;;  %v1632_v3 = vpop.f32.mrb[15].mxu1 }
 0x84f   :  { %v1639_v8 = vcombine.low %v1559_v30, %v1561_v45  ;;  %v1640_v59 = vcombine.low %v1630_v33, %v1632_v3  ;;  %v1692_v45 = vld [vmem:[%s11433_s4] sm:$0xff] }
 0x850   :  { %v1696_v3 = vld [vmem:[%s11433_s4 + $0x20] sm:$0xff] }
 0x851   :  { %v1647_v60 = vrot.slane %v1639_v8, %v8316_v58  ;;  %v1654_v2 = vrot.slane %v1640_v59, %v8316_v58  ;;  %v1694_v8 = vld [vmem:[%s11433_s4 + $0x10] sm:$0xff]  ;;  %v1701_v59 = vld [vmem:[%s11433_s4 + $0x48] sm:$0xff] }
 0x853   :  { %v1655_v5 = vcombine.low %v1647_v60, %v1654_v2  ;;  %v1705_v60 = vld [vmem:[%s11433_s4 + $0x68] sm:$0xff]  ;;  %v1703_v2 = vld [vmem:[%s11433_s4 + $0x58] sm:$0xff] }
 0x855   :  { %v1657_v23 = vadd.f32 %v5651_v4, %v1655_v5  ;;  %v1707_v4 = vld [vmem:[%s11433_s4 + $0x78] sm:$0xff] }
 0x857   :  { %v5652_v24 = vmul.f32 -1.442695, %v1657_v23  ;;  %v1665_v28 = vrot.slane %v1657_v23, 2  ;;  %v1676_v22 = vrot.slane %v1657_v23, 6  ;;  %v1673_v35 = vrot.slane %v1657_v23, 4 }
 0x859   :  { %7792 = vpow2.f32 %v5652_v24  ;;  %v5653_v13 = vmul.f32 -1.442695, %v1665_v28  ;;  %v5654_v26 = vmul.f32 -1.442695, %v1676_v22  ;;  %v8923_v24 = vpack.c.bf16 %v1696_v3, %v1692_v45  ;;  %v1704_v22 = vld [vmem:[%s11433_s4 + $0x60] sm:$0xff] }
 0x85b   :  { %7794 = vpow2.f32 %v5653_v13  ;;  %v1700_v13 = vld [vmem:[%s11433_s4 + $0x40] sm:$0xff] }
 0x85c   :  { %7796 = vpow2.f32 %v5654_v26 }
 0x863   :  { %v7793_v27 = vpop.eup %7792 }
 0x864   :  { %v1661_v53 = vadd.f32 1.0, %v7793_v27  ;;  %v8933_v27 = vpack.c.bf16 %v1705_v60, %v1701_v59  ;;  %v1717_v59 = vld [vmem:[%s11433_s4 + $0xc8] sm:$0xff] }
 0x865   :  { %v7795_v57 = vpop.eup %7794  ;;  %v1721_v60 = vld [vmem:[%s11433_s4 + $0xe8] sm:$0xff] }
 0x866   :  { %7798 = vrcp.f32 %v1661_v53  ;;  %v1670_v58 = vadd.f32 1.0, %v7795_v57  ;;  %v7797_v0 = vpop.eup %7796  ;;  %v1702_v53 = vld [vmem:[%s11433_s4 + $0x50] sm:$0xff] }
 0x867   :  { %7800 = vtanh.f32 %v1673_v35  ;;  %v1681_v34 = vadd.f32 1.0, %v7797_v0  ;;  %v8935_v35 = vpack.c.bf16 %v1707_v4, %v1703_v2  ;;  %v1706_v57 = vld [vmem:[%s11433_s4 + $0x70] sm:$0xff]  ;;  %v1713_v0 = vld [vmem:[%s11433_s4 + $0xa8] sm:$0xff]  ;;  %v1719_v2 = vld [vmem:[%s11433_s4 + $0xd8] sm:$0xff] }
 0x868   :  { %7802 = vrcp.f32 %v1670_v58  ;;  %v1709_v58 = vld [vmem:[%s11433_s4 + $0x88] sm:$0xff]  ;;  %v1723_v4 = vld [vmem:[%s11433_s4 + $0xf8] sm:$0xff] }
 0x869   :  { %7804 = vrcp.f32 %v1681_v34  ;;  %v8959_v34 = vpack.c.bf16 %v1706_v57, %v1702_v53  ;;  %v8969_v45 = vpack.c.bf16 %v1713_v0, %v1709_v58  ;;  %v9009_v53 = vpack.c.bf16 %v1723_v4, %v1719_v2  ;;  %v1718_v57 = vld [vmem:[%s11433_s4 + $0xd0] sm:$0xff]  ;;  %v1725_v0 = vld [vmem:[%s11433_s4 + $0x108] sm:$0xff] }
 0x86a   :  { %v1722_v58 = vld [vmem:[%s11433_s4 + $0xf0] sm:$0xff] }
 0x86b   :  { %11484 = vst [vmem:[#allocation5_spill] sm:$0xff] %v8959_v34  ;;  %11487 = vst [vmem:[#allocation8_spill] sm:$0xff] %v9009_v53  ;;  %v1726_v4 = vld [vmem:[%s11433_s4 + $0x110] sm:$0xff] }
 0x870   :  { %v7799_v6 = vpop.eup %7798 }
 0x871   :  { %v7801_v20 = vpop.eup %7800 }
 0x872   :  { %v7803_v25 = vpop.eup %7802  ;;  %v1685_v30 = vmul.f32 %v7801_v20, %v7799_v6  ;;  %v1711_v6 = vld [vmem:[%s11433_s4 + $0x98] sm:$0xff] }
 0x873   :  { %v1684_v37 = vmul.f32 %v7803_v25, %v8579_v46  ;;  %v1698_v46 = vld [vmem:[%s11433_s4 + $0x30] sm:$0xff]  ;;  %v7805_v5 = vpop.eup %7804  ;;  %v1715_v20 = vld [vmem:[%s11433_s4 + $0xb8] sm:$0xff]  ;;  %v8957_v25 = vpack.c.bf16 %v1704_v22, %v1700_v13  ;;  %v1716_v13 = vld [vmem:[%s11433_s4 + $0xc0] sm:$0xff] }
 0x874   :  { %v8925_v28 = vpack.c.bf16 %v1698_v46, %v1694_v8  ;;  %v8971_v3 = vpack.c.bf16 %v1715_v20, %v1711_v6  ;;  %v1710_v8 = vld [vmem:[%s11433_s4 + $0x90] sm:$0xff]  ;;  %v1720_v22 = vld [vmem:[%s11433_s4 + $0xe0] sm:$0xff]  ;;  %v1729_v6 = vld [vmem:[%s11433_s4 + $0x128] sm:$0xff] }
 0x875   :  { %v8896_v33 = vadd.f32 %v1685_v30, %v1684_v37  ;;  %v1708_v37 = vld [vmem:[%s11433_s4 + $0x80] sm:$0xff]  ;;  %v1714_v46 = vld [vmem:[%s11433_s4 + $0xb0] sm:$0xff]  ;;  %v1727_v20 = vld [vmem:[%s11433_s4 + $0x118] sm:$0xff] }
 0x876   :  { %v1712_v30 = vld [vmem:[%s11433_s4 + $0xa0] sm:$0xff]  ;;  %11485 = vst [vmem:[#allocation6_spill] sm:$0xff] %v8971_v3 }
 0x877   :  { %7806 = vtanh.f32 %v8896_v33 }
 0x881   :  { %v7807_v23 = vpop.eup %7806 }
 0x882   :  { %v1688_v26 = vmul.f32 %v7807_v23, %v7805_v5  ;;  %v8995_v5 = vpack.c.bf16 %v1712_v30, %v1708_v37  ;;  %v8997_v23 = vpack.c.bf16 %v1714_v46, %v1710_v8  ;;  %v1731_v37 = vld [vmem:[%s11433_s4 + $0x138] sm:$0xff]  ;;  %v9031_v30 = vpack.c.bf16 %v1720_v22, %v1716_v13  ;;  %v1724_v46 = vld [vmem:[%s11433_s4 + $0x100] sm:$0xff]  ;;  %v1730_v13 = vld [vmem:[%s11433_s4 + $0x130] sm:$0xff] }
 0x883   :  { %v9033_v8 = vpack.c.bf16 %v1722_v58, %v1718_v57  ;;  %v9045_v2 = vpack.c.bf16 %v1731_v37, %v1727_v20  ;;  %v1733_v22 = vld [vmem:[%s11433_s4 + $0x148] sm:$0xff]  ;;  %v1735_v58 = vld [vmem:[%s11433_s4 + $0x158] sm:$0xff]  ;;  %v9069_v20 = vpack.c.bf16 %v1730_v13, %v1726_v4  ;;  %v1732_v37 = vld [vmem:[%s11433_s4 + $0x140] sm:$0xff] }
 0x884   :  { %1885 = vmatmul.mubr.f32.vlgmr.msra.gmra.mrb[16].mxu0 %v1688_v26  ;;  %1956 = vmatmul.mubr.f32.vlgmr.msra.gmra.mrb[16].mxu1 %v1688_v26  ;;  %11486 = vst [vmem:[#allocation7_spill] sm:$0xff] %v8997_v23  ;;  %v9007_v26 = vpack.c.bf16 %v1721_v60, %v1717_v59  ;;  %v1728_v59 = vld [vmem:[%s11433_s4 + $0x120] sm:$0xff]  ;;  %v9043_v60 = vpack.c.bf16 %v1729_v6, %v1725_v0  ;;  %v1737_v57 = vld [vmem:[%s11433_s4 + $0x168] sm:$0xff]  ;;  %v1739_v0 = vld [vmem:[%s11433_s4 + $0x178] sm:$0xff] }
 0x885   :  { %6650 = vmatpush1.bf16.msra.mxu0 %v8923_v24  ;;  %6682 = vmatpush1.bf16.msra.mxu1 %v8925_v28  ;;  %11488 = vst [vmem:[#allocation9_spill] sm:$0xff] %v9033_v8  ;;  %11489 = vst [vmem:[#allocation10_spill] sm:$0xff] %v9045_v2  ;;  %v9067_v6 = vpack.c.bf16 %v1728_v59, %v1724_v46  ;;  %v1734_v46 = vld [vmem:[%s11433_s4 + $0x150] sm:$0xff]  ;;  %v1741_v4 = vld [vmem:[%s11433_s4 + $0x188] sm:$0xff] }
 0x886   :  { %6652 = vmatprep.subr.bf16.mxu0 %v8933_v27  ;;  %6684 = vmatprep.subr.bf16.mxu1 %v8935_v35  ;;  %11490 = vst [vmem:[#allocation11_spill] sm:$0xff] %v9069_v20  ;;  %v1738_v59 = vld [vmem:[%s11433_s4 + $0x170] sm:$0xff]  ;;  %v1745_v13 = vld [vmem:[%s11433_s4 + $0x1a8] sm:$0xff] }
 0x887   :  { %2026 = vmatprep.mubr.f32.mxu0 %v11439_v7  ;;  %2097 = vmatprep.mubr.f32.mxu1 %v11439_v7  ;;  %v9079_v7 = vpack.c.bf16 %v1737_v57, %v1733_v22  ;;  %v1743_v22 = vld [vmem:[%s11433_s4 + $0x198] sm:$0xff] }
 0x888   :  { %v1747_v57 = vld [vmem:[%s11433_s4 + $0x1b8] sm:$0xff] }
 0x889   :  { %6654 = vmatpush1.bf16.msra.mxu0 %v8957_v25  ;;  %6686 = vmatpush1.bf16.msra.mxu1 %v8959_v34 }
 0x88a   :  { %6656 = vmatprep.subr.bf16.mxu0 %v8969_v45  ;;  %6688 = vmatprep.subr.bf16.mxu1 %v8971_v3  ;;  %v9117_v3 = vpack.c.bf16 %v1747_v57, %v1743_v22 }
 0x88d   :  { %6658 = vmatpush1.bf16.msra.mxu0 %v8995_v5  ;;  %6690 = vmatpush1.bf16.msra.mxu1 %v8997_v23  ;;  %v9115_v23 = vpack.c.bf16 %v1745_v13, %v1741_v4  ;;  %v1751_v4 = vld [vmem:[%s11433_s4 + $0x1d8] sm:$0xff] }
 0x88e   :  { %6660 = vmatprep.subr.bf16.mxu0 %v9007_v26  ;;  %6692 = vmatprep.subr.bf16.mxu1 %v9009_v53  ;;  %v9081_v53 = vpack.c.bf16 %v1739_v0, %v1735_v58  ;;  %v9103_v58 = vpack.c.bf16 %v1736_v50, %v1732_v37  ;;  %v9105_v0 = vpack.c.bf16 %v1738_v59, %v1734_v46  ;;  %v1742_v50 = vld [vmem:[%s11433_s4 + $0x190] sm:$0xff]  ;;  %v1749_v46 = vld [vmem:[%s11433_s4 + $0x1c8] sm:$0xff]  ;;  %v1755_v13 = vld [vmem:[%s11433_s4 + $0x1f8] sm:$0xff] }
 0x88f   :  { %v1746_v37 = vld [vmem:[%s11433_s4 + $0x1b0] sm:$0xff]  ;;  %v1753_v59 = vld [vmem:[%s11433_s4 + $0x1e8] sm:$0xff]  ;;  %v9150_v34 = vpack.c.bf16 %v1755_v13, %v1751_v4  ;;  %v2140_v4 = vld [vmem:[%s11435_s6 + $0x60] sm:$0xff] }
 0x890   :  { %11491 = vst [vmem:[#allocation12_spill] sm:$0xff] %v9081_v53  ;;  %11492 = vst [vmem:[#allocation13_spill] sm:$0xff] %v9105_v0  ;;  %v9141_v57 = vpack.c.bf16 %v1746_v37, %v1742_v50  ;;  %v2141_v13 = vld [vmem:[%s11435_s6 + $0x68] sm:$0xff] }
 0x891   :  { %6662 = vmatpush1.bf16.msra.mxu0 %v9031_v30  ;;  %6694 = vmatpush1.bf16.msra.mxu1 %v9033_v8  ;;  %v1744_v8 = vld [vmem:[%s11433_s4 + $0x1a0] sm:$0xff] }
 0x892   :  { %6664 = vmatprep.subr.bf16.mxu0 %v9043_v60  ;;  %6696 = vmatprep.subr.bf16.mxu1 %v9045_v2  ;;  %v1740_v2 = vld [vmem:[%s11433_s4 + $0x180] sm:$0xff] }
 0x893   :  { %v9139_v22 = vpack.c.bf16 %v1744_v8, %v1740_v2  ;;  %v1750_v8 = vld [vmem:[%s11433_s4 + $0x1d0] sm:$0xff] }
 0x894   :  { %v1754_v2 = vld [vmem:[%s11433_s4 + $0x1f0] sm:$0xff] }
 0x895   :  { %6666 = vmatpush1.bf16.msra.mxu0 %v9067_v6  ;;  %6698 = vmatpush1.bf16.msra.mxu1 %v9069_v20  ;;  %v9148_v20 = vpack.c.bf16 %v1753_v59, %v1749_v46  ;;  %v9165_v37 = vpack.c.bf16 %v1754_v2, %v1750_v8  ;;  %v1691_v46 = vld [vmem:[%s11431_s2] sm:$0x3]  ;;  %v9260_v8 = vpack.c.bf16 %v2141_v13, %v2140_v4  ;;  %v2142_v2 = vld [vmem:[%s11435_s6 + $0x70] sm:$0xff] }
 0x896   :  { %6668 = vmatprep.subr.bf16.mxu0 %v9079_v7  ;;  %6700 = vmatprep.subr.bf16.mxu1 %v9081_v53  ;;  %v1748_v53 = vld [vmem:[%s11433_s4 + $0x1c0] sm:$0xff] }
 0x899   :  { %6670 = vmatpush1.bf16.msra.mxu0 %v9103_v58  ;;  %6702 = vmatpush1.bf16.msra.mxu1 %v9105_v0  ;;  %v1752_v0 = vld [vmem:[%s11433_s4 + $0x1e0] sm:$0xff] }
 0x89a   :  { %6672 = vmatprep.subr.bf16.mxu0 %v9115_v23  ;;  %6704 = vmatprep.subr.bf16.mxu1 %v9117_v3  ;;  %v9163_v50 = vpack.c.bf16 %v1752_v0, %v1748_v53  ;;  %v11493_v53 = vmov 0.0   ;;  %v2139_v0 = vld [vmem:[%s11435_s6 + $0x58] sm:$0xff] }
 0x89d   :  { %6674 = vmatpush1.bf16.msra.mxu0 %v9139_v22  ;;  %6706 = vmatpush1.bf16.msra.mxu1 %v9141_v57 }
 0x89e   :  { %6676 = vmatprep.subr.bf16.mxu0 %v9148_v20  ;;  %6708 = vmatprep.subr.bf16.mxu1 %v9150_v34 }
 0x8a1   :  { %6678 = vmatpush1.bf16.msra.mxu0 %v9163_v50  ;;  %6710 = vmatpush1.bf16.msra.mxu1 %v9165_v37 }
 0x8a2   :  { %6736 = vmatprep.subr.bf16.mxu1 %v8593_v38  ;;  %v2128_v38 = vld [vmem:[%s11435_s6] sm:$0xff] }
 0x8a4   :  { %2027 = vmatmul.mubr.f32.vlgmr.msra.gmra.mrb[16].mxu0 %v1691_v46  ;;  %2098 = vmatmul.mubr.f32.vlgmr.msra.gmra.mrb[16].mxu1 %v1691_v46  ;;  %v2143_v46 = vld [vmem:[%s11435_s6 + $0x78] sm:$0xff] }
 0x8a5   :  { %6738 = vmatpush1.bf16.msra.mxu1 %v8606_v49  ;;  %2450 = vmatprep.mubr.f32.mxu1 %v11493_v53  ;;  %v2129_v49 = vld [vmem:[%s11435_s6 + $0x8] sm:$0xff] }
 0x8a6   :  { %6740 = vmatprep.subr.bf16.mxu1 %v8629_v62  ;;  %v9198_v62 = vpack.c.bf16 %v2129_v49, %v2128_v38  ;;  %5858 = vmatprep.mubr.msk.f32.mxu0 %vm7938_vm0, %v11493_v53  ;;  %v9270_v38 = vpack.c.bf16 %v2143_v46, %v2142_v2 }
 0x8a9   :  { %6742 = vmatpush1.bf16.msra.mxu1 %v8642_v11  ;;  %v11450_v11 = vmov 0.0|0.0  }
 0x8aa   :  { %6744 = vmatprep.subr.bf16.mxu1 %v8664_v61  ;;  %6711 = vmatprep.subr.bf16.mxu0 %v11450_v11  ;;  %v2130_v61 = vld [vmem:[%s11435_s6 + $0x10] sm:$0xff] }
 0x8ab   :  { %6713 = vmatpush3.bf16.msra.mxu0 %v9198_v62 }
 0x8ac   :  { %6714 = vmatprep.subr.bf16.mxu0 %v11450_v11 }
 0x8ad   :  { %6746 = vmatpush1.bf16.msra.mxu1 %v8678_v18  ;;  %v2131_v18 = vld [vmem:[%s11435_s6 + $0x18] sm:$0xff] }
 0x8ae   :  { %6748 = vmatprep.subr.bf16.mxu1 %v8702_v44  ;;  %v9209_v44 = vpack.c.bf16 %v2131_v18, %v2130_v61 }
 0x8b0   :  { %6716 = vmatpush3.bf16.msra.mxu0 %v9209_v44 }
 0x8b1   :  { %6750 = vmatpush1.bf16.msra.mxu1 %v8716_v63  ;;  %6717 = vmatprep.subr.bf16.mxu0 %v11450_v11  ;;  %v2132_v63 = vld [vmem:[%s11435_s6 + $0x20] sm:$0xff] }
 0x8b2   :  { %6752 = vmatprep.subr.bf16.mxu1 %v8731_v19  ;;  %v2133_v19 = vld [vmem:[%s11435_s6 + $0x28] sm:$0xff] }
 0x8b5   :  { %6754 = vmatpush1.bf16.msra.mxu1 %v8764_v32  ;;  %v9219_v32 = vpack.c.bf16 %v2133_v19, %v2132_v63 }
 0x8b6   :  { %6756 = vmatprep.subr.bf16.mxu1 %v8773_v43  ;;  %v2134_v43 = vld [vmem:[%s11435_s6 + $0x30] sm:$0xff] }
 0x8b7   :  { %6719 = vmatpush3.bf16.msra.mxu0 %v9219_v32 }
 0x8b8   :  { %6720 = vmatprep.subr.bf16.mxu0 %v11450_v11 }
 0x8b9   :  { %6758 = vmatpush1.bf16.msra.mxu1 %v8803_v12  ;;  %v2135_v12 = vld [vmem:[%s11435_s6 + $0x38] sm:$0xff] }
 0x8ba   :  { %6760 = vmatprep.subr.bf16.mxu1 %v8809_v21  ;;  %v9229_v21 = vpack.c.bf16 %v2135_v12, %v2134_v43 }
 0x8bc   :  { %6722 = vmatpush3.bf16.msra.mxu0 %v9229_v21 }
 0x8bd   :  { %6762 = vmatpush1.bf16.msra.mxu1 %v8839_v39  ;;  %6723 = vmatprep.subr.bf16.mxu0 %v11450_v11  ;;  %v2136_v39 = vld [vmem:[%s11435_s6 + $0x40] sm:$0xff] }
 0x8be   :  { %6764 = vmatprep.subr.bf16.mxu1 %v8845_v52  ;;  %v2137_v52 = vld [vmem:[%s11435_s6 + $0x48] sm:$0xff] }
 0x8c1   :  { %6766 = vmatpush1.bf16.msra.mxu1 %v8875_v42  ;;  %v9239_v42 = vpack.c.bf16 %v2137_v52, %v2136_v39 }
 0x8c2   :  { %6800 = vmatprep.subr.bf16.mxu1 %v8881_v55  ;;  %v2138_v55 = vld [vmem:[%s11435_s6 + $0x50] sm:$0xff] }
 0x8c3   :  { %6725 = vmatpush3.bf16.msra.mxu0 %v9239_v42  ;;  %v9249_v59 = vpack.c.bf16 %v2139_v0, %v2138_v55 }
 0x8c4   :  { %6726 = vmatprep.subr.bf16.mxu0 %v11450_v11 }
 0x8c7   :  { %6728 = vmatpush3.bf16.msra.mxu0 %v9249_v59 }
 0x8c8   :  { %6729 = vmatprep.subr.bf16.mxu0 %v11450_v11 }
 0x8cb   :  { %6731 = vmatpush3.bf16.msra.mxu0 %v9260_v8 }
 0x8cc   :  { %6732 = vmatprep.subr.bf16.mxu0 %v11450_v11 }
 0x8cf   :  { %6734 = vmatpush3.bf16.msra.mxu0 %v9270_v38 }
 0x8d0   :  { %6768 = vmatprep.subr.bf16.mxu0 %v8604_v48 }
 0x977   :  { %v2028_v49 = vpop.f32.mrb[16].mxu0  ;;  %v2099_v61 = vpop.f32.mrb[16].mxu1 }
 0x978   :  { %v5655_v18 = vmul.f32 -1.442695, %v2028_v49  ;;  %v2030_v63 = vpop.f32.mrb[17].mxu0  ;;  %v2101_v19 = vpop.f32.mrb[17].mxu1 }
 0x979   :  { %v5656_v43 = vmul.f32 -1.442695, %v2030_v63  ;;  %v5657_v12 = vmul.f32 -1.442695, %v2101_v19 }
 0x97a   :  { %7808 = vpow2.f32 %v5655_v18 }
 0x97b   :  { %7810 = vpow2.f32 %v5656_v43 }
 0x97c   :  { %7812 = vpow2.f32 %v5657_v12  ;;  %v2900_v12 = vld [vmem:[%s11434_s5 + $0x60] sm:$0xff] }
 0x97d   :  { %7814 = vtanh.f32 %v2099_v61  ;;  %v2896_v61 = vld [vmem:[%s11434_s5 + $0x40] sm:$0xff] }
 0x984   :  { %v7809_v39 = vpop.eup %7808 }
 0x985   :  { %v7811_v52 = vpop.eup %7810  ;;  %v2107_v55 = vadd.f32 1.0, %v7809_v39  ;;  %v9399_v39 = vpack.c.bf16 %v2900_v12, %v2896_v61 }
 0x986   :  { %v2113_v0 = vadd.f32 1.0, %v7811_v52  ;;  %v7813_v4 = vpop.eup %7812  ;;  %v2905_v52 = vld [vmem:[%s11434_s5 + $0x88] sm:$0xff] }
 0x987   :  { %7816 = vrcp.f32 %v2107_v55  ;;  %v7815_v13 = vpop.eup %7814  ;;  %v2120_v49 = vadd.f32 1.0, %v7813_v4  ;;  %v2909_v55 = vld [vmem:[%s11434_s5 + $0xa8] sm:$0xff]  ;;  %v2904_v4 = vld [vmem:[%s11434_s5 + $0x80] sm:$0xff] }
 0x988   :  { %7818 = vrcp.f32 %v2113_v0  ;;  %v9409_v0 = vpack.c.bf16 %v2909_v55, %v2905_v52 }
 0x989   :  { %7820 = vrcp.f32 %v2120_v49 }
 0x991   :  { %v7817_v48 = vpop.eup %7816 }
 0x992   :  { %v7819_v2 = vpop.eup %7818  ;;  %v2124_v46 = vmul.f32 %v7817_v48, %v7815_v13  ;;  %v2908_v13 = vld [vmem:[%s11434_s5 + $0xa0] sm:$0xff] }
 0x993   :  { %v2123_v11 = vmul.f32 %v7819_v2, %v8896_v33  ;;  %v7821_v18 = vpop.eup %7820  ;;  %v9417_v48 = vpack.c.bf16 %v2908_v13, %v2904_v4  ;;  %v2913_v2 = vld [vmem:[%s11434_s5 + $0xc8] sm:$0xff]  ;;  %v2890_v13 = vld [vmem:[%s11434_s5 + $0x10] sm:$0xff] }
 0x995   :  { %v9276_v63 = vadd.f32 %v2124_v46, %v2123_v11  ;;  %v2893_v11 = vld [vmem:[%s11434_s5 + $0x28] sm:$0xff] }
 0x996   :  { %v2917_v46 = vld [vmem:[%s11434_s5 + $0xe8] sm:$0xff] }
 0x997   :  { %7822 = vtanh.f32 %v9276_v63  ;;  %v9427_v49 = vpack.c.bf16 %v2917_v46, %v2913_v2  ;;  %v2894_v2 = vld [vmem:[%s11434_s5 + $0x30] sm:$0xff]  ;;  %v2899_v46 = vld [vmem:[%s11434_s5 + $0x58] sm:$0xff] }
 0x9a1   :  { %v7823_v19 = vpop.eup %7822 }
 0x9a2   :  { %v2127_v43 = vmul.f32 %v7823_v19, %v7821_v18  ;;  %v2912_v18 = vld [vmem:[%s11434_s5 + $0xc0] sm:$0xff] }
 0x9a3   :  { %v2916_v19 = vld [vmem:[%s11434_s5 + $0xe0] sm:$0xff] }
 0x9a4   :  { %5859 = vmatmul.mubr.f32.vlgmr.msra.gmra.mrb[18].mxu0 %v2127_v43  ;;  %2451 = vmatmul.mubr.f32.vlgmr.msra.gmra.mrb[18].mxu1 %v2127_v43 }
 0x9a5   :  { %6770 = vmatpush1.bf16.msra.mxu0 %v8615_v54  ;;  %2521 = vmatprep.mubr.f32.mxu0 %v11493_v53  ;;  %v11495_v54 = vld [vmem:[#allocation5_spill] sm:$0xff] }
 0x9a6   :  { %6772 = vmatprep.subr.bf16.mxu0 %v8640_v10  ;;  %6802 = vmatpush1.bf16.msra.mxu1 %v8923_v24  ;;  %v11496_v10 = vld [vmem:[#allocation6_spill] sm:$0xff] }
 0x9a7   :  { %6804 = vmatprep.subr.bf16.mxu1 %v8933_v27  ;;  %2592 = vmatprep.mubr.f32.mxu1 %v11493_v53 }
 0x9a9   :  { %6774 = vmatpush1.bf16.msra.mxu0 %v8651_v15  ;;  %v11497_v15 = vld [vmem:[#allocation7_spill] sm:$0xff] }
 0x9aa   :  { %6776 = vmatprep.subr.bf16.mxu0 %v8676_v17  ;;  %6806 = vmatpush1.bf16.msra.mxu1 %v8957_v25  ;;  %v11498_v17 = vld [vmem:[#allocation8_spill] sm:$0xff] }
 0x9ab   :  { %6808 = vmatprep.subr.bf16.mxu1 %v8969_v45 }
 0x9ad   :  { %6778 = vmatpush1.bf16.msra.mxu0 %v8690_v31  ;;  %v11499_v31 = vld [vmem:[#allocation9_spill] sm:$0xff] }
 0x9ae   :  { %6780 = vmatprep.subr.bf16.mxu0 %v8704_v51  ;;  %6810 = vmatpush1.bf16.msra.mxu1 %v8995_v5  ;;  %v11500_v51 = vld [vmem:[#allocation10_spill] sm:$0xff] }
 0x9af   :  { %6812 = vmatprep.subr.bf16.mxu1 %v9007_v26 }
 0x9b1   :  { %6782 = vmatpush1.bf16.msra.mxu0 %v8729_v16  ;;  %v11501_v16 = vld [vmem:[#allocation11_spill] sm:$0xff] }
 0x9b2   :  { %6784 = vmatprep.subr.bf16.mxu0 %v8743_v36  ;;  %6814 = vmatpush1.bf16.msra.mxu1 %v9031_v30  ;;  %v11502_v36 = vld [vmem:[#allocation12_spill] sm:$0xff] }
 0x9b3   :  { %6816 = vmatprep.subr.bf16.mxu1 %v9043_v60  ;;  %v5661_v60 = vld [vmem:[%s11431_s2 + $0x2] sm:$0x3] }
 0x9b5   :  { %6786 = vmatpush1.bf16.msra.mxu0 %v8771_v41  ;;  %v11503_v41 = vld [vmem:[#allocation13_spill] sm:$0xff] }
 0x9b6   :  { %6788 = vmatprep.subr.bf16.mxu0 %v8785_v56  ;;  %6818 = vmatpush1.bf16.msra.mxu1 %v9067_v6  ;;  %v9332_v56 = vld [vmem:[%s11436_s7] ss:$0 sm:$0xff]  ;;  %v2252_v6 = vstv %s2249_s15 }
 0x9b7   :  { %6820 = vmatprep.subr.bf16.mxu1 %v9079_v7  ;;  %v11494_v7 = vmov 0.0|0.0  }
 0x9b9   :  { %6790 = vmatpush1.bf16.msra.mxu0 %v8807_v14 }
 0x9ba   :  { %6792 = vmatprep.subr.bf16.mxu0 %v8821_v9  ;;  %6822 = vmatpush1.bf16.msra.mxu1 %v9103_v58  ;;  %v2255_v58 = vstv %s2254_s16 }
 0x9bb   :  { %6824 = vmatprep.subr.bf16.mxu1 %v9115_v23 }
 0x9bd   :  { %6794 = vmatpush1.bf16.msra.mxu0 %v8843_v40 }
 0x9be   :  { %6796 = vmatprep.subr.bf16.mxu0 %v8857_v1  ;;  %6826 = vmatpush1.bf16.msra.mxu1 %v9139_v22  ;;  %v2253_v22 = vmul.f32 %v5661_v60, %v2252_v6 }
 0x9bf   :  { %6828 = vmatprep.subr.bf16.mxu1 %v9148_v20 }
 0x9c1   :  { %6798 = vmatpush1.bf16.msra.mxu0 %v8879_v47  ;;  %v11504_v47 = vlaneseq }
 0x9c2   :  { %6832 = vmatprep.subr.bf16.mxu0 %v8884_v29  ;;  %6830 = vmatpush1.bf16.msra.mxu1 %v9163_v50 }
 0x9c3   :  { %6863 = vmatprep.subr.bf16.mxu1 %v11494_v7  ;;  %v9340_v29 = vand.u32 127, %v11504_v47 }
 0x9c4   :  { %2522 = vmatmul.mubr.f32.vlgmr.msra.gmra.mrb[20].mxu0 %v2127_v43  ;;  %v9435_v43 = vpack.c.bf16 %v2916_v19, %v2912_v18 }
 0x9c5   :  { %6834 = vmatpush1.bf16.msra.mxu0 %v8925_v28  ;;  %2663 = vmatprep.mubr.f32.mxu0 %v11493_v53 }
 0x9c6   :  { %6836 = vmatprep.subr.bf16.mxu0 %v8935_v35 }
 0x9c9   :  { %6838 = vmatpush1.bf16.msra.mxu0 %v11495_v54  ;;  %v2921_v54 = vld [vmem:[%s11434_s5 + $0x108] sm:$0xff] }
 0x9ca   :  { %6840 = vmatprep.subr.bf16.mxu0 %v11496_v10  ;;  %v2925_v10 = vld [vmem:[%s11434_s5 + $0x128] sm:$0xff] }
 0x9cd   :  { %6842 = vmatpush1.bf16.msra.mxu0 %v11497_v15  ;;  %v9445_v15 = vpack.c.bf16 %v2925_v10, %v2921_v54  ;;  %v9536_v54 = vpack.c.bf16 %v2894_v2, %v2890_v13  ;;  %v2951_v13 = vld [vmem:[%s11434_s5 + $0x1f8] sm:$0xff] }
 0x9ce   :  { %6844 = vmatprep.subr.bf16.mxu0 %v11498_v17  ;;  %v2920_v17 = vld [vmem:[%s11434_s5 + $0x100] sm:$0xff] }
 0x9d1   :  { %6846 = vmatpush1.bf16.msra.mxu0 %v11499_v31  ;;  %v2924_v31 = vld [vmem:[%s11434_s5 + $0x120] sm:$0xff] }
 0x9d2   :  { %6848 = vmatprep.subr.bf16.mxu0 %v11500_v51  ;;  %v9453_v51 = vpack.c.bf16 %v2924_v31, %v2920_v17  ;;  %v2898_v31 = vld [vmem:[%s11434_s5 + $0x50] sm:$0xff] }
 0x9d5   :  { %6850 = vmatpush1.bf16.msra.mxu0 %v11501_v16  ;;  %v2929_v16 = vld [vmem:[%s11434_s5 + $0x148] sm:$0xff] }
 0x9d6   :  { %6852 = vmatprep.subr.bf16.mxu0 %v11502_v36  ;;  %v2933_v36 = vld [vmem:[%s11434_s5 + $0x168] sm:$0xff] }
 0x9d9   :  { %6854 = vmatpush1.bf16.msra.mxu0 %v11503_v41  ;;  %v2928_v41 = vld [vmem:[%s11434_s5 + $0x140] sm:$0xff] }
 0x9da   :  { %6856 = vmatprep.subr.bf16.mxu0 %v9117_v3 }
 0x9dd   :  { %6858 = vmatpush1.bf16.msra.mxu0 %v9141_v57 }
 0x9de   :  { %6860 = vmatprep.subr.bf16.mxu0 %v9150_v34 }
 0x9e1   :  { %6862 = vmatpush1.bf16.msra.mxu0 %v9165_v37 }
 0xa77   :  { %v2217_v14 = vpop.f32.mrb[18].mxu0 }
 0xa78   :  { %v2218_v9 = vadd.f32 %v9332_v56, %v2217_v14  ;;  %v5860_v40 = vpop.f32.mrb[19].mxu0  ;;  %v9466_v14 = vpack.c.bf16 %v2933_v36, %v2929_v16  ;;  %v2902_v16 = vld [vmem:[%s11434_s5 + $0x70] sm:$0xff]  ;;  %v2907_v36 = vld [vmem:[%s11434_s5 + $0x98] sm:$0xff] }
 0xa79   :  { %v2937_v40 = vld [vmem:[%s11434_s5 + $0x188] sm:$0xff] }
 0xa7a   :  { %2221 = vst [vmem:[%s11437_s8] sm:$0x3] %v2218_v9  ;;  %v2223_v1 = vsel %vm2222_vm1, %v2218_v9, -inf }
 0xa7b   :  { %2224 = vmax.xlane.f32.xlu0 %v2223_v1  ;;  %v2941_v1 = vld [vmem:[%s11434_s5 + $0x1a8] sm:$0xff] }
 0xb08   :  { %v2225_v33 = vpop.xlane.xlu0 %2224 }
 0xb09   :  { %vm2226_vm2 = vcmp.eq.f32.partialorder %v2218_v9, %v2225_v33  ;;  %v2932_v9 = vld [vmem:[%s11434_s5 + $0x160] sm:$0xff]  ;;  %v9479_v33 = vpack.c.bf16 %v2941_v1, %v2937_v40  ;;  %v2906_v1 = vld [vmem:[%s11434_s5 + $0x90] sm:$0xff] }
 0xb0a   :  { %v2227_v24 = vsel %vm2226_vm2, %v9340_v29, 128  ;;  %v9477_v47 = vpack.c.bf16 %v2932_v9, %v2928_v41  ;;  %v2911_v41 = vld [vmem:[%s11434_s5 + $0xb8] sm:$0xff]  ;;  %v9553_v9 = vpack.c.bf16 %v2902_v16, %v2898_v31 }
 0xb0b   :  { %v2228_v28 = vsel %vm2222_vm1, %v2227_v24, 2147483647  ;;  %v2936_v24 = vld [vmem:[%s11434_s5 + $0x180] sm:$0xff]  ;;  %v9557_v40 = vpack.c.bf16 %v2911_v41, %v2907_v36 }
 0xb0c   :  { %v2230_v27 = vshra.s32 %v2228_v28, 16  ;;  %v2229_v25 = vand.u32 65535, %v2228_v28  ;;  %v2940_v28 = vld [vmem:[%s11434_s5 + $0x1a0] sm:$0xff] }
 0xb0e   :  { %v2232_v35 = vcvt.s32.f32 %v2230_v27  ;;  %v2231_v45 = vcvt.s32.f32 %v2229_v25  ;;  %v2945_v27 = vld [vmem:[%s11434_s5 + $0x1c8] sm:$0xff]  ;;  %v2891_v25 = vld [vmem:[%s11434_s5 + $0x18] sm:$0xff] }
 0xb10   :  { %2233 = vmin.xlane.f32.xlu0 %v2232_v35 }
 0xb9d   :  { %v2234_v34 = vpop.xlane.xlu0 %2233 }
 0xb9e   :  { %vm2235_vm3 = vcmp.eq.f32.partialorder %v2232_v35, %v2234_v34  ;;  %v2240_v5 = vcvt.f32.s32 %v2234_v34  ;;  %v2949_v35 = vld [vmem:[%s11434_s5 + $0x1e8] sm:$0xff]  ;;  %v2895_v34 = vld [vmem:[%s11434_s5 + $0x38] sm:$0xff] }
 0xb9f   :  { %v2236_v3 = vsel %vm2235_vm3, %v2231_v45, inf  ;;  %v9501_v45 = vpack.c.bf16 %v2940_v28, %v2936_v24  ;;  %v2910_v24 = vld [vmem:[%s11434_s5 + $0xb0] sm:$0xff]  ;;  %v2915_v28 = vld [vmem:[%s11434_s5 + $0xd8] sm:$0xff] }
 0xba0   :  { %2237 = vmin.xlane.f32.xlu1 %v2236_v3  ;;  %v2241_v26 = vshll.u32 %v2240_v5, 16  ;;  %v9503_v3 = vpack.c.bf16 %v2895_v34, %v2891_v25  ;;  %v9506_v5 = vpack.c.bf16 %v2949_v35, %v2945_v27  ;;  %v2919_v27 = vld [vmem:[%s11434_s5 + $0xf8] sm:$0xff]  ;;  %v9573_v35 = vpack.c.bf16 %v2910_v24, %v2906_v1  ;;  %v2914_v34 = vld [vmem:[%s11434_s5 + $0xd0] sm:$0xff] }
 0xba1   :  { %v9576_v25 = vpack.c.bf16 %v2919_v27, %v2915_v28 }
 0xc2d   :  { %v2238_v23 = vpop.xlane.xlu1 %2237 }
 0xc2e   :  { %v2239_v30 = vcvt.f32.s32 %v2238_v23  ;;  %v2944_v23 = vld [vmem:[%s11434_s5 + $0x1c0] sm:$0xff] }
 0xc30   :  { %v2242_v20 = vadd.s32 %v2241_v26, %v2239_v30  ;;  %v2948_v26 = vld [vmem:[%s11434_s5 + $0x1e0] sm:$0xff] }
 0xc31   :  { %v9516_v30 = vpack.c.bf16 %v2948_v26, %v2944_v23  ;;  %v2918_v23 = vld [vmem:[%s11434_s5 + $0xf0] sm:$0xff]  ;;  %v2923_v26 = vld [vmem:[%s11434_s5 + $0x118] sm:$0xff] }
 0xc32   :  { %vm2243_vm4 = vcmp.eq.s32.totalorder %v9340_v29, %v2242_v20 }
 0xc33   :  { %v5659_v57 = vsel %vm2243_vm4, 1.0, %v11493_v53 }
 0xc34   :  { %v2256_v50 = vmul.f32 %v5659_v57, %v2255_v58 }
 0xc36   :  { %v2257_v37 = vadd.f32 %v2256_v50, %v2253_v22 }
 0xc38   :  { %2593 = vmatmul.mubr.f32.vlgmr.msra.gmra.mrb[18].mxu1 %v2257_v37  ;;  %2664 = vmatmul.mubr.f32.vlgmr.msra.gmra.mrb[20].mxu0 %v2257_v37 }
 0xc39   :  { %6865 = vmatpush3.bf16.msra.mxu1 %v9198_v62  ;;  %5893 = vmatprep.mubr.msk.f32.mxu1 %vm7938_vm0, %v11493_v53  ;;  %v2889_v62 = vld [vmem:[%s11434_s5 + $0x8] sm:$0xff] }
 0xc3a   :  { %6866 = vmatprep.subr.bf16.mxu1 %v11494_v7  ;;  %3016 = vmatprep.mubr.f32.mxu0 %v11493_v53 }
 0xc3d   :  { %6868 = vmatpush3.bf16.msra.mxu1 %v9209_v44  ;;  %v9373_v44 = vpack.c.bf16 %v2893_v11, %v2889_v62 }
 0xc3e   :  { %6869 = vmatprep.subr.bf16.mxu1 %v11494_v7 }
 0xc3f   :  { %6888 = vmatprep.subr.bf16.mxu0 %v9373_v44 }
 0xc41   :  { %6871 = vmatpush3.bf16.msra.mxu1 %v9219_v32  ;;  %v2888_v32 = vld [vmem:[%s11434_s5] sm:$0xff] }
 0xc42   :  { %6872 = vmatprep.subr.bf16.mxu1 %v11494_v7 }
 0xc45   :  { %6874 = vmatpush3.bf16.msra.mxu1 %v9229_v21  ;;  %v2892_v21 = vld [vmem:[%s11434_s5 + $0x20] sm:$0xff] }
 0xc46   :  { %6875 = vmatprep.subr.bf16.mxu1 %v11494_v7 }
 0xc49   :  { %6877 = vmatpush3.bf16.msra.mxu1 %v9239_v42  ;;  %v9381_v42 = vpack.c.bf16 %v2892_v21, %v2888_v32 }
 0xc4a   :  { %6878 = vmatprep.subr.bf16.mxu1 %v11494_v7 }
 0xc4b   :  { %6890 = vmatpush1.bf16.msra.mxu0 %v9381_v42 }
 0xc4d   :  { %6880 = vmatpush3.bf16.msra.mxu1 %v9249_v59  ;;  %v2897_v59 = vld [vmem:[%s11434_s5 + $0x48] sm:$0xff] }
 0xc4e   :  { %6881 = vmatprep.subr.bf16.mxu1 %v11494_v7 }
 0xc51   :  { %6883 = vmatpush3.bf16.msra.mxu1 %v9260_v8  ;;  %v2901_v8 = vld [vmem:[%s11434_s5 + $0x68] sm:$0xff] }
 0xc52   :  { %6884 = vmatprep.subr.bf16.mxu1 %v11494_v7 }
 0xc55   :  { %6886 = vmatpush3.bf16.msra.mxu1 %v9270_v38  ;;  %v9391_v38 = vpack.c.bf16 %v2901_v8, %v2897_v59 }
 0xc56   :  { %6920 = vmatprep.subr.bf16.mxu1 %v9503_v3 }
 0xc57   :  { %6892 = vmatprep.subr.bf16.mxu0 %v9391_v38 }
 0xc58   :  { %6894 = vmatpush1.bf16.msra.mxu0 %v9399_v39 }
 0xc59   :  { %6896 = vmatprep.subr.bf16.mxu0 %v9409_v0 }
 0xc5c   :  { %6898 = vmatpush1.bf16.msra.mxu0 %v9417_v48 }
 0xc5d   :  { %6900 = vmatprep.subr.bf16.mxu0 %v9427_v49 }
 0xc60   :  { %6902 = vmatpush1.bf16.msra.mxu0 %v9435_v43 }
 0xc61   :  { %6904 = vmatprep.subr.bf16.mxu0 %v9445_v15 }
 0xc64   :  { %6906 = vmatpush1.bf16.msra.mxu0 %v9453_v51 }
 0xc65   :  { %6908 = vmatprep.subr.bf16.mxu0 %v9466_v14 }
 0xc68   :  { %6910 = vmatpush1.bf16.msra.mxu0 %v9477_v47 }
 0xc69   :  { %6912 = vmatprep.subr.bf16.mxu0 %v9479_v33 }
 0xc6c   :  { %6914 = vmatpush1.bf16.msra.mxu0 %v9501_v45 }
 0xc6d   :  { %6916 = vmatprep.subr.bf16.mxu0 %v9506_v5 }
 0xc70   :  { %6918 = vmatpush1.bf16.msra.mxu0 %v9516_v30 }
 0xd0b   :  { %v2594_v60 = vpop.f32.mrb[18].mxu1  ;;  %v2665_v6 = vpop.f32.mrb[20].mxu0 }
 0xd0c   :  { %v5662_v20 = vmul.f32 -1.442695, %v2594_v60  ;;  %v2596_v58 = vpop.f32.mrb[19].mxu1  ;;  %v2667_v22 = vpop.f32.mrb[21].mxu0  ;;  %v2927_v60 = vld [vmem:[%s11434_s5 + $0x138] sm:$0xff] }
 0xd0d   :  { %v5663_v57 = vmul.f32 -1.442695, %v2596_v58  ;;  %v5664_v50 = vmul.f32 -1.442695, %v2667_v22  ;;  %v2922_v58 = vld [vmem:[%s11434_s5 + $0x110] sm:$0xff] }
 0xd0e   :  { %7824 = vpow2.f32 %v5662_v20  ;;  %v9594_v20 = vpack.c.bf16 %v2927_v60, %v2923_v26  ;;  %v2926_v22 = vld [vmem:[%s11434_s5 + $0x130] sm:$0xff]  ;;  %v2831_v60 = vld [vmem:[%s11433_s4 + $0x38] sm:$0xff] }
 0xd0f   :  { %7826 = vpow2.f32 %v5663_v57  ;;  %v2931_v57 = vld [vmem:[%s11434_s5 + $0x158] sm:$0xff] }
 0xd10   :  { %7828 = vpow2.f32 %v5664_v50  ;;  %v2935_v50 = vld [vmem:[%s11434_s5 + $0x178] sm:$0xff] }
 0xd11   :  { %7830 = vtanh.f32 %v2665_v6  ;;  %v9591_v6 = vpack.c.bf16 %v2918_v23, %v2914_v34  ;;  %v2829_v34 = vld [vmem:[%s11433_s4 + $0x28] sm:$0xff]  ;;  %v2827_v23 = vld [vmem:[%s11433_s4 + $0x18] sm:$0xff] }
 0xd18   :  { %v7825_v37 = vpop.eup %7824 }
 0xd19   :  { %v7827_v62 = vpop.eup %7826  ;;  %v2673_v11 = vadd.f32 1.0, %v7825_v37  ;;  %v9609_v37 = vpack.c.bf16 %v2926_v22, %v2922_v58  ;;  %v2824_v58 = vld [vmem:[%s11433_s4] sm:$0xff] }
 0xd1a   :  { %v2679_v32 = vadd.f32 1.0, %v7827_v62  ;;  %v7829_v21 = vpop.eup %7828  ;;  %v9612_v62 = vpack.c.bf16 %v2935_v50, %v2931_v57  ;;  %v2828_v22 = vld [vmem:[%s11433_s4 + $0x20] sm:$0xff]  ;;  %v9695_v57 = vpack.c.bf16 %v2831_v60, %v2827_v23  ;;  %v2847_v23 = vld [vmem:[%s11433_s4 + $0xb8] sm:$0xff] }
 0xd1b   :  { %7832 = vrcp.f32 %v2673_v11  ;;  %v7831_v59 = vpop.eup %7830  ;;  %v2686_v52 = vadd.f32 1.0, %v7829_v21  ;;  %v2930_v11 = vld [vmem:[%s11434_s5 + $0x150] sm:$0xff]  ;;  %v2939_v21 = vld [vmem:[%s11434_s5 + $0x198] sm:$0xff]  ;;  %v9697_v50 = vpack.c.bf16 %v2828_v22, %v2824_v58  ;;  %v2840_v60 = vld [vmem:[%s11433_s4 + $0x80] sm:$0xff] }
 0xd1c   :  { %7834 = vrcp.f32 %v2679_v32  ;;  %v2934_v32 = vld [vmem:[%s11434_s5 + $0x170] sm:$0xff]  ;;  %v2844_v22 = vld [vmem:[%s11433_s4 + $0xa0] sm:$0xff] }
 0xd1d   :  { %7836 = vrcp.f32 %v2686_v52  ;;  %v2942_v52 = vld [vmem:[%s11434_s5 + $0x1b0] sm:$0xff] }
 0xd25   :  { %v7833_v8 = vpop.eup %7832 }
 0xd26   :  { %v7835_v61 = vpop.eup %7834  ;;  %v2690_v12 = vmul.f32 %v7833_v8, %v7831_v59  ;;  %v2943_v59 = vld [vmem:[%s11434_s5 + $0x1b8] sm:$0xff]  ;;  %v9627_v8 = vpack.c.bf16 %v2934_v32, %v2930_v11  ;;  %v2826_v11 = vld [vmem:[%s11433_s4 + $0x10] sm:$0xff] }
 0xd27   :  { %v2689_v55 = vmul.f32 %v7835_v61, %v9276_v63  ;;  %v2903_v63 = vld [vmem:[%s11434_s5 + $0x78] sm:$0xff]  ;;  %v7837_v18 = vpop.eup %7836  ;;  %v9630_v61 = vpack.c.bf16 %v2943_v59, %v2939_v21  ;;  %v2830_v32 = vld [vmem:[%s11433_s4 + $0x30] sm:$0xff]  ;;  %v2833_v21 = vld [vmem:[%s11433_s4 + $0x48] sm:$0xff] }
 0xd28   :  { %v9538_v17 = vpack.c.bf16 %v2903_v63, %v2899_v46  ;;  %v2946_v63 = vld [vmem:[%s11434_s5 + $0x1d0] sm:$0xff]  ;;  %v9709_v59 = vpack.c.bf16 %v2830_v32, %v2826_v11 }
 0xd29   :  { %v9521_v4 = vadd.f32 %v2690_v12, %v2689_v55  ;;  %v2938_v12 = vld [vmem:[%s11434_s5 + $0x190] sm:$0xff]  ;;  %v2947_v55 = vld [vmem:[%s11434_s5 + $0x1d8] sm:$0xff] }
 0xd2a   :  { %v9645_v2 = vpack.c.bf16 %v2942_v52, %v2938_v12  ;;  %v9648_v46 = vpack.c.bf16 %v2951_v13, %v2947_v55  ;;  %11505 = vst [vmem:[#allocation5_spill] sm:$0xff] %v9709_v59  ;;  %v2837_v12 = vld [vmem:[%s11433_s4 + $0x68] sm:$0xff]  ;;  %v2835_v52 = vld [vmem:[%s11433_s4 + $0x58] sm:$0xff]  ;;  %v2842_v11 = vld [vmem:[%s11433_s4 + $0x90] sm:$0xff] }
 0xd2b   :  { %7838 = vtanh.f32 %v9521_v4  ;;  %v2839_v55 = vld [vmem:[%s11433_s4 + $0x78] sm:$0xff]  ;;  %v9722_v13 = vpack.c.bf16 %v2837_v12, %v2833_v21  ;;  %v2846_v32 = vld [vmem:[%s11433_s4 + $0xb0] sm:$0xff]  ;;  %v9774_v21 = vpack.c.bf16 %v2844_v22, %v2840_v60  ;;  %v2849_v12 = vld [vmem:[%s11433_s4 + $0xc8] sm:$0xff] }
 0xd2c   :  { %v2857_v60 = vld [vmem:[%s11433_s4 + $0x108] sm:$0xff] }
 0xd2d   :  { %v2861_v22 = vld [vmem:[%s11433_s4 + $0x128] sm:$0xff] }
 0xd35   :  { %v7839_v19 = vpop.eup %7838 }
 0xd36   :  { %v2693_v10 = vmul.f32 %v7839_v19, %v7837_v18  ;;  %v2950_v18 = vld [vmem:[%s11434_s5 + $0x1f0] sm:$0xff] }
 0xd37   :  { %v9657_v19 = vpack.c.bf16 %v2950_v18, %v2946_v63  ;;  %v9724_v63 = vpack.c.bf16 %v2839_v55, %v2835_v52  ;;  %v2832_v18 = vld [vmem:[%s11433_s4 + $0x40] sm:$0xff]  ;;  %v2853_v52 = vld [vmem:[%s11433_s4 + $0xe8] sm:$0xff]  ;;  %v2851_v55 = vld [vmem:[%s11433_s4 + $0xd8] sm:$0xff] }
 0xd38   :  { %5894 = vmatmul.mubr.f32.vlgmr.msra.gmra.mrb[20].mxu1 %v2693_v10  ;;  %3017 = vmatmul.mubr.f32.vlgmr.msra.gmra.mrb[22].mxu0 %v2693_v10 }
 0xd39   :  { %6922 = vmatpush1.bf16.msra.mxu1 %v9536_v54  ;;  %3087 = vmatprep.mubr.f32.mxu1 %v11493_v53  ;;  %11506 = vst [vmem:[#allocation6_spill] sm:$0xff] %v9724_v63 }
 0xd3a   :  { %6924 = vmatprep.subr.bf16.mxu1 %v9538_v17  ;;  %3158 = vmatprep.mubr.f32.mxu0 %v11493_v53 }
 0xd3d   :  { %6926 = vmatpush1.bf16.msra.mxu1 %v9553_v9 }
 0xd3e   :  { %6928 = vmatprep.subr.bf16.mxu1 %v9557_v40 }
 0xd41   :  { %6930 = vmatpush1.bf16.msra.mxu1 %v9573_v35 }
 0xd42   :  { %6932 = vmatprep.subr.bf16.mxu1 %v9576_v25 }
 0xd45   :  { %6934 = vmatpush1.bf16.msra.mxu1 %v9591_v6 }
 0xd46   :  { %6936 = vmatprep.subr.bf16.mxu1 %v9594_v20 }
 0xd49   :  { %6938 = vmatpush1.bf16.msra.mxu1 %v9609_v37 }
 0xd4a   :  { %6940 = vmatprep.subr.bf16.mxu1 %v9612_v62 }
 0xd4d   :  { %6942 = vmatpush1.bf16.msra.mxu1 %v9627_v8 }
 0xd4e   :  { %6944 = vmatprep.subr.bf16.mxu1 %v9630_v61 }
 0xd51   :  { %6946 = vmatpush1.bf16.msra.mxu1 %v9645_v2 }
 0xd52   :  { %6948 = vmatprep.subr.bf16.mxu1 %v9648_v46 }
 0xd55   :  { %6950 = vmatpush1.bf16.msra.mxu1 %v9657_v19 }
 0xd56   :  { %6984 = vmatprep.subr.bf16.mxu1 %v9695_v57 }
 0xd58   :  { %3088 = vmatmul.mubr.f32.vlgmr.msra.gmra.mrb[22].mxu1 %v2693_v10 }
 0xd59   :  { %3229 = vmatprep.mubr.f32.mxu1 %v11493_v53  ;;  %6986 = vmatpush1.bf16.msra.mxu1 %v9709_v59 }
 0xd5a   :  { %6988 = vmatprep.subr.bf16.mxu1 %v9724_v63  ;;  %v2868_v63 = vld [vmem:[%s11433_s4 + $0x160] sm:$0xff] }
 0xe0b   :  { %v2783_v31 = vpop.f32.mrb[20].mxu1 }
 0xe0c   :  { %v2784_v16 = vadd.f32 %v9332_v56, %v2783_v31  ;;  %v5895_v36 = vpop.f32.mrb[21].mxu1  ;;  %v2825_v56 = vld [vmem:[%s11433_s4 + $0x8] sm:$0xff]  ;;  %v2836_v31 = vld [vmem:[%s11433_s4 + $0x60] sm:$0xff] }
 0xe0d   :  { %v9684_v26 = vpack.c.bf16 %v2829_v34, %v2825_v56  ;;  %v9736_v36 = vpack.c.bf16 %v2836_v31, %v2832_v18  ;;  %v2843_v34 = vld [vmem:[%s11433_s4 + $0x98] sm:$0xff]  ;;  %v9787_v18 = vpack.c.bf16 %v2846_v32, %v2842_v11  ;;  %v9789_v31 = vpack.c.bf16 %v2853_v52, %v2849_v12 }
 0xe0e   :  { %5666 = vst [vmem:[%s11437_s8 + $0x2] sm:$0x3] %v2784_v16  ;;  %v2789_v41 = vsel %vm2222_vm1, %v2784_v16, -inf  ;;  %v9762_v58 = vpack.c.bf16 %v2847_v23, %v2843_v34  ;;  %v2850_v34 = vld [vmem:[%s11433_s4 + $0xd0] sm:$0xff]  ;;  %v2859_v11 = vld [vmem:[%s11433_s4 + $0x118] sm:$0xff] }
 0xe0f   :  { %2790 = vmax.xlane.f32.xlu1 %v2789_v41  ;;  %6952 = vmatprep.subr.bf16.mxu0 %v9684_v26  ;;  %v2838_v41 = vld [vmem:[%s11433_s4 + $0x70] sm:$0xff]  ;;  %11509 = vst [vmem:[#allocation9_spill] sm:$0xff] %v9787_v18  ;;  %v2863_v32 = vld [vmem:[%s11433_s4 + $0x138] sm:$0xff] }
 0xe10   :  { %6954 = vmatpush1.bf16.msra.mxu0 %v9697_v50  ;;  %11508 = vst [vmem:[#allocation8_spill] sm:$0xff] %v9762_v58  ;;  %v2854_v23 = vld [vmem:[%s11433_s4 + $0xf0] sm:$0xff] }
 0xe11   :  { %6956 = vmatprep.subr.bf16.mxu0 %v9722_v13  ;;  %v9826_v52 = vpack.c.bf16 %v2854_v23, %v2850_v34  ;;  %v2862_v34 = vld [vmem:[%s11433_s4 + $0x130] sm:$0xff]  ;;  %v2865_v23 = vld [vmem:[%s11433_s4 + $0x148] sm:$0xff] }
 0xe13   :  { %11511 = vst [vmem:[#allocation11_spill] sm:$0xff] %v9826_v52 }
 0xe14   :  { %6958 = vmatpush1.bf16.msra.mxu0 %v9736_v36 }
 0xe9c   :  { %v2791_v1 = vpop.xlane.xlu1 %2790 }
 0xe9d   :  { %vm2792_vm5 = vcmp.eq.f32.partialorder %v2784_v16, %v2791_v1  ;;  %v2834_v16 = vld [vmem:[%s11433_s4 + $0x50] sm:$0xff]  ;;  %v2841_v1 = vld [vmem:[%s11433_s4 + $0x88] sm:$0xff] }
 0xe9e   :  { %v2793_v24 = vsel %vm2792_vm5, %v9340_v29, 128 }
 0xe9f   :  { %v9669_v28 = vsel %vm2222_vm1, %v2793_v24, 2147483647  ;;  %v2845_v24 = vld [vmem:[%s11433_s4 + $0xa8] sm:$0xff] }
 0xea0   :  { %v2796_v10 = vshra.s32 %v9669_v28, 16  ;;  %v9751_v56 = vpack.c.bf16 %v2845_v24, %v2841_v1  ;;  %v2852_v1 = vld [vmem:[%s11433_s4 + $0xe0] sm:$0xff] }
 0xea2   :  { %v9672_v27 = vcvt.s32.f32 %v2796_v10  ;;  %v9749_v10 = vpack.c.bf16 %v2838_v41, %v2834_v16  ;;  %6960 = vmatprep.subr.bf16.mxu0 %v9751_v56  ;;  %v2855_v16 = vld [vmem:[%s11433_s4 + $0xf8] sm:$0xff]  ;;  %v2848_v41 = vld [vmem:[%s11433_s4 + $0xc0] sm:$0xff] }
 0xea3   :  { %v9801_v24 = vpack.c.bf16 %v2855_v16, %v2851_v55  ;;  %6962 = vmatpush1.bf16.msra.mxu0 %v9774_v21  ;;  %v9822_v12 = vpack.c.bf16 %v2852_v1, %v2848_v41  ;;  %v9828_v55 = vpack.c.bf16 %v2861_v22, %v2857_v60  ;;  %v2856_v16 = vld [vmem:[%s11433_s4 + $0x100] sm:$0xff]  ;;  %v2858_v41 = vld [vmem:[%s11433_s4 + $0x110] sm:$0xff]  ;;  %v9840_v1 = vpack.c.bf16 %v2863_v32, %v2859_v11  ;;  %v2869_v60 = vld [vmem:[%s11433_s4 + $0x168] sm:$0xff] }
 0xea4   :  { %2799 = vmin.xlane.f32.xlu0 %v9672_v27  ;;  %11507 = vst [vmem:[#allocation7_spill] sm:$0xff] %v9749_v10  ;;  %6990 = vmatpush1.bf16.msra.mxu1 %v9749_v10  ;;  %v2867_v22 = vld [vmem:[%s11433_s4 + $0x158] sm:$0xff]  ;;  %v2864_v10 = vld [vmem:[%s11433_s4 + $0x140] sm:$0xff] }
 0xea5   :  { %6992 = vmatprep.subr.bf16.mxu1 %v9762_v58  ;;  %11510 = vst [vmem:[#allocation10_spill] sm:$0xff] %v9801_v24  ;;  %6964 = vmatprep.subr.bf16.mxu0 %v9789_v31  ;;  %v2860_v58 = vld [vmem:[%s11433_s4 + $0x120] sm:$0xff]  ;;  %11512 = vst [vmem:[#allocation12_spill] sm:$0xff] %v9840_v1  ;;  %v2871_v11 = vld [vmem:[%s11433_s4 + $0x178] sm:$0xff] }
 0xea6   :  { %v9858_v32 = vpack.c.bf16 %v2860_v58, %v2856_v16  ;;  %v9873_v58 = vpack.c.bf16 %v2871_v11, %v2867_v22  ;;  %v2866_v16 = vld [vmem:[%s11433_s4 + $0x150] sm:$0xff] }
 0xea7   :  { %6966 = vmatpush1.bf16.msra.mxu0 %v9822_v12 }
 0xea8   :  { %6994 = vmatpush1.bf16.msra.mxu1 %v9787_v18  ;;  %6968 = vmatprep.subr.bf16.mxu0 %v9828_v55  ;;  %v9864_v18 = vpack.c.bf16 %v2869_v60, %v2865_v23  ;;  %11514 = vst [vmem:[#allocation14_spill] sm:$0xff] %v9873_v58  ;;  %v2795_v60 = vand.u32 65535, %v9669_v28  ;;  %v2879_v28 = vld [vmem:[%s11433_s4 + $0x1b8] sm:$0xff] }
 0xea9   :  { %6996 = vmatprep.subr.bf16.mxu1 %v9801_v24  ;;  %v9862_v24 = vpack.c.bf16 %v2862_v34, %v2858_v41  ;;  %v2870_v41 = vld [vmem:[%s11433_s4 + $0x170] sm:$0xff]  ;;  %v9882_v34 = vpack.c.bf16 %v2868_v63, %v2864_v10  ;;  %v2873_v10 = vld [vmem:[%s11433_s4 + $0x188] sm:$0xff] }
 0xeaa   :  { %v9886_v23 = vpack.c.bf16 %v2870_v41, %v2866_v16  ;;  %v2797_v11 = vcvt.s32.f32 %v2795_v60  ;;  %v2877_v16 = vld [vmem:[%s11433_s4 + $0x1a8] sm:$0xff]  ;;  %v2875_v41 = vld [vmem:[%s11433_s4 + $0x198] sm:$0xff]  ;;  %v2876_v60 = vld [vmem:[%s11433_s4 + $0x1a0] sm:$0xff] }
 0xeab   :  { %11513 = vst [vmem:[#allocation13_spill] sm:$0xff] %v9862_v24  ;;  %6970 = vmatpush1.bf16.msra.mxu0 %v9858_v32 }
 0xeac   :  { %6998 = vmatpush1.bf16.msra.mxu1 %v9826_v52  ;;  %6972 = vmatprep.subr.bf16.mxu0 %v9864_v18  ;;  %11515 = vst [vmem:[#allocation15_spill] sm:$0xff] %v9886_v23 }
 0xead   :  { %7000 = vmatprep.subr.bf16.mxu1 %v9840_v1 }
 0xeaf   :  { %6974 = vmatpush1.bf16.msra.mxu0 %v9882_v34 }
 0xeb0   :  { %7002 = vmatpush1.bf16.msra.mxu1 %v9862_v24 }
 0xeb1   :  { %7004 = vmatprep.subr.bf16.mxu1 %v9873_v58 }
 0xeb4   :  { %7006 = vmatpush1.bf16.msra.mxu1 %v9886_v23  ;;  %v9902_v23 = vpack.c.bf16 %v2877_v16, %v2873_v10  ;;  %v2874_v10 = vld [vmem:[%s11433_s4 + $0x190] sm:$0xff] }
 0xeb5   :  { %v2878_v16 = vld [vmem:[%s11433_s4 + $0x1b0] sm:$0xff] }
 0xeb6   :  { %6976 = vmatprep.subr.bf16.mxu0 %v9902_v23  ;;  %v9924_v58 = vpack.c.bf16 %v2878_v16, %v2874_v10  ;;  %v2887_v10 = vld [vmem:[%s11433_s4 + $0x1f8] sm:$0xff]  ;;  %v2880_v16 = vld [vmem:[%s11433_s4 + $0x1c0] sm:$0xff] }
 0xeb8   :  { %11517 = vst [vmem:[#allocation17_spill] sm:$0xff] %v9924_v58 }
 0xf31   :  { %v2800_v22 = vpop.xlane.xlu0 %2799 }
 0xf32   :  { %vm2801_vm6 = vcmp.eq.f32.partialorder %v9672_v27, %v2800_v22  ;;  %v2872_v27 = vld [vmem:[%s11433_s4 + $0x180] sm:$0xff] }
 0xf33   :  { %v2802_v63 = vsel %vm2801_vm6, %v2797_v11, inf  ;;  %v9913_v11 = vpack.c.bf16 %v2879_v28, %v2875_v41  ;;  %v2881_v41 = vld [vmem:[%s11433_s4 + $0x1c8] sm:$0xff] }
 0xf34   :  { %2803 = vmin.xlane.f32.xlu1 %v2802_v63  ;;  %v9915_v63 = vpack.c.bf16 %v2876_v60, %v2872_v27  ;;  %v2885_v28 = vld [vmem:[%s11433_s4 + $0x1e8] sm:$0xff]  ;;  %v2883_v27 = vld [vmem:[%s11433_s4 + $0x1d8] sm:$0xff] }
 0xf35   :  { %11516 = vst [vmem:[#allocation16_spill] sm:$0xff] %v9913_v11  ;;  %7008 = vmatprep.subr.bf16.mxu1 %v9913_v11  ;;  %v9938_v60 = vpack.c.bf16 %v2885_v28, %v2881_v41  ;;  %v2884_v11 = vld [vmem:[%s11433_s4 + $0x1e0] sm:$0xff]  ;;  %v9949_v24 = vpack.c.bf16 %v2887_v10, %v2883_v27  ;;  %v2882_v41 = vld [vmem:[%s11433_s4 + $0x1d0] sm:$0xff] }
 0xf36   :  { %6978 = vmatpush1.bf16.msra.mxu0 %v9915_v63  ;;  %7010 = vmatpush1.bf16.msra.mxu1 %v9924_v58  ;;  %v9951_v1 = vpack.c.bf16 %v2884_v11, %v2880_v16  ;;  %v2886_v28 = vld [vmem:[%s11433_s4 + $0x1f0] sm:$0xff]  ;;  %v2806_v11 = vcvt.f32.s32 %v2800_v22 }
 0xf37   :  { %11518 = vst [vmem:[#allocation18_spill] sm:$0xff] %v9949_v24  ;;  %6980 = vmatprep.subr.bf16.mxu0 %v9938_v60  ;;  %v9960_v58 = vpack.c.bf16 %v2886_v28, %v2882_v41  ;;  %7012 = vmatprep.subr.bf16.mxu1 %v9949_v24  ;;  %v5669_v41 = vld [vmem:[%s11431_s2 + $0x4] sm:$0x3]  ;;  %v2818_v28 = vstv %s2815_s28  ;;  %v3274_v22 = vld [vmem:[%s11435_s6 + $0x70] sm:$0xff] }
 0xf38   :  { %11519 = vst [vmem:[#allocation19_spill] sm:$0xff] %v9951_v1  ;;  %v2807_v10 = vshll.u32 %v2806_v11, 16  ;;  %v2819_v52 = vmul.f32 %v5669_v41, %v2818_v28  ;;  %v3275_v11 = vld [vmem:[%s11435_s6 + $0x78] sm:$0xff] }
 0xf39   :  { %11520 = vst [vmem:[#allocation20_spill] sm:$0xff] %v9960_v58 }
 0xf3a   :  { %6982 = vmatpush1.bf16.msra.mxu0 %v9951_v1  ;;  %7014 = vmatpush1.bf16.msra.mxu1 %v9960_v58  ;;  %v2821_v58 = vstv %s2820_s0 }
 0xf3b   :  { %7015 = vmatprep.subr.bf16.mxu0 %v11494_v7  ;;  %7040 = vmatprep.subr.bf16.mxu1 %v9373_v44 }
 0xfc1   :  { %v2804_v27 = vpop.xlane.xlu1 %2803 }
 0xfc2   :  { %v2805_v16 = vcvt.f32.s32 %v2804_v27  ;;  %v10066_v27 = vpack.c.bf16 %v3275_v11, %v3274_v22 }
 0xfc4   :  { %v2808_v24 = vadd.s32 %v2807_v10, %v2805_v16 }
 0xfc6   :  { %vm2809_vm7 = vcmp.eq.s32.totalorder %v9340_v29, %v2808_v24 }
 0xfc7   :  { %v5667_v44 = vsel %vm2809_vm7, 1.0, %v11493_v53 }
 0xfc8   :  { %v2822_v59 = vmul.f32 %v5667_v44, %v2821_v58 }
 0xfca   :  { %v2823_v1 = vadd.f32 %v2822_v59, %v2819_v52  ;;  %v3271_v59 = vld [vmem:[%s11435_s6 + $0x58] sm:$0xff]  ;;  %v3272_v52 = vld [vmem:[%s11435_s6 + $0x60] sm:$0xff] }
 0xfcc   :  { %3159 = vmatmul.mubr.f32.vlgmr.msra.gmra.mrb[22].mxu0 %v2823_v1  ;;  %3230 = vmatmul.mubr.f32.vlgmr.msra.gmra.mrb[22].mxu1 %v2823_v1  ;;  %v3273_v1 = vld [vmem:[%s11435_s6 + $0x68] sm:$0xff] }
 0xfcd   :  { %7042 = vmatpush1.bf16.msra.mxu1 %v9381_v42  ;;  %5928 = vmatprep.mubr.msk.f32.mxu0 %vm7938_vm0, %v11493_v53  ;;  %v3260_v42 = vld [vmem:[%s11435_s6] sm:$0xff]  ;;  %v10056_v58 = vpack.c.bf16 %v3273_v1, %v3272_v52 }
 0xfce   :  { %7044 = vmatprep.subr.bf16.mxu1 %v9391_v38  ;;  %3582 = vmatprep.mubr.f32.mxu1 %v11493_v53  ;;  %v3261_v38 = vld [vmem:[%s11435_s6 + $0x8] sm:$0xff] }
 0xfd1   :  { %7046 = vmatpush1.bf16.msra.mxu1 %v9399_v39  ;;  %v9997_v39 = vpack.c.bf16 %v3261_v38, %v3260_v42 }
 0xfd2   :  { %7048 = vmatprep.subr.bf16.mxu1 %v9409_v0  ;;  %v3262_v0 = vld [vmem:[%s11435_s6 + $0x10] sm:$0xff] }
 0xfd3   :  { %7017 = vmatpush3.bf16.msra.mxu0 %v9997_v39 }
 0xfd4   :  { %7018 = vmatprep.subr.bf16.mxu0 %v11494_v7 }
 0xfd5   :  { %7050 = vmatpush1.bf16.msra.mxu1 %v9417_v48  ;;  %v3263_v48 = vld [vmem:[%s11435_s6 + $0x18] sm:$0xff] }
 0xfd6   :  { %7052 = vmatprep.subr.bf16.mxu1 %v9427_v49  ;;  %v10007_v49 = vpack.c.bf16 %v3263_v48, %v3262_v0 }
 0xfd8   :  { %7020 = vmatpush3.bf16.msra.mxu0 %v10007_v49 }
 0xfd9   :  { %7054 = vmatpush1.bf16.msra.mxu1 %v9435_v43  ;;  %7021 = vmatprep.subr.bf16.mxu0 %v11494_v7  ;;  %v3264_v43 = vld [vmem:[%s11435_s6 + $0x20] sm:$0xff] }
 0xfda   :  { %7056 = vmatprep.subr.bf16.mxu1 %v9445_v15  ;;  %v3265_v15 = vld [vmem:[%s11435_s6 + $0x28] sm:$0xff] }
 0xfdd   :  { %7058 = vmatpush1.bf16.msra.mxu1 %v9453_v51  ;;  %v10017_v51 = vpack.c.bf16 %v3265_v15, %v3264_v43 }
 0xfde   :  { %7060 = vmatprep.subr.bf16.mxu1 %v9466_v14  ;;  %v3266_v14 = vld [vmem:[%s11435_s6 + $0x30] sm:$0xff] }
 0xfdf   :  { %7023 = vmatpush3.bf16.msra.mxu0 %v10017_v51 }
 0xfe0   :  { %7024 = vmatprep.subr.bf16.mxu0 %v11494_v7 }
 0xfe1   :  { %7062 = vmatpush1.bf16.msra.mxu1 %v9477_v47  ;;  %v3267_v47 = vld [vmem:[%s11435_s6 + $0x38] sm:$0xff] }
 0xfe2   :  { %7064 = vmatprep.subr.bf16.mxu1 %v9479_v33  ;;  %v10027_v33 = vpack.c.bf16 %v3267_v47, %v3266_v14 }
 0xfe4   :  { %7026 = vmatpush3.bf16.msra.mxu0 %v10027_v33 }
 0xfe5   :  { %7066 = vmatpush1.bf16.msra.mxu1 %v9501_v45  ;;  %7027 = vmatprep.subr.bf16.mxu0 %v11494_v7  ;;  %v3268_v45 = vld [vmem:[%s11435_s6 + $0x40] sm:$0xff] }
 0xfe6   :  { %7068 = vmatprep.subr.bf16.mxu1 %v9506_v5  ;;  %v3269_v5 = vld [vmem:[%s11435_s6 + $0x48] sm:$0xff] }
 0xfe9   :  { %7070 = vmatpush1.bf16.msra.mxu1 %v9516_v30  ;;  %v10037_v30 = vpack.c.bf16 %v3269_v5, %v3268_v45 }
 0xfea   :  { %7104 = vmatprep.subr.bf16.mxu1 %v9684_v26  ;;  %v3270_v26 = vld [vmem:[%s11435_s6 + $0x50] sm:$0xff] }
 0xfeb   :  { %7029 = vmatpush3.bf16.msra.mxu0 %v10037_v30  ;;  %v10047_v24 = vpack.c.bf16 %v3271_v59, %v3270_v26 }
 0xfec   :  { %7030 = vmatprep.subr.bf16.mxu0 %v11494_v7 }
 0xfef   :  { %7032 = vmatpush3.bf16.msra.mxu0 %v10047_v24 }
 0xff0   :  { %7033 = vmatprep.subr.bf16.mxu0 %v11494_v7 }
 0xff3   :  { %7035 = vmatpush3.bf16.msra.mxu0 %v10056_v58 }
 0xff4   :  { %7036 = vmatprep.subr.bf16.mxu0 %v11494_v7 }
 0xff7   :  { %7038 = vmatpush3.bf16.msra.mxu0 %v10066_v27 }
 0xff8   :  { %7072 = vmatprep.subr.bf16.mxu0 %v9503_v3 }
0x109f   :  { %v3160_v10 = vpop.f32.mrb[22].mxu0  ;;  %v3231_v16 = vpop.f32.mrb[22].mxu1 }
0x10a0   :  { %v5670_v41 = vmul.f32 -1.442695, %v3160_v10  ;;  %v3162_v28 = vpop.f32.mrb[23].mxu0  ;;  %v3233_v44 = vpop.f32.mrb[23].mxu1 }
0x10a1   :  { %v5671_v42 = vmul.f32 -1.442695, %v3162_v28  ;;  %v5672_v38 = vmul.f32 -1.442695, %v3233_v44  ;;  %v5677_v28 = vld [vmem:[%s11431_s2 + $0x6] sm:$0x3]  ;;  %v3384_v44 = vstv %s3381_s21 }
0x10a2   :  { %7840 = vpow2.f32 %v5670_v41 }
0x10a3   :  { %7842 = vpow2.f32 %v5671_v42 }
0x10a4   :  { %7844 = vpow2.f32 %v5672_v38  ;;  %v3387_v38 = vstv %s3386_s1 }
0x10a5   :  { %7846 = vtanh.f32 %v3231_v16 }
0x10ac   :  { %v7841_v0 = vpop.eup %7840 }
0x10ad   :  { %v7843_v48 = vpop.eup %7842  ;;  %v3239_v43 = vadd.f32 1.0, %v7841_v0  ;;  %v3385_v0 = vmul.f32 %v5677_v28, %v3384_v44 }
0x10ae   :  { %v3245_v15 = vadd.f32 1.0, %v7843_v48  ;;  %v7845_v14 = vpop.eup %7844 }
0x10af   :  { %7848 = vrcp.f32 %v3239_v43  ;;  %v7847_v47 = vpop.eup %7846  ;;  %v3252_v26 = vadd.f32 1.0, %v7845_v14 }
0x10b0   :  { %7850 = vrcp.f32 %v3245_v15 }
0x10b1   :  { %7852 = vrcp.f32 %v3252_v26  ;;  %v4041_v26 = vld [vmem:[%s11434_s5 + $0xa8] sm:$0xff] }
0x10b9   :  { %v7849_v3 = vpop.eup %7848 }
0x10ba   :  { %v7851_v45 = vpop.eup %7850  ;;  %v3256_v5 = vmul.f32 %v7849_v3, %v7847_v47  ;;  %v4028_v47 = vld [vmem:[%s11434_s5 + $0x40] sm:$0xff] }
0x10bb   :  { %v3255_v59 = vmul.f32 %v7851_v45, %v9521_v4  ;;  %v7853_v1 = vpop.eup %7852  ;;  %v11521_v4 = vld [vmem:[#allocation19_spill] sm:$0xff]  ;;  %v4032_v3 = vld [vmem:[%s11434_s5 + $0x60] sm:$0xff] }
0x10bc   :  { %v10192_v45 = vpack.c.bf16 %v4032_v3, %v4028_v47 }
0x10bd   :  { %v10072_v52 = vadd.f32 %v3256_v5, %v3255_v59  ;;  %v4037_v5 = vld [vmem:[%s11434_s5 + $0x88] sm:$0xff] }
0x10be   :  { %v10202_v59 = vpack.c.bf16 %v4041_v26, %v4037_v5 }
0x10bf   :  { %7854 = vtanh.f32 %v10072_v52 }
0x10c9   :  { %v7855_v22 = vpop.eup %7854 }
0x10ca   :  { %v3259_v11 = vmul.f32 %v7855_v22, %v7853_v1  ;;  %v4036_v1 = vld [vmem:[%s11434_s5 + $0x80] sm:$0xff] }
0x10cb   :  { %v4040_v22 = vld [vmem:[%s11434_s5 + $0xa0] sm:$0xff] }
0x10cc   :  { %5929 = vmatmul.mubr.f32.vlgmr.msra.gmra.mrb[24].mxu0 %v3259_v11  ;;  %3583 = vmatmul.mubr.f32.vlgmr.msra.gmra.mrb[24].mxu1 %v3259_v11 }
0x10cd   :  { %7074 = vmatpush1.bf16.msra.mxu0 %v9536_v54  ;;  %3653 = vmatprep.mubr.f32.mxu0 %v11493_v53  ;;  %v11522_v54 = vld [vmem:[#allocation5_spill] sm:$0xff] }
0x10ce   :  { %7076 = vmatprep.subr.bf16.mxu0 %v9538_v17  ;;  %7106 = vmatpush1.bf16.msra.mxu1 %v9697_v50  ;;  %v11523_v17 = vld [vmem:[#allocation6_spill] sm:$0xff] }
0x10cf   :  { %7108 = vmatprep.subr.bf16.mxu1 %v9722_v13  ;;  %3724 = vmatprep.mubr.f32.mxu1 %v11493_v53 }
0x10d1   :  { %7078 = vmatpush1.bf16.msra.mxu0 %v9553_v9  ;;  %v11524_v9 = vld [vmem:[#allocation7_spill] sm:$0xff] }
0x10d2   :  { %7080 = vmatprep.subr.bf16.mxu0 %v9557_v40  ;;  %7110 = vmatpush1.bf16.msra.mxu1 %v9736_v36  ;;  %v11525_v40 = vld [vmem:[#allocation8_spill] sm:$0xff] }
0x10d3   :  { %7112 = vmatprep.subr.bf16.mxu1 %v9751_v56 }
0x10d5   :  { %7082 = vmatpush1.bf16.msra.mxu0 %v9573_v35  ;;  %v11526_v35 = vld [vmem:[#allocation9_spill] sm:$0xff] }
0x10d6   :  { %7084 = vmatprep.subr.bf16.mxu0 %v9576_v25  ;;  %7114 = vmatpush1.bf16.msra.mxu1 %v9774_v21  ;;  %v11527_v25 = vld [vmem:[#allocation10_spill] sm:$0xff] }
0x10d7   :  { %7116 = vmatprep.subr.bf16.mxu1 %v9789_v31 }
0x10d9   :  { %7086 = vmatpush1.bf16.msra.mxu0 %v9591_v6  ;;  %v11528_v6 = vld [vmem:[#allocation11_spill] sm:$0xff] }
0x10da   :  { %7088 = vmatprep.subr.bf16.mxu0 %v9594_v20  ;;  %7118 = vmatpush1.bf16.msra.mxu1 %v9822_v12  ;;  %v11529_v20 = vld [vmem:[#allocation12_spill] sm:$0xff] }
0x10db   :  { %7120 = vmatprep.subr.bf16.mxu1 %v9828_v55 }
0x10dd   :  { %7090 = vmatpush1.bf16.msra.mxu0 %v9609_v37  ;;  %v11530_v37 = vld [vmem:[#allocation13_spill] sm:$0xff] }
0x10de   :  { %7092 = vmatprep.subr.bf16.mxu0 %v9612_v62  ;;  %7122 = vmatpush1.bf16.msra.mxu1 %v9858_v32  ;;  %v11531_v62 = vld [vmem:[#allocation14_spill] sm:$0xff] }
0x10df   :  { %7124 = vmatprep.subr.bf16.mxu1 %v9864_v18 }
0x10e1   :  { %7094 = vmatpush1.bf16.msra.mxu0 %v9627_v8  ;;  %v11532_v8 = vld [vmem:[#allocation15_spill] sm:$0xff] }
0x10e2   :  { %7096 = vmatprep.subr.bf16.mxu0 %v9630_v61  ;;  %7126 = vmatpush1.bf16.msra.mxu1 %v9882_v34  ;;  %v11533_v61 = vld [vmem:[#allocation16_spill] sm:$0xff] }
0x10e3   :  { %7128 = vmatprep.subr.bf16.mxu1 %v9902_v23 }
0x10e5   :  { %7098 = vmatpush1.bf16.msra.mxu0 %v9645_v2  ;;  %v11534_v2 = vld [vmem:[#allocation17_spill] sm:$0xff] }
0x10e6   :  { %7100 = vmatprep.subr.bf16.mxu0 %v9648_v46  ;;  %7130 = vmatpush1.bf16.msra.mxu1 %v9915_v63  ;;  %v11535_v46 = vld [vmem:[#allocation18_spill] sm:$0xff] }
0x10e7   :  { %7132 = vmatprep.subr.bf16.mxu1 %v9938_v60 }
0x10e9   :  { %7102 = vmatpush1.bf16.msra.mxu0 %v9657_v19  ;;  %v11536_v19 = vld [vmem:[#allocation20_spill] sm:$0xff] }
0x10ea   :  { %7136 = vmatprep.subr.bf16.mxu0 %v9695_v57  ;;  %7134 = vmatpush1.bf16.msra.mxu1 %v11521_v4  ;;  %v10128_v57 = vld [vmem:[%s11436_s7] ss:$0 sm:$0xff]  ;;  %v4045_v4 = vld [vmem:[%s11434_s5 + $0xc8] sm:$0xff] }
0x10eb   :  { %7167 = vmatprep.subr.bf16.mxu1 %v11494_v7 }
0x10ec   :  { %3654 = vmatmul.mubr.f32.vlgmr.msra.gmra.mrb[26].mxu0 %v3259_v11  ;;  %v10210_v11 = vpack.c.bf16 %v4040_v22, %v4036_v1  ;;  %v4022_v22 = vld [vmem:[%s11434_s5 + $0x10] sm:$0xff] }
0x10ed   :  { %7138 = vmatpush1.bf16.msra.mxu0 %v11522_v54  ;;  %3795 = vmatprep.mubr.f32.mxu0 %v11493_v53  ;;  %v4049_v54 = vld [vmem:[%s11434_s5 + $0xe8] sm:$0xff] }
0x10ee   :  { %7140 = vmatprep.subr.bf16.mxu0 %v11523_v17  ;;  %v10220_v17 = vpack.c.bf16 %v4049_v54, %v4045_v4  ;;  %v4026_v4 = vld [vmem:[%s11434_s5 + $0x30] sm:$0xff]  ;;  %v4031_v54 = vld [vmem:[%s11434_s5 + $0x58] sm:$0xff] }
0x10f1   :  { %7142 = vmatpush1.bf16.msra.mxu0 %v11524_v9  ;;  %v4044_v9 = vld [vmem:[%s11434_s5 + $0xc0] sm:$0xff] }
0x10f2   :  { %7144 = vmatprep.subr.bf16.mxu0 %v11525_v40  ;;  %v4048_v40 = vld [vmem:[%s11434_s5 + $0xe0] sm:$0xff] }
0x10f5   :  { %7146 = vmatpush1.bf16.msra.mxu0 %v11526_v35  ;;  %v10228_v35 = vpack.c.bf16 %v4048_v40, %v4044_v9 }
0x10f6   :  { %7148 = vmatprep.subr.bf16.mxu0 %v11527_v25  ;;  %v4053_v25 = vld [vmem:[%s11434_s5 + $0x108] sm:$0xff] }
0x10f9   :  { %7150 = vmatpush1.bf16.msra.mxu0 %v11528_v6  ;;  %v4057_v6 = vld [vmem:[%s11434_s5 + $0x128] sm:$0xff] }
0x10fa   :  { %7152 = vmatprep.subr.bf16.mxu0 %v11529_v20  ;;  %v10238_v20 = vpack.c.bf16 %v4057_v6, %v4053_v25  ;;  %v10329_v25 = vpack.c.bf16 %v4026_v4, %v4022_v22  ;;  %v4083_v22 = vld [vmem:[%s11434_s5 + $0x1f8] sm:$0xff] }
0x10fd   :  { %7154 = vmatpush1.bf16.msra.mxu0 %v11530_v37  ;;  %v4052_v37 = vld [vmem:[%s11434_s5 + $0x100] sm:$0xff] }
0x10fe   :  { %7156 = vmatprep.subr.bf16.mxu0 %v11531_v62  ;;  %v4056_v62 = vld [vmem:[%s11434_s5 + $0x120] sm:$0xff] }
0x1101   :  { %7158 = vmatpush1.bf16.msra.mxu0 %v11532_v8  ;;  %v10246_v8 = vpack.c.bf16 %v4056_v62, %v4052_v37  ;;  %v4030_v62 = vld [vmem:[%s11434_s5 + $0x50] sm:$0xff] }
0x1102   :  { %7160 = vmatprep.subr.bf16.mxu0 %v11533_v61  ;;  %v4061_v61 = vld [vmem:[%s11434_s5 + $0x148] sm:$0xff] }
0x1105   :  { %7162 = vmatpush1.bf16.msra.mxu0 %v11534_v2  ;;  %v4065_v2 = vld [vmem:[%s11434_s5 + $0x168] sm:$0xff] }
0x1106   :  { %7164 = vmatprep.subr.bf16.mxu0 %v11535_v46  ;;  %v4060_v46 = vld [vmem:[%s11434_s5 + $0x140] sm:$0xff] }
0x1109   :  { %7166 = vmatpush1.bf16.msra.mxu0 %v11536_v19  ;;  %v10259_v19 = vpack.c.bf16 %v4065_v2, %v4061_v61  ;;  %v4034_v61 = vld [vmem:[%s11434_s5 + $0x70] sm:$0xff]  ;;  %v4039_v2 = vld [vmem:[%s11434_s5 + $0x98] sm:$0xff] }
0x119f   :  { %v3349_v50 = vpop.f32.mrb[24].mxu0 }
0x11a0   :  { %v3350_v13 = vadd.f32 %v10128_v57, %v3349_v50  ;;  %v5930_v36 = vpop.f32.mrb[25].mxu0  ;;  %v4064_v50 = vld [vmem:[%s11434_s5 + $0x160] sm:$0xff] }
0x11a1   :  { %v4073_v36 = vld [vmem:[%s11434_s5 + $0x1a8] sm:$0xff] }
0x11a2   :  { %5674 = vst [vmem:[%s11437_s8 + $0x4] sm:$0x3] %v3350_v13  ;;  %v3355_v56 = vsel %vm2222_vm1, %v3350_v13, -inf }
0x11a3   :  { %3356 = vmax.xlane.f32.xlu0 %v3355_v56  ;;  %v10270_v56 = vpack.c.bf16 %v4064_v50, %v4060_v46  ;;  %v4043_v46 = vld [vmem:[%s11434_s5 + $0xb8] sm:$0xff]  ;;  %v10346_v50 = vpack.c.bf16 %v4034_v61, %v4030_v62 }
0x1230   :  { %v3357_v21 = vpop.xlane.xlu0 %3356 }
0x1231   :  { %vm3358_vm8 = vcmp.eq.f32.partialorder %v3350_v13, %v3357_v21  ;;  %v4069_v13 = vld [vmem:[%s11434_s5 + $0x188] sm:$0xff] }
0x1232   :  { %v3359_v18 = vsel %vm3358_vm8, %v9340_v29, 128  ;;  %v10272_v21 = vpack.c.bf16 %v4073_v36, %v4069_v13  ;;  %v10350_v13 = vpack.c.bf16 %v4043_v46, %v4039_v2  ;;  %v4038_v36 = vld [vmem:[%s11434_s5 + $0x90] sm:$0xff] }
0x1233   :  { %v3360_v31 = vsel %vm2222_vm1, %v3359_v18, 2147483647  ;;  %v4068_v18 = vld [vmem:[%s11434_s5 + $0x180] sm:$0xff] }
0x1234   :  { %v3362_v12 = vshra.s32 %v3360_v31, 16  ;;  %v3361_v32 = vand.u32 65535, %v3360_v31  ;;  %v4072_v31 = vld [vmem:[%s11434_s5 + $0x1a0] sm:$0xff] }
0x1236   :  { %v3364_v55 = vcvt.s32.f32 %v3362_v12  ;;  %v3363_v23 = vcvt.s32.f32 %v3361_v32  ;;  %v4077_v12 = vld [vmem:[%s11434_s5 + $0x1c8] sm:$0xff]  ;;  %v4023_v32 = vld [vmem:[%s11434_s5 + $0x18] sm:$0xff] }
0x1238   :  { %3365 = vmin.xlane.f32.xlu1 %v3364_v55 }
0x12c5   :  { %v3366_v34 = vpop.xlane.xlu1 %3365 }
0x12c6   :  { %vm3367_vm9 = vcmp.eq.f32.partialorder %v3364_v55, %v3366_v34  ;;  %v3372_v60 = vcvt.f32.s32 %v3366_v34  ;;  %v4081_v55 = vld [vmem:[%s11434_s5 + $0x1e8] sm:$0xff]  ;;  %v4027_v34 = vld [vmem:[%s11434_s5 + $0x38] sm:$0xff] }
0x12c7   :  { %v3368_v63 = vsel %vm3367_vm9, %v3363_v23, inf  ;;  %v10294_v23 = vpack.c.bf16 %v4072_v31, %v4068_v18  ;;  %v4042_v18 = vld [vmem:[%s11434_s5 + $0xb0] sm:$0xff]  ;;  %v4047_v31 = vld [vmem:[%s11434_s5 + $0xd8] sm:$0xff] }
0x12c8   :  { %3369 = vmin.xlane.f32.xlu0 %v3368_v63  ;;  %v3373_v16 = vshll.u32 %v3372_v60, 16  ;;  %v10296_v63 = vpack.c.bf16 %v4027_v34, %v4023_v32  ;;  %v10299_v60 = vpack.c.bf16 %v4081_v55, %v4077_v12  ;;  %v4051_v12 = vld [vmem:[%s11434_s5 + $0xf8] sm:$0xff]  ;;  %v10366_v55 = vpack.c.bf16 %v4042_v18, %v4038_v36  ;;  %v4046_v34 = vld [vmem:[%s11434_s5 + $0xd0] sm:$0xff] }
0x12c9   :  { %v10369_v32 = vpack.c.bf16 %v4051_v12, %v4047_v31 }
0x1355   :  { %v3370_v10 = vpop.xlane.xlu0 %3369 }
0x1356   :  { %v3371_v41 = vcvt.f32.s32 %v3370_v10  ;;  %v4076_v10 = vld [vmem:[%s11434_s5 + $0x1c0] sm:$0xff] }
0x1358   :  { %v3374_v42 = vadd.s32 %v3373_v16, %v3371_v41  ;;  %v4080_v16 = vld [vmem:[%s11434_s5 + $0x1e0] sm:$0xff] }
0x1359   :  { %v10309_v41 = vpack.c.bf16 %v4080_v16, %v4076_v10  ;;  %v4050_v10 = vld [vmem:[%s11434_s5 + $0xf0] sm:$0xff]  ;;  %v4055_v16 = vld [vmem:[%s11434_s5 + $0x118] sm:$0xff] }
0x135a   :  { %vm3375_vm10 = vcmp.eq.s32.totalorder %v9340_v29, %v3374_v42 }
0x135b   :  { %v5675_v48 = vsel %vm3375_vm10, 1.0, %v11493_v53 }
0x135c   :  { %v3388_v43 = vmul.f32 %v5675_v48, %v3387_v38 }
0x135e   :  { %v3389_v15 = vadd.f32 %v3388_v43, %v3385_v0 }
0x1360   :  { %3725 = vmatmul.mubr.f32.vlgmr.msra.gmra.mrb[24].mxu1 %v3389_v15  ;;  %3796 = vmatmul.mubr.f32.vlgmr.msra.gmra.mrb[26].mxu0 %v3389_v15 }
0x1361   :  { %7169 = vmatpush3.bf16.msra.mxu1 %v9997_v39  ;;  %5963 = vmatprep.mubr.msk.f32.mxu1 %vm7938_vm0, %v11493_v53  ;;  %v4021_v39 = vld [vmem:[%s11434_s5 + $0x8] sm:$0xff] }
0x1362   :  { %7170 = vmatprep.subr.bf16.mxu1 %v11494_v7  ;;  %4148 = vmatprep.mubr.f32.mxu0 %v11493_v53 }
0x1365   :  { %7172 = vmatpush3.bf16.msra.mxu1 %v10007_v49  ;;  %v4025_v49 = vld [vmem:[%s11434_s5 + $0x28] sm:$0xff] }
0x1366   :  { %7173 = vmatprep.subr.bf16.mxu1 %v11494_v7 }
0x1369   :  { %7175 = vmatpush3.bf16.msra.mxu1 %v10017_v51  ;;  %v10166_v51 = vpack.c.bf16 %v4025_v49, %v4021_v39 }
0x136a   :  { %7176 = vmatprep.subr.bf16.mxu1 %v11494_v7 }
0x136b   :  { %7192 = vmatprep.subr.bf16.mxu0 %v10166_v51 }
0x136d   :  { %7178 = vmatpush3.bf16.msra.mxu1 %v10027_v33  ;;  %v4020_v33 = vld [vmem:[%s11434_s5] sm:$0xff] }
0x136e   :  { %7179 = vmatprep.subr.bf16.mxu1 %v11494_v7 }
0x1371   :  { %7181 = vmatpush3.bf16.msra.mxu1 %v10037_v30  ;;  %v4024_v30 = vld [vmem:[%s11434_s5 + $0x20] sm:$0xff] }
0x1372   :  { %7182 = vmatprep.subr.bf16.mxu1 %v11494_v7 }
0x1375   :  { %7184 = vmatpush3.bf16.msra.mxu1 %v10047_v24  ;;  %v10174_v24 = vpack.c.bf16 %v4024_v30, %v4020_v33 }
0x1376   :  { %7185 = vmatprep.subr.bf16.mxu1 %v11494_v7 }
0x1377   :  { %7194 = vmatpush1.bf16.msra.mxu0 %v10174_v24 }
0x1379   :  { %7187 = vmatpush3.bf16.msra.mxu1 %v10056_v58  ;;  %v4029_v58 = vld [vmem:[%s11434_s5 + $0x48] sm:$0xff] }
0x137a   :  { %7188 = vmatprep.subr.bf16.mxu1 %v11494_v7 }
0x137d   :  { %7190 = vmatpush3.bf16.msra.mxu1 %v10066_v27  ;;  %v4033_v27 = vld [vmem:[%s11434_s5 + $0x68] sm:$0xff] }
0x137e   :  { %v10184_v14 = vpack.c.bf16 %v4033_v27, %v4029_v58  ;;  %7224 = vmatprep.subr.bf16.mxu1 %v10296_v63 }
0x1380   :  { %7196 = vmatprep.subr.bf16.mxu0 %v10184_v14 }
0x1381   :  { %7198 = vmatpush1.bf16.msra.mxu0 %v10192_v45 }
0x1382   :  { %7200 = vmatprep.subr.bf16.mxu0 %v10202_v59 }
0x1385   :  { %7202 = vmatpush1.bf16.msra.mxu0 %v10210_v11 }
0x1386   :  { %7204 = vmatprep.subr.bf16.mxu0 %v10220_v17 }
0x1389   :  { %7206 = vmatpush1.bf16.msra.mxu0 %v10228_v35 }
0x138a   :  { %7208 = vmatprep.subr.bf16.mxu0 %v10238_v20 }
0x138d   :  { %7210 = vmatpush1.bf16.msra.mxu0 %v10246_v8 }
0x138e   :  { %7212 = vmatprep.subr.bf16.mxu0 %v10259_v19 }
0x1391   :  { %7214 = vmatpush1.bf16.msra.mxu0 %v10270_v56 }
0x1392   :  { %7216 = vmatprep.subr.bf16.mxu0 %v10272_v21 }
0x1395   :  { %7218 = vmatpush1.bf16.msra.mxu0 %v10294_v23 }
0x1396   :  { %7220 = vmatprep.subr.bf16.mxu0 %v10299_v60 }
0x1399   :  { %7222 = vmatpush1.bf16.msra.mxu0 %v10309_v41 }
0x1433   :  { %v3726_v28 = vpop.f32.mrb[24].mxu1  ;;  %v3797_v44 = vpop.f32.mrb[26].mxu0 }
0x1434   :  { %v5678_v42 = vmul.f32 -1.442695, %v3726_v28  ;;  %v3728_v38 = vpop.f32.mrb[25].mxu1  ;;  %v3799_v0 = vpop.f32.mrb[27].mxu0  ;;  %v4059_v28 = vld [vmem:[%s11434_s5 + $0x138] sm:$0xff] }
0x1435   :  { %v5679_v48 = vmul.f32 -1.442695, %v3728_v38  ;;  %v5680_v43 = vmul.f32 -1.442695, %v3799_v0  ;;  %v4054_v38 = vld [vmem:[%s11434_s5 + $0x110] sm:$0xff] }
0x1436   :  { %7856 = vpow2.f32 %v5678_v42  ;;  %v10387_v42 = vpack.c.bf16 %v4059_v28, %v4055_v16  ;;  %v4058_v0 = vld [vmem:[%s11434_s5 + $0x130] sm:$0xff]  ;;  %v3963_v28 = vld [vmem:[%s11433_s4 + $0x38] sm:$0xff] }
0x1437   :  { %7858 = vpow2.f32 %v5679_v48  ;;  %v4063_v48 = vld [vmem:[%s11434_s5 + $0x158] sm:$0xff] }
0x1438   :  { %7860 = vpow2.f32 %v5680_v43  ;;  %v4067_v43 = vld [vmem:[%s11434_s5 + $0x178] sm:$0xff] }
0x1439   :  { %7862 = vtanh.f32 %v3797_v44  ;;  %v10384_v44 = vpack.c.bf16 %v4050_v10, %v4046_v34  ;;  %v3961_v34 = vld [vmem:[%s11433_s4 + $0x28] sm:$0xff]  ;;  %v3959_v10 = vld [vmem:[%s11433_s4 + $0x18] sm:$0xff] }
0x1440   :  { %v7857_v15 = vpop.eup %7856 }
0x1441   :  { %v7859_v39 = vpop.eup %7858  ;;  %v3805_v49 = vadd.f32 1.0, %v7857_v15  ;;  %v10402_v15 = vpack.c.bf16 %v4058_v0, %v4054_v38  ;;  %v3956_v38 = vld [vmem:[%s11433_s4] sm:$0xff] }
0x1442   :  { %v3811_v33 = vadd.f32 1.0, %v7859_v39  ;;  %v7861_v30 = vpop.eup %7860  ;;  %v10405_v39 = vpack.c.bf16 %v4067_v43, %v4063_v48  ;;  %v3960_v0 = vld [vmem:[%s11433_s4 + $0x20] sm:$0xff]  ;;  %v10488_v48 = vpack.c.bf16 %v3963_v28, %v3959_v10  ;;  %v3979_v10 = vld [vmem:[%s11433_s4 + $0xb8] sm:$0xff] }
0x1443   :  { %7864 = vrcp.f32 %v3805_v49  ;;  %v7863_v58 = vpop.eup %7862  ;;  %v3818_v5 = vadd.f32 1.0, %v7861_v30  ;;  %v4062_v49 = vld [vmem:[%s11434_s5 + $0x150] sm:$0xff]  ;;  %v4071_v30 = vld [vmem:[%s11434_s5 + $0x198] sm:$0xff]  ;;  %v10490_v43 = vpack.c.bf16 %v3960_v0, %v3956_v38  ;;  %v3972_v28 = vld [vmem:[%s11433_s4 + $0x80] sm:$0xff] }
0x1444   :  { %7866 = vrcp.f32 %v3811_v33  ;;  %v4066_v33 = vld [vmem:[%s11434_s5 + $0x170] sm:$0xff]  ;;  %v3976_v0 = vld [vmem:[%s11433_s4 + $0xa0] sm:$0xff] }
0x1445   :  { %7868 = vrcp.f32 %v3818_v5  ;;  %v4074_v5 = vld [vmem:[%s11434_s5 + $0x1b0] sm:$0xff] }
0x144d   :  { %v7865_v27 = vpop.eup %7864 }
0x144e   :  { %v7867_v47 = vpop.eup %7866  ;;  %v3822_v3 = vmul.f32 %v7865_v27, %v7863_v58  ;;  %v4075_v58 = vld [vmem:[%s11434_s5 + $0x1b8] sm:$0xff]  ;;  %v10420_v27 = vpack.c.bf16 %v4066_v33, %v4062_v49  ;;  %v3958_v49 = vld [vmem:[%s11433_s4 + $0x10] sm:$0xff] }
0x144f   :  { %v3821_v26 = vmul.f32 %v7867_v47, %v10072_v52  ;;  %v4035_v52 = vld [vmem:[%s11434_s5 + $0x78] sm:$0xff]  ;;  %v7869_v9 = vpop.eup %7868  ;;  %v10423_v47 = vpack.c.bf16 %v4075_v58, %v4071_v30  ;;  %v3962_v33 = vld [vmem:[%s11433_s4 + $0x30] sm:$0xff]  ;;  %v3965_v30 = vld [vmem:[%s11433_s4 + $0x48] sm:$0xff] }
0x1450   :  { %v10331_v37 = vpack.c.bf16 %v4035_v52, %v4031_v54  ;;  %v4078_v52 = vld [vmem:[%s11434_s5 + $0x1d0] sm:$0xff]  ;;  %v10502_v58 = vpack.c.bf16 %v3962_v33, %v3958_v49 }
0x1451   :  { %v10314_v1 = vadd.f32 %v3822_v3, %v3821_v26  ;;  %v4070_v3 = vld [vmem:[%s11434_s5 + $0x190] sm:$0xff]  ;;  %v4079_v26 = vld [vmem:[%s11434_s5 + $0x1d8] sm:$0xff] }
0x1452   :  { %v10438_v4 = vpack.c.bf16 %v4074_v5, %v4070_v3  ;;  %v10441_v54 = vpack.c.bf16 %v4083_v22, %v4079_v26  ;;  %11537 = vst [vmem:[#allocation19_spill] sm:$0xff] %v10502_v58  ;;  %v3969_v3 = vld [vmem:[%s11433_s4 + $0x68] sm:$0xff]  ;;  %v3967_v5 = vld [vmem:[%s11433_s4 + $0x58] sm:$0xff]  ;;  %v3974_v49 = vld [vmem:[%s11433_s4 + $0x90] sm:$0xff] }
0x1453   :  { %7870 = vtanh.f32 %v10314_v1  ;;  %v3971_v26 = vld [vmem:[%s11433_s4 + $0x78] sm:$0xff]  ;;  %v10515_v22 = vpack.c.bf16 %v3969_v3, %v3965_v30  ;;  %v3978_v33 = vld [vmem:[%s11433_s4 + $0xb0] sm:$0xff]  ;;  %v10567_v30 = vpack.c.bf16 %v3976_v0, %v3972_v28  ;;  %v3981_v3 = vld [vmem:[%s11433_s4 + $0xc8] sm:$0xff] }
0x1454   :  { %v3989_v28 = vld [vmem:[%s11433_s4 + $0x108] sm:$0xff] }
0x1455   :  { %v3993_v0 = vld [vmem:[%s11433_s4 + $0x128] sm:$0xff] }
0x145d   :  { %v7871_v40 = vpop.eup %7870 }
0x145e   :  { %v3825_v6 = vmul.f32 %v7871_v40, %v7869_v9  ;;  %v4082_v9 = vld [vmem:[%s11434_s5 + $0x1f0] sm:$0xff] }
0x145f   :  { %v10450_v40 = vpack.c.bf16 %v4082_v9, %v4078_v52  ;;  %v10517_v52 = vpack.c.bf16 %v3971_v26, %v3967_v5  ;;  %v3964_v9 = vld [vmem:[%s11433_s4 + $0x40] sm:$0xff]  ;;  %v3985_v5 = vld [vmem:[%s11433_s4 + $0xe8] sm:$0xff]  ;;  %v3983_v26 = vld [vmem:[%s11433_s4 + $0xd8] sm:$0xff] }
0x1460   :  { %5964 = vmatmul.mubr.f32.vlgmr.msra.gmra.mrb[26].mxu1 %v3825_v6  ;;  %4149 = vmatmul.mubr.f32.vlgmr.msra.gmra.mrb[28].mxu0 %v3825_v6 }
0x1461   :  { %7226 = vmatpush1.bf16.msra.mxu1 %v10329_v25  ;;  %4219 = vmatprep.mubr.f32.mxu1 %v11493_v53  ;;  %11538 = vst [vmem:[#allocation5_spill] sm:$0xff] %v10517_v52 }
0x1462   :  { %7228 = vmatprep.subr.bf16.mxu1 %v10331_v37  ;;  %4290 = vmatprep.mubr.f32.mxu0 %v11493_v53 }
0x1465   :  { %7230 = vmatpush1.bf16.msra.mxu1 %v10346_v50 }
0x1466   :  { %7232 = vmatprep.subr.bf16.mxu1 %v10350_v13 }
0x1469   :  { %7234 = vmatpush1.bf16.msra.mxu1 %v10366_v55 }
0x146a   :  { %7236 = vmatprep.subr.bf16.mxu1 %v10369_v32 }
0x146d   :  { %7238 = vmatpush1.bf16.msra.mxu1 %v10384_v44 }
0x146e   :  { %7240 = vmatprep.subr.bf16.mxu1 %v10387_v42 }
0x1471   :  { %7242 = vmatpush1.bf16.msra.mxu1 %v10402_v15 }
0x1472   :  { %7244 = vmatprep.subr.bf16.mxu1 %v10405_v39 }
0x1475   :  { %7246 = vmatpush1.bf16.msra.mxu1 %v10420_v27 }
0x1476   :  { %7248 = vmatprep.subr.bf16.mxu1 %v10423_v47 }
0x1479   :  { %7250 = vmatpush1.bf16.msra.mxu1 %v10438_v4 }
0x147a   :  { %7252 = vmatprep.subr.bf16.mxu1 %v10441_v54 }
0x147d   :  { %7254 = vmatpush1.bf16.msra.mxu1 %v10450_v40 }
0x147e   :  { %7288 = vmatprep.subr.bf16.mxu1 %v10488_v48 }
0x1480   :  { %4220 = vmatmul.mubr.f32.vlgmr.msra.gmra.mrb[28].mxu1 %v3825_v6 }
0x1481   :  { %4361 = vmatprep.mubr.f32.mxu1 %v11493_v53  ;;  %7290 = vmatpush1.bf16.msra.mxu1 %v10502_v58 }
0x1482   :  { %7292 = vmatprep.subr.bf16.mxu1 %v10517_v52  ;;  %v4000_v52 = vld [vmem:[%s11433_s4 + $0x160] sm:$0xff] }
0x1533   :  { %v3915_v62 = vpop.f32.mrb[26].mxu1 }
0x1534   :  { %v3916_v61 = vadd.f32 %v10128_v57, %v3915_v62  ;;  %v5965_v2 = vpop.f32.mrb[27].mxu1  ;;  %v3957_v57 = vld [vmem:[%s11433_s4 + $0x8] sm:$0xff]  ;;  %v3968_v62 = vld [vmem:[%s11433_s4 + $0x60] sm:$0xff] }
0x1535   :  { %v10477_v16 = vpack.c.bf16 %v3961_v34, %v3957_v57  ;;  %v10529_v2 = vpack.c.bf16 %v3968_v62, %v3964_v9  ;;  %v3975_v34 = vld [vmem:[%s11433_s4 + $0x98] sm:$0xff]  ;;  %v10580_v9 = vpack.c.bf16 %v3978_v33, %v3974_v49  ;;  %v10582_v62 = vpack.c.bf16 %v3985_v5, %v3981_v3 }
0x1536   :  { %5682 = vst [vmem:[%s11437_s8 + $0x6] sm:$0x3] %v3916_v61  ;;  %v3921_v46 = vsel %vm2222_vm1, %v3916_v61, -inf  ;;  %v10555_v38 = vpack.c.bf16 %v3979_v10, %v3975_v34  ;;  %v3982_v34 = vld [vmem:[%s11433_s4 + $0xd0] sm:$0xff]  ;;  %v3991_v49 = vld [vmem:[%s11433_s4 + $0x118] sm:$0xff] }
0x1537   :  { %3922 = vmax.xlane.f32.xlu1 %v3921_v46  ;;  %7256 = vmatprep.subr.bf16.mxu0 %v10477_v16  ;;  %v3970_v46 = vld [vmem:[%s11433_s4 + $0x70] sm:$0xff]  ;;  %11541 = vst [vmem:[#allocation8_spill] sm:$0xff] %v10580_v9  ;;  %v3995_v33 = vld [vmem:[%s11433_s4 + $0x138] sm:$0xff] }
0x1538   :  { %7258 = vmatpush1.bf16.msra.mxu0 %v10490_v43  ;;  %11540 = vst [vmem:[#allocation7_spill] sm:$0xff] %v10555_v38  ;;  %v3986_v10 = vld [vmem:[%s11433_s4 + $0xf0] sm:$0xff] }
0x1539   :  { %7260 = vmatprep.subr.bf16.mxu0 %v10515_v22  ;;  %v10619_v5 = vpack.c.bf16 %v3986_v10, %v3982_v34  ;;  %v3994_v34 = vld [vmem:[%s11433_s4 + $0x130] sm:$0xff]  ;;  %v3997_v10 = vld [vmem:[%s11433_s4 + $0x148] sm:$0xff] }
0x153b   :  { %11543 = vst [vmem:[#allocation10_spill] sm:$0xff] %v10619_v5 }
0x153c   :  { %7262 = vmatpush1.bf16.msra.mxu0 %v10529_v2 }
0x15c4   :  { %v3923_v36 = vpop.xlane.xlu1 %3922 }
0x15c5   :  { %vm3924_vm11 = vcmp.eq.f32.partialorder %v3916_v61, %v3923_v36  ;;  %v3966_v61 = vld [vmem:[%s11433_s4 + $0x50] sm:$0xff]  ;;  %v3973_v36 = vld [vmem:[%s11433_s4 + $0x88] sm:$0xff] }
0x15c6   :  { %v3925_v18 = vsel %vm3924_vm11, %v9340_v29, 128 }
0x15c7   :  { %v10462_v31 = vsel %vm2222_vm1, %v3925_v18, 2147483647  ;;  %v3977_v18 = vld [vmem:[%s11433_s4 + $0xa8] sm:$0xff] }
0x15c8   :  { %v3928_v6 = vshra.s32 %v10462_v31, 16  ;;  %v10544_v57 = vpack.c.bf16 %v3977_v18, %v3973_v36  ;;  %v3984_v36 = vld [vmem:[%s11433_s4 + $0xe0] sm:$0xff] }
0x15ca   :  { %v10465_v12 = vcvt.s32.f32 %v3928_v6  ;;  %v10542_v6 = vpack.c.bf16 %v3970_v46, %v3966_v61  ;;  %7264 = vmatprep.subr.bf16.mxu0 %v10544_v57  ;;  %v3987_v61 = vld [vmem:[%s11433_s4 + $0xf8] sm:$0xff]  ;;  %v3980_v46 = vld [vmem:[%s11433_s4 + $0xc0] sm:$0xff] }
0x15cb   :  { %v10594_v18 = vpack.c.bf16 %v3987_v61, %v3983_v26  ;;  %7266 = vmatpush1.bf16.msra.mxu0 %v10567_v30  ;;  %v10615_v3 = vpack.c.bf16 %v3984_v36, %v3980_v46  ;;  %v10621_v26 = vpack.c.bf16 %v3993_v0, %v3989_v28  ;;  %v3988_v61 = vld [vmem:[%s11433_s4 + $0x100] sm:$0xff]  ;;  %v3990_v46 = vld [vmem:[%s11433_s4 + $0x110] sm:$0xff]  ;;  %v10633_v36 = vpack.c.bf16 %v3995_v33, %v3991_v49  ;;  %v4001_v28 = vld [vmem:[%s11433_s4 + $0x168] sm:$0xff] }
0x15cc   :  { %3931 = vmin.xlane.f32.xlu0 %v10465_v12  ;;  %11539 = vst [vmem:[#allocation6_spill] sm:$0xff] %v10542_v6  ;;  %7294 = vmatpush1.bf16.msra.mxu1 %v10542_v6  ;;  %v3999_v0 = vld [vmem:[%s11433_s4 + $0x158] sm:$0xff]  ;;  %v3996_v6 = vld [vmem:[%s11433_s4 + $0x140] sm:$0xff] }
0x15cd   :  { %7296 = vmatprep.subr.bf16.mxu1 %v10555_v38  ;;  %11542 = vst [vmem:[#allocation9_spill] sm:$0xff] %v10594_v18  ;;  %7268 = vmatprep.subr.bf16.mxu0 %v10582_v62  ;;  %v3992_v38 = vld [vmem:[%s11433_s4 + $0x120] sm:$0xff]  ;;  %11544 = vst [vmem:[#allocation11_spill] sm:$0xff] %v10633_v36  ;;  %v4003_v49 = vld [vmem:[%s11433_s4 + $0x178] sm:$0xff] }
0x15ce   :  { %v10651_v33 = vpack.c.bf16 %v3992_v38, %v3988_v61  ;;  %v10666_v38 = vpack.c.bf16 %v4003_v49, %v3999_v0  ;;  %v3998_v61 = vld [vmem:[%s11433_s4 + $0x150] sm:$0xff] }
0x15cf   :  { %7270 = vmatpush1.bf16.msra.mxu0 %v10615_v3 }
0x15d0   :  { %7298 = vmatpush1.bf16.msra.mxu1 %v10580_v9  ;;  %7272 = vmatprep.subr.bf16.mxu0 %v10621_v26  ;;  %v10657_v9 = vpack.c.bf16 %v4001_v28, %v3997_v10  ;;  %11546 = vst [vmem:[#allocation13_spill] sm:$0xff] %v10666_v38  ;;  %v3927_v28 = vand.u32 65535, %v10462_v31  ;;  %v4011_v31 = vld [vmem:[%s11433_s4 + $0x1b8] sm:$0xff] }
0x15d1   :  { %7300 = vmatprep.subr.bf16.mxu1 %v10594_v18  ;;  %v10655_v18 = vpack.c.bf16 %v3994_v34, %v3990_v46  ;;  %v4002_v46 = vld [vmem:[%s11433_s4 + $0x170] sm:$0xff]  ;;  %v10675_v34 = vpack.c.bf16 %v4000_v52, %v3996_v6  ;;  %v4005_v6 = vld [vmem:[%s11433_s4 + $0x188] sm:$0xff] }
0x15d2   :  { %v10679_v10 = vpack.c.bf16 %v4002_v46, %v3998_v61  ;;  %v3929_v49 = vcvt.s32.f32 %v3927_v28  ;;  %v4009_v61 = vld [vmem:[%s11433_s4 + $0x1a8] sm:$0xff]  ;;  %v4007_v46 = vld [vmem:[%s11433_s4 + $0x198] sm:$0xff]  ;;  %v4008_v28 = vld [vmem:[%s11433_s4 + $0x1a0] sm:$0xff] }
0x15d3   :  { %11545 = vst [vmem:[#allocation12_spill] sm:$0xff] %v10655_v18  ;;  %7274 = vmatpush1.bf16.msra.mxu0 %v10651_v33 }
0x15d4   :  { %7302 = vmatpush1.bf16.msra.mxu1 %v10619_v5  ;;  %7276 = vmatprep.subr.bf16.mxu0 %v10657_v9  ;;  %11547 = vst [vmem:[#allocation14_spill] sm:$0xff] %v10679_v10 }
0x15d5   :  { %7304 = vmatprep.subr.bf16.mxu1 %v10633_v36 }
0x15d7   :  { %7278 = vmatpush1.bf16.msra.mxu0 %v10675_v34 }
0x15d8   :  { %7306 = vmatpush1.bf16.msra.mxu1 %v10655_v18 }
0x15d9   :  { %7308 = vmatprep.subr.bf16.mxu1 %v10666_v38 }
0x15dc   :  { %7310 = vmatpush1.bf16.msra.mxu1 %v10679_v10  ;;  %v10695_v10 = vpack.c.bf16 %v4009_v61, %v4005_v6  ;;  %v4006_v6 = vld [vmem:[%s11433_s4 + $0x190] sm:$0xff] }
0x15dd   :  { %v4010_v61 = vld [vmem:[%s11433_s4 + $0x1b0] sm:$0xff] }
0x15de   :  { %7280 = vmatprep.subr.bf16.mxu0 %v10695_v10  ;;  %v10717_v38 = vpack.c.bf16 %v4010_v61, %v4006_v6  ;;  %v4019_v6 = vld [vmem:[%s11433_s4 + $0x1f8] sm:$0xff]  ;;  %v4012_v61 = vld [vmem:[%s11433_s4 + $0x1c0] sm:$0xff] }
0x15e0   :  { %11549 = vst [vmem:[#allocation16_spill] sm:$0xff] %v10717_v38 }
0x1659   :  { %v3932_v0 = vpop.xlane.xlu0 %3931 }
0x165a   :  { %vm3933_vm12 = vcmp.eq.f32.partialorder %v10465_v12, %v3932_v0  ;;  %v4004_v12 = vld [vmem:[%s11433_s4 + $0x180] sm:$0xff] }
0x165b   :  { %v3934_v52 = vsel %vm3933_vm12, %v3929_v49, inf  ;;  %v10706_v49 = vpack.c.bf16 %v4011_v31, %v4007_v46  ;;  %v4013_v46 = vld [vmem:[%s11433_s4 + $0x1c8] sm:$0xff] }
0x165c   :  { %3935 = vmin.xlane.f32.xlu1 %v3934_v52  ;;  %v10708_v52 = vpack.c.bf16 %v4008_v28, %v4004_v12  ;;  %v4017_v31 = vld [vmem:[%s11433_s4 + $0x1e8] sm:$0xff]  ;;  %v4015_v12 = vld [vmem:[%s11433_s4 + $0x1d8] sm:$0xff] }
0x165d   :  { %11548 = vst [vmem:[#allocation15_spill] sm:$0xff] %v10706_v49  ;;  %7312 = vmatprep.subr.bf16.mxu1 %v10706_v49  ;;  %v10731_v28 = vpack.c.bf16 %v4017_v31, %v4013_v46  ;;  %v4016_v49 = vld [vmem:[%s11433_s4 + $0x1e0] sm:$0xff]  ;;  %v10742_v18 = vpack.c.bf16 %v4019_v6, %v4015_v12  ;;  %v4014_v46 = vld [vmem:[%s11433_s4 + $0x1d0] sm:$0xff] }
0x165e   :  { %7282 = vmatpush1.bf16.msra.mxu0 %v10708_v52  ;;  %7314 = vmatpush1.bf16.msra.mxu1 %v10717_v38  ;;  %v10744_v36 = vpack.c.bf16 %v4016_v49, %v4012_v61  ;;  %v4018_v31 = vld [vmem:[%s11433_s4 + $0x1f0] sm:$0xff]  ;;  %v3938_v49 = vcvt.f32.s32 %v3932_v0 }
0x165f   :  { %11550 = vst [vmem:[#allocation17_spill] sm:$0xff] %v10742_v18  ;;  %7284 = vmatprep.subr.bf16.mxu0 %v10731_v28  ;;  %v10753_v38 = vpack.c.bf16 %v4018_v31, %v4014_v46  ;;  %7316 = vmatprep.subr.bf16.mxu1 %v10742_v18  ;;  %v5685_v46 = vld [vmem:[%s11431_s2 + $0x8] sm:$0x3]  ;;  %v3950_v31 = vstv %s3947_s11  ;;  %v4406_v0 = vld [vmem:[%s11435_s6 + $0x70] sm:$0xff]  ;;  %s5078_s11 = scalar_select %p5077_p10, 1, 0 }
0x1660   :  { %11551 = vst [vmem:[#allocation18_spill] sm:$0xff] %v10744_v36  ;;  %v3939_v6 = vshll.u32 %v3938_v49, 16  ;;  %v3951_v5 = vmul.f32 %v5685_v46, %v3950_v31  ;;  %v4407_v49 = vld [vmem:[%s11435_s6 + $0x78] sm:$0xff] }
0x1661   :  { %11552 = vst [vmem:[#allocation20_spill] sm:$0xff] %v10753_v38 }
0x1662   :  { %7286 = vmatpush1.bf16.msra.mxu0 %v10744_v36  ;;  %7318 = vmatpush1.bf16.msra.mxu1 %v10753_v38  ;;  %v3953_v38 = vstv %s3952_s12 }
0x1663   :  { %7319 = vmatprep.subr.bf16.mxu0 %v11494_v7  ;;  %7344 = vmatprep.subr.bf16.mxu1 %v10166_v51 }
0x16e9   :  { %v3936_v12 = vpop.xlane.xlu1 %3935 }
0x16ea   :  { %v3937_v61 = vcvt.f32.s32 %v3936_v12  ;;  %v10859_v12 = vpack.c.bf16 %v4407_v49, %v4406_v0 }
0x16ec   :  { %v3940_v18 = vadd.s32 %v3939_v6, %v3937_v61 }
0x16ee   :  { %vm3941_vm13 = vcmp.eq.s32.totalorder %v9340_v29, %v3940_v18 }
0x16ef   :  { %v5683_v51 = vsel %vm3941_vm13, 1.0, %v11493_v53 }
0x16f0   :  { %v3954_v58 = vmul.f32 %v5683_v51, %v3953_v38 }
0x16f2   :  { %v3955_v36 = vadd.f32 %v3954_v58, %v3951_v5  ;;  %v4403_v58 = vld [vmem:[%s11435_s6 + $0x58] sm:$0xff]  ;;  %v4404_v5 = vld [vmem:[%s11435_s6 + $0x60] sm:$0xff] }
0x16f4   :  { %4291 = vmatmul.mubr.f32.vlgmr.msra.gmra.mrb[28].mxu0 %v3955_v36  ;;  %4362 = vmatmul.mubr.f32.vlgmr.msra.gmra.mrb[28].mxu1 %v3955_v36  ;;  %v4405_v36 = vld [vmem:[%s11435_s6 + $0x68] sm:$0xff] }
0x16f5   :  { %7346 = vmatpush1.bf16.msra.mxu1 %v10174_v24  ;;  %5998 = vmatprep.mubr.msk.f32.mxu0 %vm7938_vm0, %v11493_v53  ;;  %v4392_v24 = vld [vmem:[%s11435_s6] sm:$0xff]  ;;  %v10849_v38 = vpack.c.bf16 %v4405_v36, %v4404_v5 }
0x16f6   :  { %7348 = vmatprep.subr.bf16.mxu1 %v10184_v14  ;;  %4714 = vmatprep.mubr.f32.mxu1 %v11493_v53  ;;  %v4393_v14 = vld [vmem:[%s11435_s6 + $0x8] sm:$0xff] }
0x16f9   :  { %7350 = vmatpush1.bf16.msra.mxu1 %v10192_v45  ;;  %v10790_v45 = vpack.c.bf16 %v4393_v14, %v4392_v24 }
0x16fa   :  { %7352 = vmatprep.subr.bf16.mxu1 %v10202_v59  ;;  %v4394_v59 = vld [vmem:[%s11435_s6 + $0x10] sm:$0xff] }
0x16fb   :  { %7321 = vmatpush3.bf16.msra.mxu0 %v10790_v45 }
0x16fc   :  { %7322 = vmatprep.subr.bf16.mxu0 %v11494_v7 }
0x16fd   :  { %7354 = vmatpush1.bf16.msra.mxu1 %v10210_v11  ;;  %v4395_v11 = vld [vmem:[%s11435_s6 + $0x18] sm:$0xff] }
0x16fe   :  { %7356 = vmatprep.subr.bf16.mxu1 %v10220_v17  ;;  %v10800_v17 = vpack.c.bf16 %v4395_v11, %v4394_v59 }
0x1700   :  { %7324 = vmatpush3.bf16.msra.mxu0 %v10800_v17 }
0x1701   :  { %7358 = vmatpush1.bf16.msra.mxu1 %v10228_v35  ;;  %7325 = vmatprep.subr.bf16.mxu0 %v11494_v7  ;;  %v4396_v35 = vld [vmem:[%s11435_s6 + $0x20] sm:$0xff] }
0x1702   :  { %7360 = vmatprep.subr.bf16.mxu1 %v10238_v20  ;;  %v4397_v20 = vld [vmem:[%s11435_s6 + $0x28] sm:$0xff] }
0x1705   :  { %7362 = vmatpush1.bf16.msra.mxu1 %v10246_v8  ;;  %v10810_v8 = vpack.c.bf16 %v4397_v20, %v4396_v35 }
0x1706   :  { %7364 = vmatprep.subr.bf16.mxu1 %v10259_v19  ;;  %v4398_v19 = vld [vmem:[%s11435_s6 + $0x30] sm:$0xff] }
0x1707   :  { %7327 = vmatpush3.bf16.msra.mxu0 %v10810_v8 }
0x1708   :  { %7328 = vmatprep.subr.bf16.mxu0 %v11494_v7 }
0x1709   :  { %7366 = vmatpush1.bf16.msra.mxu1 %v10270_v56  ;;  %v4399_v56 = vld [vmem:[%s11435_s6 + $0x38] sm:$0xff] }
0x170a   :  { %7368 = vmatprep.subr.bf16.mxu1 %v10272_v21  ;;  %v10820_v21 = vpack.c.bf16 %v4399_v56, %v4398_v19 }
0x170c   :  { %7330 = vmatpush3.bf16.msra.mxu0 %v10820_v21 }
0x170d   :  { %7370 = vmatpush1.bf16.msra.mxu1 %v10294_v23  ;;  %7331 = vmatprep.subr.bf16.mxu0 %v11494_v7  ;;  %v4400_v23 = vld [vmem:[%s11435_s6 + $0x40] sm:$0xff] }
0x170e   :  { %7372 = vmatprep.subr.bf16.mxu1 %v10299_v60  ;;  %v4401_v60 = vld [vmem:[%s11435_s6 + $0x48] sm:$0xff] }
0x1711   :  { %7374 = vmatpush1.bf16.msra.mxu1 %v10309_v41  ;;  %v10830_v41 = vpack.c.bf16 %v4401_v60, %v4400_v23 }
0x1712   :  { %7408 = vmatprep.subr.bf16.mxu1 %v10477_v16  ;;  %v4402_v16 = vld [vmem:[%s11435_s6 + $0x50] sm:$0xff] }
0x1713   :  { %7333 = vmatpush3.bf16.msra.mxu0 %v10830_v41  ;;  %v10840_v18 = vpack.c.bf16 %v4403_v58, %v4402_v16 }
0x1714   :  { %7334 = vmatprep.subr.bf16.mxu0 %v11494_v7 }
0x1717   :  { %7336 = vmatpush3.bf16.msra.mxu0 %v10840_v18 }
0x1718   :  { %7337 = vmatprep.subr.bf16.mxu0 %v11494_v7 }
0x171b   :  { %7339 = vmatpush3.bf16.msra.mxu0 %v10849_v38 }
0x171c   :  { %7340 = vmatprep.subr.bf16.mxu0 %v11494_v7 }
0x171f   :  { %7342 = vmatpush3.bf16.msra.mxu0 %v10859_v12 }
0x1720   :  { %7376 = vmatprep.subr.bf16.mxu0 %v10296_v63 }
0x17c7   :  { %v4292_v6 = vpop.f32.mrb[28].mxu0  ;;  %v4363_v61 = vpop.f32.mrb[28].mxu1 }
0x17c8   :  { %v5686_v46 = vmul.f32 -1.442695, %v4292_v6  ;;  %v4294_v31 = vpop.f32.mrb[29].mxu0  ;;  %v4365_v51 = vpop.f32.mrb[29].mxu1 }
0x17c9   :  { %v5687_v24 = vmul.f32 -1.442695, %v4294_v31  ;;  %v5688_v14 = vmul.f32 -1.442695, %v4365_v51  ;;  %v5693_v31 = vld [vmem:[%s11431_s2 + $0xa] sm:$0x3]  ;;  %v4516_v51 = vstv %s4513_s26 }
0x17ca   :  { %7872 = vpow2.f32 %v5686_v46 }
0x17cb   :  { %7874 = vpow2.f32 %v5687_v24 }
0x17cc   :  { %7876 = vpow2.f32 %v5688_v14  ;;  %v4519_v14 = vstv %s4518_s27 }
0x17cd   :  { %7878 = vtanh.f32 %v4363_v61 }
0x17d4   :  { %v7873_v59 = vpop.eup %7872 }
0x17d5   :  { %v7875_v11 = vpop.eup %7874  ;;  %v4371_v35 = vadd.f32 1.0, %v7873_v59  ;;  %v4517_v59 = vmul.f32 %v5693_v31, %v4516_v51 }
0x17d6   :  { %v4377_v20 = vadd.f32 1.0, %v7875_v11  ;;  %v7877_v19 = vpop.eup %7876 }
0x17d7   :  { %7880 = vrcp.f32 %v4371_v35  ;;  %v7879_v56 = vpop.eup %7878  ;;  %v4384_v16 = vadd.f32 1.0, %v7877_v19 }
0x17d8   :  { %7882 = vrcp.f32 %v4377_v20 }
0x17d9   :  { %7884 = vrcp.f32 %v4384_v16  ;;  %v5173_v16 = vld [vmem:[%s11434_s5 + $0xa8] sm:$0xff] }
0x17e1   :  { %v7881_v63 = vpop.eup %7880 }
0x17e2   :  { %v7883_v23 = vpop.eup %7882  ;;  %v4388_v60 = vmul.f32 %v7881_v63, %v7879_v56  ;;  %v5160_v56 = vld [vmem:[%s11434_s5 + $0x40] sm:$0xff] }
0x17e3   :  { %v4387_v58 = vmul.f32 %v7883_v23, %v10314_v1  ;;  %v7885_v36 = vpop.eup %7884  ;;  %v11553_v1 = vld [vmem:[#allocation18_spill] sm:$0xff]  ;;  %v5164_v63 = vld [vmem:[%s11434_s5 + $0x60] sm:$0xff] }
0x17e4   :  { %v7501_v23 = vpack.c.bf16 %v5164_v63, %v5160_v56 }
0x17e5   :  { %v10865_v5 = vadd.f32 %v4388_v60, %v4387_v58  ;;  %v5169_v60 = vld [vmem:[%s11434_s5 + $0x88] sm:$0xff] }
0x17e6   :  { %v7503_v58 = vpack.c.bf16 %v5173_v16, %v5169_v60  ;;  %v5158_v60 = vld [vmem:[%s11434_s5 + $0x30] sm:$0xff]  ;;  %v5163_v16 = vld [vmem:[%s11434_s5 + $0x58] sm:$0xff] }
0x17e7   :  { %7886 = vtanh.f32 %v10865_v5 }
0x17f1   :  { %v7887_v0 = vpop.eup %7886 }
0x17f2   :  { %v4391_v49 = vmul.f32 %v7887_v0, %v7885_v36  ;;  %v5168_v36 = vld [vmem:[%s11434_s5 + $0x80] sm:$0xff] }
0x17f3   :  { %v5172_v0 = vld [vmem:[%s11434_s5 + $0xa0] sm:$0xff] }
0x17f4   :  { %5999 = vmatmul.mubr.f32.vlgmr.msra.gmra.mrb[30].mxu0 %v4391_v49  ;;  %4715 = vmatmul.mubr.f32.vlgmr.msra.gmra.mrb[30].mxu1 %v4391_v49 }
0x17f5   :  { %7378 = vmatpush1.bf16.msra.mxu0 %v10329_v25  ;;  %4785 = vmatprep.mubr.f32.mxu0 %v11493_v53  ;;  %v11554_v25 = vld [vmem:[#allocation19_spill] sm:$0xff] }
0x17f6   :  { %7380 = vmatprep.subr.bf16.mxu0 %v10331_v37  ;;  %7410 = vmatpush1.bf16.msra.mxu1 %v10490_v43  ;;  %v11555_v37 = vld [vmem:[#allocation5_spill] sm:$0xff] }
0x17f7   :  { %7412 = vmatprep.subr.bf16.mxu1 %v10515_v22  ;;  %4856 = vmatprep.mubr.f32.mxu1 %v11493_v53 }
0x17f9   :  { %7382 = vmatpush1.bf16.msra.mxu0 %v10346_v50  ;;  %v11556_v50 = vld [vmem:[#allocation6_spill] sm:$0xff] }
0x17fa   :  { %7384 = vmatprep.subr.bf16.mxu0 %v10350_v13  ;;  %7414 = vmatpush1.bf16.msra.mxu1 %v10529_v2  ;;  %v11557_v13 = vld [vmem:[#allocation7_spill] sm:$0xff] }
0x17fb   :  { %7416 = vmatprep.subr.bf16.mxu1 %v10544_v57 }
0x17fd   :  { %7386 = vmatpush1.bf16.msra.mxu0 %v10366_v55  ;;  %v11558_v55 = vld [vmem:[#allocation8_spill] sm:$0xff] }
0x17fe   :  { %7388 = vmatprep.subr.bf16.mxu0 %v10369_v32  ;;  %7418 = vmatpush1.bf16.msra.mxu1 %v10567_v30  ;;  %v11559_v32 = vld [vmem:[#allocation9_spill] sm:$0xff] }
0x17ff   :  { %7420 = vmatprep.subr.bf16.mxu1 %v10582_v62 }
0x1801   :  { %7390 = vmatpush1.bf16.msra.mxu0 %v10384_v44  ;;  %v11560_v44 = vld [vmem:[#allocation10_spill] sm:$0xff] }
0x1802   :  { %7392 = vmatprep.subr.bf16.mxu0 %v10387_v42  ;;  %7422 = vmatpush1.bf16.msra.mxu1 %v10615_v3  ;;  %v11561_v42 = vld [vmem:[#allocation11_spill] sm:$0xff] }
0x1803   :  { %7424 = vmatprep.subr.bf16.mxu1 %v10621_v26 }
0x1805   :  { %7394 = vmatpush1.bf16.msra.mxu0 %v10402_v15  ;;  %v11562_v15 = vld [vmem:[#allocation12_spill] sm:$0xff] }
0x1806   :  { %7396 = vmatprep.subr.bf16.mxu0 %v10405_v39  ;;  %7426 = vmatpush1.bf16.msra.mxu1 %v10651_v33  ;;  %v11563_v39 = vld [vmem:[#allocation13_spill] sm:$0xff] }
0x1807   :  { %7428 = vmatprep.subr.bf16.mxu1 %v10657_v9 }
0x1809   :  { %7398 = vmatpush1.bf16.msra.mxu0 %v10420_v27  ;;  %v11564_v27 = vld [vmem:[#allocation14_spill] sm:$0xff] }
0x180a   :  { %7400 = vmatprep.subr.bf16.mxu0 %v10423_v47  ;;  %7430 = vmatpush1.bf16.msra.mxu1 %v10675_v34  ;;  %v11565_v47 = vld [vmem:[#allocation15_spill] sm:$0xff] }
0x180b   :  { %7432 = vmatprep.subr.bf16.mxu1 %v10695_v10 }
0x180d   :  { %7402 = vmatpush1.bf16.msra.mxu0 %v10438_v4  ;;  %v11566_v4 = vld [vmem:[#allocation16_spill] sm:$0xff] }
0x180e   :  { %7404 = vmatprep.subr.bf16.mxu0 %v10441_v54  ;;  %7434 = vmatpush1.bf16.msra.mxu1 %v10708_v52  ;;  %v11567_v54 = vld [vmem:[#allocation17_spill] sm:$0xff] }
0x180f   :  { %7436 = vmatprep.subr.bf16.mxu1 %v10731_v28 }
0x1811   :  { %7406 = vmatpush1.bf16.msra.mxu0 %v10450_v40  ;;  %v11568_v40 = vld [vmem:[#allocation20_spill] sm:$0xff] }
0x1812   :  { %7440 = vmatprep.subr.bf16.mxu0 %v10488_v48  ;;  %7438 = vmatpush1.bf16.msra.mxu1 %v11553_v1  ;;  %v10921_v48 = vld [vmem:[%s11436_s7] ss:$0 sm:$0xff]  ;;  %v5177_v1 = vld [vmem:[%s11434_s5 + $0xc8] sm:$0xff] }
0x1813   :  { %7471 = vmatprep.subr.bf16.mxu1 %v11494_v7 }
0x1814   :  { %4786 = vmatmul.mubr.f32.vlgmr.msra.gmra.mrb[32].mxu0 %v4391_v49  ;;  %v7505_v49 = vpack.c.bf16 %v5172_v0, %v5168_v36 }
0x1815   :  { %7442 = vmatpush1.bf16.msra.mxu0 %v11554_v25  ;;  %4927 = vmatprep.mubr.f32.mxu0 %v11493_v53  ;;  %v5181_v25 = vld [vmem:[%s11434_s5 + $0xe8] sm:$0xff] }
0x1816   :  { %7444 = vmatprep.subr.bf16.mxu0 %v11555_v37  ;;  %v7507_v37 = vpack.c.bf16 %v5181_v25, %v5177_v1  ;;  %v5162_v25 = vld [vmem:[%s11434_s5 + $0x50] sm:$0xff] }
0x1819   :  { %7446 = vmatpush1.bf16.msra.mxu0 %v11556_v50  ;;  %v5176_v50 = vld [vmem:[%s11434_s5 + $0xc0] sm:$0xff] }
0x181a   :  { %7448 = vmatprep.subr.bf16.mxu0 %v11557_v13  ;;  %v5180_v13 = vld [vmem:[%s11434_s5 + $0xe0] sm:$0xff] }
0x181d   :  { %7450 = vmatpush1.bf16.msra.mxu0 %v11558_v55  ;;  %v7509_v55 = vpack.c.bf16 %v5180_v13, %v5176_v50  ;;  %v5171_v50 = vld [vmem:[%s11434_s5 + $0x98] sm:$0xff] }
0x181e   :  { %7452 = vmatprep.subr.bf16.mxu0 %v11559_v32  ;;  %v5185_v32 = vld [vmem:[%s11434_s5 + $0x108] sm:$0xff]  ;;  %v5175_v13 = vld [vmem:[%s11434_s5 + $0xb8] sm:$0xff] }
0x1821   :  { %7454 = vmatpush1.bf16.msra.mxu0 %v11560_v44  ;;  %v5189_v44 = vld [vmem:[%s11434_s5 + $0x128] sm:$0xff] }
0x1822   :  { %7456 = vmatprep.subr.bf16.mxu0 %v11561_v42  ;;  %v7511_v42 = vpack.c.bf16 %v5189_v44, %v5185_v32  ;;  %v7535_v32 = vpack.c.bf16 %v5175_v13, %v5171_v50  ;;  %v5170_v44 = vld [vmem:[%s11434_s5 + $0x90] sm:$0xff]  ;;  %v5099_v50 = vld [vmem:[%s11433_s4 + $0x58] sm:$0xff] }
0x1823   :  { %v5103_v13 = vld [vmem:[%s11433_s4 + $0x78] sm:$0xff] }
0x1825   :  { %7458 = vmatpush1.bf16.msra.mxu0 %v11562_v15  ;;  %v5184_v15 = vld [vmem:[%s11434_s5 + $0x100] sm:$0xff] }
0x1826   :  { %7460 = vmatprep.subr.bf16.mxu0 %v11563_v39  ;;  %v5188_v39 = vld [vmem:[%s11434_s5 + $0x120] sm:$0xff] }
0x1829   :  { %7462 = vmatpush1.bf16.msra.mxu0 %v11564_v27  ;;  %v7513_v27 = vpack.c.bf16 %v5188_v39, %v5184_v15  ;;  %v5179_v15 = vld [vmem:[%s11434_s5 + $0xd8] sm:$0xff] }
0x182a   :  { %7464 = vmatprep.subr.bf16.mxu0 %v11565_v47  ;;  %v5193_v47 = vld [vmem:[%s11434_s5 + $0x148] sm:$0xff]  ;;  %v5183_v39 = vld [vmem:[%s11434_s5 + $0xf8] sm:$0xff] }
0x182d   :  { %7466 = vmatpush1.bf16.msra.mxu0 %v11566_v4  ;;  %v5197_v4 = vld [vmem:[%s11434_s5 + $0x168] sm:$0xff] }
0x182e   :  { %7468 = vmatprep.subr.bf16.mxu0 %v11567_v54  ;;  %v5192_v54 = vld [vmem:[%s11434_s5 + $0x140] sm:$0xff] }
0x1831   :  { %7470 = vmatpush1.bf16.msra.mxu0 %v11568_v40  ;;  %v7515_v40 = vpack.c.bf16 %v5197_v4, %v5193_v47  ;;  %v7539_v47 = vpack.c.bf16 %v5183_v39, %v5179_v15  ;;  %v5178_v4 = vld [vmem:[%s11434_s5 + $0xd0] sm:$0xff] }
0x1832   :  { %v5098_v15 = vld [vmem:[%s11433_s4 + $0x50] sm:$0xff] }
0x18c7   :  { %v4481_v43 = vpop.f32.mrb[30].mxu0 }
0x18c8   :  { %v4482_v22 = vadd.f32 %v10921_v48, %v4481_v43  ;;  %v6000_v2 = vpop.f32.mrb[31].mxu0  ;;  %v5196_v43 = vld [vmem:[%s11434_s5 + $0x160] sm:$0xff] }
0x18c9   :  { %v5205_v2 = vld [vmem:[%s11434_s5 + $0x1a8] sm:$0xff] }
0x18ca   :  { %5690 = vst [vmem:[%s11437_s8 + $0x8] sm:$0x3] %v4482_v22  ;;  %v4487_v57 = vsel %vm2222_vm1, %v4482_v22, -inf }
0x18cb   :  { %4488 = vmax.xlane.f32.xlu0 %v4487_v57  ;;  %v7517_v57 = vpack.c.bf16 %v5196_v43, %v5192_v54  ;;  %v5182_v54 = vld [vmem:[%s11434_s5 + $0xf0] sm:$0xff]  ;;  %v5191_v43 = vld [vmem:[%s11434_s5 + $0x138] sm:$0xff] }
0x1958   :  { %v4489_v30 = vpop.xlane.xlu0 %4488 }
0x1959   :  { %vm4490_vm14 = vcmp.eq.f32.partialorder %v4482_v22, %v4489_v30  ;;  %v5201_v22 = vld [vmem:[%s11434_s5 + $0x188] sm:$0xff] }
0x195a   :  { %v4491_v9 = vsel %vm4490_vm14, %v9340_v29, 128  ;;  %v7519_v30 = vpack.c.bf16 %v5205_v2, %v5201_v22  ;;  %v7541_v22 = vpack.c.bf16 %v5182_v54, %v5178_v4  ;;  %v5109_v4 = vld [vmem:[%s11433_s4 + $0xa8] sm:$0xff] }
0x195b   :  { %v4492_v62 = vsel %vm2222_vm1, %v4491_v9, 2147483647  ;;  %v5200_v9 = vld [vmem:[%s11434_s5 + $0x180] sm:$0xff] }
0x195c   :  { %v4494_v3 = vshra.s32 %v4492_v62, 16  ;;  %v4493_v33 = vand.u32 65535, %v4492_v62  ;;  %v5204_v62 = vld [vmem:[%s11434_s5 + $0x1a0] sm:$0xff] }
0x195e   :  { %v4496_v26 = vcvt.s32.f32 %v4494_v3  ;;  %v4495_v10 = vcvt.s32.f32 %v4493_v33  ;;  %v5209_v3 = vld [vmem:[%s11434_s5 + $0x1c8] sm:$0xff]  ;;  %v5155_v33 = vld [vmem:[%s11434_s5 + $0x18] sm:$0xff] }
0x1960   :  { %4497 = vmin.xlane.f32.xlu1 %v4496_v26 }
0x19ed   :  { %v4498_v34 = vpop.xlane.xlu1 %4497 }
0x19ee   :  { %vm4499_vm15 = vcmp.eq.f32.partialorder %v4496_v26, %v4498_v34  ;;  %v4504_v28 = vcvt.f32.s32 %v4498_v34  ;;  %v5213_v26 = vld [vmem:[%s11434_s5 + $0x1e8] sm:$0xff]  ;;  %v5159_v34 = vld [vmem:[%s11434_s5 + $0x38] sm:$0xff] }
0x19ef   :  { %v4500_v52 = vsel %vm4499_vm15, %v4495_v10, inf  ;;  %v7521_v10 = vpack.c.bf16 %v5204_v62, %v5200_v9  ;;  %v5195_v9 = vld [vmem:[%s11434_s5 + $0x158] sm:$0xff] }
0x19f0   :  { %4501 = vmin.xlane.f32.xlu0 %v4500_v52  ;;  %v4505_v61 = vshll.u32 %v4504_v28, 16  ;;  %v7527_v52 = vpack.c.bf16 %v5159_v34, %v5155_v33  ;;  %v7523_v28 = vpack.c.bf16 %v5213_v26, %v5209_v3  ;;  %v5199_v62 = vld [vmem:[%s11434_s5 + $0x178] sm:$0xff]  ;;  %v5194_v33 = vld [vmem:[%s11434_s5 + $0x150] sm:$0xff] }
0x19f1   :  { %v7547_v26 = vpack.c.bf16 %v5199_v62, %v5195_v9  ;;  %v5198_v34 = vld [vmem:[%s11434_s5 + $0x170] sm:$0xff] }
0x19f2   :  { %v5106_v9 = vld [vmem:[%s11433_s4 + $0x90] sm:$0xff] }
0x19f3   :  { %v5110_v62 = vld [vmem:[%s11433_s4 + $0xb0] sm:$0xff] }
0x1a7d   :  { %v4502_v6 = vpop.xlane.xlu0 %4501 }
0x1a7e   :  { %v4503_v46 = vcvt.f32.s32 %v4502_v6  ;;  %v5208_v6 = vld [vmem:[%s11434_s5 + $0x1c0] sm:$0xff] }
0x1a80   :  { %v4506_v24 = vadd.s32 %v4505_v61, %v4503_v46  ;;  %v5212_v61 = vld [vmem:[%s11434_s5 + $0x1e0] sm:$0xff] }
0x1a81   :  { %v7525_v46 = vpack.c.bf16 %v5212_v61, %v5208_v6  ;;  %v5202_v61 = vld [vmem:[%s11434_s5 + $0x190] sm:$0xff] }
0x1a82   :  { %vm4507_vm2 = vcmp.eq.s32.totalorder %v9340_v29, %v4506_v24 }
0x1a83   :  { %v5691_v11 = vsel %vm4507_vm2, 1.0, %v11493_v53 }
0x1a84   :  { %v4520_v35 = vmul.f32 %v5691_v11, %v4519_v14 }
0x1a86   :  { %v4521_v20 = vadd.f32 %v4520_v35, %v4517_v59 }
0x1a88   :  { %4857 = vmatmul.mubr.f32.vlgmr.msra.gmra.mrb[30].mxu1 %v4521_v20  ;;  %4928 = vmatmul.mubr.f32.vlgmr.msra.gmra.mrb[32].mxu0 %v4521_v20 }
0x1a89   :  { %7473 = vmatpush3.bf16.msra.mxu1 %v10790_v45  ;;  %6033 = vmatprep.mubr.msk.f32.mxu1 %vm7938_vm0, %v11493_v53  ;;  %v5153_v45 = vld [vmem:[%s11434_s5 + $0x8] sm:$0xff] }
0x1a8a   :  { %7474 = vmatprep.subr.bf16.mxu1 %v11494_v7  ;;  %5280 = vmatprep.mubr.f32.mxu0 %v11493_v53 }
0x1a8d   :  { %7476 = vmatpush3.bf16.msra.mxu1 %v10800_v17  ;;  %v5157_v17 = vld [vmem:[%s11434_s5 + $0x28] sm:$0xff] }
0x1a8e   :  { %7477 = vmatprep.subr.bf16.mxu1 %v11494_v7 }
0x1a91   :  { %7479 = vmatpush3.bf16.msra.mxu1 %v10810_v8  ;;  %v7495_v8 = vpack.c.bf16 %v5157_v17, %v5153_v45 }
0x1a92   :  { %7480 = vmatprep.subr.bf16.mxu1 %v11494_v7 }
0x1a93   :  { %7496 = vmatprep.subr.bf16.mxu0 %v7495_v8 }
0x1a95   :  { %7482 = vmatpush3.bf16.msra.mxu1 %v10820_v21  ;;  %v5152_v21 = vld [vmem:[%s11434_s5] sm:$0xff] }
0x1a96   :  { %7483 = vmatprep.subr.bf16.mxu1 %v11494_v7 }
0x1a99   :  { %7485 = vmatpush3.bf16.msra.mxu1 %v10830_v41  ;;  %v5156_v41 = vld [vmem:[%s11434_s5 + $0x20] sm:$0xff] }
0x1a9a   :  { %7486 = vmatprep.subr.bf16.mxu1 %v11494_v7 }
0x1a9d   :  { %7488 = vmatpush3.bf16.msra.mxu1 %v10840_v18  ;;  %v7497_v18 = vpack.c.bf16 %v5156_v41, %v5152_v21 }
0x1a9e   :  { %7489 = vmatprep.subr.bf16.mxu1 %v11494_v7 }
0x1a9f   :  { %7498 = vmatpush1.bf16.msra.mxu0 %v7497_v18 }
0x1aa1   :  { %7491 = vmatpush3.bf16.msra.mxu1 %v10849_v38  ;;  %v5161_v38 = vld [vmem:[%s11434_s5 + $0x48] sm:$0xff] }
0x1aa2   :  { %7492 = vmatprep.subr.bf16.mxu1 %v11494_v7 }
0x1aa5   :  { %7494 = vmatpush3.bf16.msra.mxu1 %v10859_v12  ;;  %v5165_v12 = vld [vmem:[%s11434_s5 + $0x68] sm:$0xff] }
0x1aa6   :  { %v7499_v19 = vpack.c.bf16 %v5165_v12, %v5161_v38  ;;  %7528 = vmatprep.subr.bf16.mxu1 %v7527_v52  ;;  %v5207_v52 = vld [vmem:[%s11434_s5 + $0x1b8] sm:$0xff] }
0x1aa8   :  { %7500 = vmatprep.subr.bf16.mxu0 %v7499_v19 }
0x1aa9   :  { %7502 = vmatpush1.bf16.msra.mxu0 %v7501_v23  ;;  %v5154_v23 = vld [vmem:[%s11434_s5 + $0x10] sm:$0xff] }
0x1aaa   :  { %7504 = vmatprep.subr.bf16.mxu0 %v7503_v58  ;;  %v7529_v0 = vpack.c.bf16 %v5158_v60, %v5154_v23  ;;  %v5095_v60 = vld [vmem:[%s11433_s4 + $0x38] sm:$0xff] }
0x1aad   :  { %7506 = vmatpush1.bf16.msra.mxu0 %v7505_v49 }
0x1aae   :  { %7508 = vmatprep.subr.bf16.mxu0 %v7507_v37  ;;  %v5166_v37 = vld [vmem:[%s11434_s5 + $0x70] sm:$0xff] }
0x1ab1   :  { %7510 = vmatpush1.bf16.msra.mxu0 %v7509_v55  ;;  %v7533_v55 = vpack.c.bf16 %v5166_v37, %v5162_v25  ;;  %v5101_v37 = vld [vmem:[%s11433_s4 + $0x68] sm:$0xff] }
0x1ab2   :  { %7512 = vmatprep.subr.bf16.mxu0 %v7511_v42  ;;  %v5174_v42 = vld [vmem:[%s11434_s5 + $0xb0] sm:$0xff] }
0x1ab5   :  { %7514 = vmatpush1.bf16.msra.mxu0 %v7513_v27  ;;  %v7537_v27 = vpack.c.bf16 %v5174_v42, %v5170_v44  ;;  %v5096_v44 = vld [vmem:[%s11433_s4 + $0x40] sm:$0xff] }
0x1ab6   :  { %7516 = vmatprep.subr.bf16.mxu0 %v7515_v40  ;;  %v5187_v40 = vld [vmem:[%s11434_s5 + $0x118] sm:$0xff]  ;;  %v5100_v42 = vld [vmem:[%s11433_s4 + $0x60] sm:$0xff] }
0x1ab7   :  { %v7543_v2 = vpack.c.bf16 %v5191_v43, %v5187_v40  ;;  %v7565_v39 = vpack.c.bf16 %v5100_v42, %v5096_v44  ;;  %v5107_v43 = vld [vmem:[%s11433_s4 + $0x98] sm:$0xff]  ;;  %v5137_v44 = vld [vmem:[%s11433_s4 + $0x188] sm:$0xff] }
0x1ab8   :  { %v5141_v42 = vld [vmem:[%s11433_s4 + $0x1a8] sm:$0xff] }
0x1ab9   :  { %7518 = vmatpush1.bf16.msra.mxu0 %v7517_v57  ;;  %v5186_v57 = vld [vmem:[%s11434_s5 + $0x110] sm:$0xff] }
0x1aba   :  { %7520 = vmatprep.subr.bf16.mxu0 %v7519_v30  ;;  %v5190_v30 = vld [vmem:[%s11434_s5 + $0x130] sm:$0xff] }
0x1abb   :  { %v7545_v3 = vpack.c.bf16 %v5190_v30, %v5186_v57  ;;  %v5108_v30 = vld [vmem:[%s11433_s4 + $0xa0] sm:$0xff] }
0x1abd   :  { %7522 = vmatpush1.bf16.msra.mxu0 %v7521_v10  ;;  %v5203_v10 = vld [vmem:[%s11434_s5 + $0x198] sm:$0xff] }
0x1abe   :  { %7524 = vmatprep.subr.bf16.mxu0 %v7523_v28  ;;  %v7549_v28 = vpack.c.bf16 %v5198_v34, %v5194_v33  ;;  %v7551_v6 = vpack.c.bf16 %v5207_v52, %v5203_v10  ;;  %v5117_v33 = vld [vmem:[%s11433_s4 + $0xe8] sm:$0xff]  ;;  %v5115_v34 = vld [vmem:[%s11433_s4 + $0xd8] sm:$0xff]  ;;  %v7601_v10 = vpack.c.bf16 %v5110_v62, %v5106_v9  ;;  %v5144_v62 = vld [vmem:[%s11433_s4 + $0x1c0] sm:$0xff] }
0x1abf   :  { %v5151_v9 = vld [vmem:[%s11433_s4 + $0x1f8] sm:$0xff] }
0x1ac1   :  { %7526 = vmatpush1.bf16.msra.mxu0 %v7525_v46  ;;  %v5206_v46 = vld [vmem:[%s11434_s5 + $0x1b0] sm:$0xff] }
0x1b5b   :  { %v4858_v31 = vpop.f32.mrb[30].mxu1  ;;  %v4929_v51 = vpop.f32.mrb[32].mxu0 }
0x1b5c   :  { %v5694_v24 = vmul.f32 -1.442695, %v4858_v31  ;;  %v4860_v14 = vpop.f32.mrb[31].mxu1  ;;  %v4931_v59 = vpop.f32.mrb[33].mxu0  ;;  %v5211_v31 = vld [vmem:[%s11434_s5 + $0x1d8] sm:$0xff] }
0x1b5d   :  { %v5695_v11 = vmul.f32 -1.442695, %v4860_v14  ;;  %v5696_v35 = vmul.f32 -1.442695, %v4931_v59  ;;  %v5210_v59 = vld [vmem:[%s11434_s5 + $0x1d0] sm:$0xff] }
0x1b5e   :  { %7888 = vpow2.f32 %v5694_v24  ;;  %v7553_v24 = vpack.c.bf16 %v5206_v46, %v5202_v61  ;;  %v5116_v61 = vld [vmem:[%s11433_s4 + $0xe0] sm:$0xff] }
0x1b5f   :  { %7890 = vpow2.f32 %v5695_v11  ;;  %v5214_v11 = vld [vmem:[%s11434_s5 + $0x1f0] sm:$0xff] }
0x1b60   :  { %7892 = vpow2.f32 %v5696_v35  ;;  %v7557_v35 = vpack.c.bf16 %v5214_v11, %v5210_v59  ;;  %v5123_v59 = vld [vmem:[%s11433_s4 + $0x118] sm:$0xff] }
0x1b61   :  { %7894 = vtanh.f32 %v4929_v51  ;;  %v5215_v51 = vld [vmem:[%s11434_s5 + $0x1f8] sm:$0xff] }
0x1b62   :  { %v7555_v14 = vpack.c.bf16 %v5215_v51, %v5211_v31  ;;  %v5114_v31 = vld [vmem:[%s11433_s4 + $0xd0] sm:$0xff]  ;;  %v5127_v11 = vld [vmem:[%s11433_s4 + $0x138] sm:$0xff] }
0x1b63   :  { %v5118_v51 = vld [vmem:[%s11433_s4 + $0xf0] sm:$0xff] }
0x1b68   :  { %v7889_v20 = vpop.eup %7888 }
0x1b69   :  { %v7891_v45 = vpop.eup %7890  ;;  %v4937_v17 = vadd.f32 1.0, %v7889_v20 }
0x1b6a   :  { %v4943_v8 = vadd.f32 1.0, %v7891_v45  ;;  %v7893_v21 = vpop.eup %7892 }
0x1b6b   :  { %7896 = vrcp.f32 %v4937_v17  ;;  %v7895_v41 = vpop.eup %7894  ;;  %v4950_v19 = vadd.f32 1.0, %v7893_v21 }
0x1b6c   :  { %7898 = vrcp.f32 %v4943_v8 }
0x1b6d   :  { %7900 = vrcp.f32 %v4950_v19  ;;  %v5093_v19 = vld [vmem:[%s11433_s4 + $0x28] sm:$0xff] }
0x1b75   :  { %v7897_v18 = vpop.eup %7896 }
0x1b76   :  { %v7899_v38 = vpop.eup %7898  ;;  %v4954_v12 = vmul.f32 %v7897_v18, %v7895_v41 }
0x1b77   :  { %v4953_v56 = vmul.f32 %v7899_v38, %v10865_v5  ;;  %v5167_v5 = vld [vmem:[%s11434_s5 + $0x78] sm:$0xff]  ;;  %v7901_v58 = vpop.eup %7900  ;;  %s5079_s5 = scvt.s32.f32 %s5078_s11 }
0x1b78   :  { %v7531_v1 = vpack.c.bf16 %v5167_v5, %v5163_v16  ;;  %v5088_v16 = vld [vmem:[%s11433_s4] sm:$0xff] }
0x1b79   :  { %v11056_v63 = vadd.f32 %v4954_v12, %v4953_v56  ;;  %v5091_v56 = vld [vmem:[%s11433_s4 + $0x18] sm:$0xff]  ;;  %v5092_v5 = vld [vmem:[%s11433_s4 + $0x20] sm:$0xff]  ;;  %s5084_s12 = ssub.f32 1.0, %s5079_s5 }
0x1b7b   :  { %7902 = vtanh.f32 %v11056_v63 }
0x1b85   :  { %v7903_v36 = vpop.eup %7902 }
0x1b86   :  { %v4957_v49 = vmul.f32 %v7903_v36, %v7901_v58  ;;  %v7591_v58 = vpack.c.bf16 %v5095_v60, %v5091_v56  ;;  %v7561_v36 = vpack.c.bf16 %v5092_v5, %v5088_v16  ;;  %v5131_v56 = vld [vmem:[%s11433_s4 + $0x158] sm:$0xff] }
0x1b88   :  { %6034 = vmatmul.mubr.f32.vlgmr.msra.gmra.mrb[32].mxu1 %v4957_v49  ;;  %5281 = vmatmul.mubr.f32.vlgmr.msra.gmra.mrb[34].mxu0 %v4957_v49 }
0x1b89   :  { %7530 = vmatpush1.bf16.msra.mxu1 %v7529_v0  ;;  %5351 = vmatprep.mubr.f32.mxu1 %v11493_v53  ;;  %v5090_v0 = vld [vmem:[%s11433_s4 + $0x10] sm:$0xff] }
0x1b8a   :  { %7532 = vmatprep.subr.bf16.mxu1 %v7531_v1  ;;  %5422 = vmatprep.mubr.f32.mxu0 %v11493_v53  ;;  %v5097_v1 = vld [vmem:[%s11433_s4 + $0x48] sm:$0xff] }
0x1b8d   :  { %7534 = vmatpush1.bf16.msra.mxu1 %v7533_v55  ;;  %v7563_v55 = vpack.c.bf16 %v5101_v37, %v5097_v1  ;;  %v5134_v1 = vld [vmem:[%s11433_s4 + $0x170] sm:$0xff] }
0x1b8e   :  { %7536 = vmatprep.subr.bf16.mxu1 %v7535_v32  ;;  %v7595_v32 = vpack.c.bf16 %v5103_v13, %v5099_v50 }
0x1b91   :  { %7538 = vmatpush1.bf16.msra.mxu1 %v7537_v27  ;;  %v5102_v27 = vld [vmem:[%s11433_s4 + $0x70] sm:$0xff] }
0x1b92   :  { %7540 = vmatprep.subr.bf16.mxu1 %v7539_v47  ;;  %v5105_v47 = vld [vmem:[%s11433_s4 + $0x88] sm:$0xff]  ;;  %v7597_v54 = vpack.c.bf16 %v5102_v27, %v5098_v15  ;;  %v5139_v15 = vld [vmem:[%s11433_s4 + $0x198] sm:$0xff]  ;;  %v5140_v27 = vld [vmem:[%s11433_s4 + $0x1a0] sm:$0xff] }
0x1b93   :  { %v7567_v40 = vpack.c.bf16 %v5109_v4, %v5105_v47 }
0x1b95   :  { %7542 = vmatpush1.bf16.msra.mxu1 %v7541_v22  ;;  %v5111_v22 = vld [vmem:[%s11433_s4 + $0xb8] sm:$0xff] }
0x1b96   :  { %7544 = vmatprep.subr.bf16.mxu1 %v7543_v2  ;;  %v5104_v2 = vld [vmem:[%s11433_s4 + $0x80] sm:$0xff]  ;;  %v7599_v57 = vpack.c.bf16 %v5111_v22, %v5107_v43  ;;  %v5145_v22 = vld [vmem:[%s11433_s4 + $0x1c8] sm:$0xff] }
0x1b99   :  { %7546 = vmatpush1.bf16.msra.mxu1 %v7545_v3  ;;  %v7569_v3 = vpack.c.bf16 %v5108_v30, %v5104_v2  ;;  %v5149_v2 = vld [vmem:[%s11433_s4 + $0x1e8] sm:$0xff] }
0x1b9a   :  { %7548 = vmatprep.subr.bf16.mxu1 %v7547_v26  ;;  %v5113_v26 = vld [vmem:[%s11433_s4 + $0xc8] sm:$0xff]  ;;  %v7587_v30 = vpack.c.bf16 %v5149_v2, %v5145_v22 }
0x1b9b   :  { %v7571_v52 = vpack.c.bf16 %v5117_v33, %v5113_v26 }
0x1b9d   :  { %7550 = vmatpush1.bf16.msra.mxu1 %v7549_v28  ;;  %v5119_v28 = vld [vmem:[%s11433_s4 + $0xf8] sm:$0xff] }
0x1b9e   :  { %7552 = vmatprep.subr.bf16.mxu1 %v7551_v6  ;;  %v5112_v6 = vld [vmem:[%s11433_s4 + $0xc0] sm:$0xff]  ;;  %v7603_v46 = vpack.c.bf16 %v5119_v28, %v5115_v34  ;;  %v5146_v34 = vld [vmem:[%s11433_s4 + $0x1d0] sm:$0xff] }
0x1ba1   :  { %7554 = vmatpush1.bf16.msra.mxu1 %v7553_v24  ;;  %v5121_v24 = vld [vmem:[%s11433_s4 + $0x108] sm:$0xff] }
0x1ba2   :  { %7556 = vmatprep.subr.bf16.mxu1 %v7555_v14  ;;  %v5125_v14 = vld [vmem:[%s11433_s4 + $0x128] sm:$0xff] }
0x1ba5   :  { %7558 = vmatpush1.bf16.msra.mxu1 %v7557_v35  ;;  %v7573_v35 = vpack.c.bf16 %v5116_v61, %v5112_v6 }
0x1ba6   :  { %7592 = vmatprep.subr.bf16.mxu1 %v7591_v58  ;;  %v5128_v58 = vld [vmem:[%s11433_s4 + $0x140] sm:$0xff] }
0x1ba8   :  { %5352 = vmatmul.mubr.f32.vlgmr.msra.gmra.mrb[34].mxu1 %v4957_v49  ;;  %v5094_v49 = vld [vmem:[%s11433_s4 + $0x30] sm:$0xff] }
0x1ba9   :  { %5493 = vmatprep.mubr.f32.mxu1 %v11493_v53  ;;  %v7593_v25 = vpack.c.bf16 %v5094_v49, %v5090_v0  ;;  %v5130_v49 = vld [vmem:[%s11433_s4 + $0x150] sm:$0xff] }
0x1baa   :  { %v7613_v37 = vpack.c.bf16 %v5134_v1, %v5130_v49  ;;  %v5537_v1 = vld [vmem:[%s11435_s6 + $0x68] sm:$0xff] }
0x1bab   :  { %7594 = vmatpush1.bf16.msra.mxu1 %v7593_v25 }
0x1bac   :  { %7596 = vmatprep.subr.bf16.mxu1 %v7595_v32 }
0x1baf   :  { %7598 = vmatpush1.bf16.msra.mxu1 %v7597_v54  ;;  %v5138_v54 = vld [vmem:[%s11433_s4 + $0x190] sm:$0xff] }
0x1bb0   :  { %7600 = vmatprep.subr.bf16.mxu1 %v7599_v57  ;;  %v5147_v57 = vld [vmem:[%s11433_s4 + $0x1d8] sm:$0xff] }
0x1bb1   :  { %v7619_v26 = vpack.c.bf16 %v5151_v9, %v5147_v57 }
0x1bb3   :  { %7602 = vmatpush1.bf16.msra.mxu1 %v7601_v10  ;;  %v5150_v10 = vld [vmem:[%s11433_s4 + $0x1f0] sm:$0xff] }
0x1bb4   :  { %7604 = vmatprep.subr.bf16.mxu1 %v7603_v46 }
0x1c5b   :  { %v5047_v20 = vpop.f32.mrb[32].mxu1 }
0x1c5c   :  { %v5048_v45 = vadd.f32 %v10921_v48, %v5047_v20  ;;  %v6035_v17 = vpop.f32.mrb[33].mxu1  ;;  %v5089_v48 = vld [vmem:[%s11433_s4 + $0x8] sm:$0xff]  ;;  %v7605_v20 = vpack.c.bf16 %v5118_v51, %v5114_v31  ;;  %v5082_v51 = vstv %s5079_s5 }
0x1c5d   :  { %v7559_v23 = vpack.c.bf16 %v5093_v19, %v5089_v48  ;;  %v5120_v17 = vld [vmem:[%s11433_s4 + $0x100] sm:$0xff]  ;;  %v5129_v48 = vld [vmem:[%s11433_s4 + $0x148] sm:$0xff] }
0x1c5e   :  { %5698 = vst [vmem:[%s11437_s8 + $0xa] sm:$0x3] %v5048_v45  ;;  %v5053_v8 = vsel %vm2222_vm1, %v5048_v45, -inf  ;;  %v5133_v19 = vld [vmem:[%s11433_s4 + $0x168] sm:$0xff]  ;;  %7606 = vmatpush1.bf16.msra.mxu1 %v7605_v20 }
0x1c5f   :  { %5054 = vmax.xlane.f32.xlu1 %v5053_v8  ;;  %7560 = vmatprep.subr.bf16.mxu0 %v7559_v23  ;;  %v5124_v8 = vld [vmem:[%s11433_s4 + $0x120] sm:$0xff]  ;;  %v5135_v23 = vld [vmem:[%s11433_s4 + $0x178] sm:$0xff]  ;;  %v7579_v5 = vpack.c.bf16 %v5133_v19, %v5129_v48  ;;  %v5701_v31 = vld [vmem:[%s11431_s2 + $0xc] sm:$0x3] }
0x1c60   :  { %7562 = vmatpush1.bf16.msra.mxu0 %v7561_v36  ;;  %v7577_v60 = vpack.c.bf16 %v5124_v8, %v5120_v17  ;;  %v5132_v36 = vld [vmem:[%s11433_s4 + $0x160] sm:$0xff]  ;;  %v7611_v0 = vpack.c.bf16 %v5135_v23, %v5131_v56  ;;  %v5525_v17 = vld [vmem:[%s11435_s6 + $0x8] sm:$0xff]  ;;  %v5530_v19 = vld [vmem:[%s11435_s6 + $0x30] sm:$0xff] }
0x1c61   :  { %7564 = vmatprep.subr.bf16.mxu0 %v7563_v55  ;;  %v7581_v25 = vpack.c.bf16 %v5132_v36, %v5128_v58  ;;  %v5531_v56 = vld [vmem:[%s11435_s6 + $0x38] sm:$0xff]  ;;  %v5534_v58 = vld [vmem:[%s11435_s6 + $0x50] sm:$0xff] }
0x1c62   :  { %v7633_v23 = vpack.c.bf16 %v5531_v56, %v5530_v19  ;;  %v5535_v36 = vld [vmem:[%s11435_s6 + $0x58] sm:$0xff] }
0x1c63   :  { %v7639_v49 = vpack.c.bf16 %v5535_v36, %v5534_v58 }
0x1c64   :  { %7566 = vmatpush1.bf16.msra.mxu0 %v7565_v39  ;;  %v7583_v39 = vpack.c.bf16 %v5141_v42, %v5137_v44 }
0x1c65   :  { %7568 = vmatprep.subr.bf16.mxu0 %v7567_v40  ;;  %v5142_v40 = vld [vmem:[%s11433_s4 + $0x1b0] sm:$0xff] }
0x1c66   :  { %v7617_v43 = vpack.c.bf16 %v5142_v40, %v5138_v54 }
0x1c68   :  { %7570 = vmatpush1.bf16.msra.mxu0 %v7569_v3  ;;  %v5148_v3 = vld [vmem:[%s11433_s4 + $0x1e0] sm:$0xff] }
0x1c69   :  { %7572 = vmatprep.subr.bf16.mxu0 %v7571_v52  ;;  %v7589_v33 = vpack.c.bf16 %v5148_v3, %v5144_v62  ;;  %v7621_v52 = vpack.c.bf16 %v5150_v10, %v5146_v34 }
0x1c6c   :  { %7574 = vmatpush1.bf16.msra.mxu0 %v7573_v35 }
0x1cec   :  { %v5055_v21 = vpop.xlane.xlu1 %5054 }
0x1ced   :  { %vm5056_vm3 = vcmp.eq.f32.partialorder %v5048_v45, %v5055_v21  ;;  %v7575_v45 = vpack.c.bf16 %v5125_v14, %v5121_v24  ;;  %v5122_v21 = vld [vmem:[%s11433_s4 + $0x110] sm:$0xff]  ;;  %v5085_v14 = vstv %s5084_s12 }
0x1cee   :  { %v5057_v41 = vsel %vm5056_vm3, %v9340_v29, 128 }
0x1cef   :  { %v11159_v18 = vsel %vm2222_vm1, %v5057_v41, 2147483647  ;;  %v7607_v41 = vpack.c.bf16 %v5127_v11, %v5123_v59  ;;  %7576 = vmatprep.subr.bf16.mxu0 %v7575_v45  ;;  %v5083_v59 = vmul.f32 %v5701_v31, %v5082_v51  ;;  %v5524_v45 = vld [vmem:[%s11435_s6] sm:$0xff] }
0x1cf0   :  { %v5060_v38 = vshra.s32 %v11159_v18, 16  ;;  %7578 = vmatpush1.bf16.msra.mxu0 %v7577_v60  ;;  %v5059_v50 = vand.u32 65535, %v11159_v18  ;;  %v5143_v18 = vld [vmem:[%s11433_s4 + $0x1b8] sm:$0xff]  ;;  %v7624_v8 = vpack.c.bf16 %v5525_v17, %v5524_v45  ;;  %v5532_v60 = vld [vmem:[%s11435_s6 + $0x40] sm:$0xff] }
0x1cf1   :  { %7608 = vmatprep.subr.bf16.mxu1 %v7607_v41  ;;  %7580 = vmatprep.subr.bf16.mxu0 %v7579_v5  ;;  %v7615_v47 = vpack.c.bf16 %v5143_v18, %v5139_v15  ;;  %v5528_v41 = vld [vmem:[%s11435_s6 + $0x20] sm:$0xff] }
0x1cf2   :  { %v11162_v12 = vcvt.s32.f32 %v5060_v38  ;;  %v5126_v38 = vld [vmem:[%s11433_s4 + $0x130] sm:$0xff]  ;;  %v5061_v55 = vcvt.s32.f32 %v5059_v50  ;;  %v5539_v50 = vld [vmem:[%s11435_s6 + $0x78] sm:$0xff] }
0x1cf3   :  { %v7609_v16 = vpack.c.bf16 %v5126_v38, %v5122_v21  ;;  %v5529_v38 = vld [vmem:[%s11435_s6 + $0x28] sm:$0xff] }
0x1cf4   :  { %5063 = vmin.xlane.f32.xlu0 %v11162_v12  ;;  %7582 = vmatpush1.bf16.msra.mxu0 %v7581_v25  ;;  %v7630_v48 = vpack.c.bf16 %v5529_v38, %v5528_v41 }
0x1cf5   :  { %7610 = vmatpush1.bf16.msra.mxu1 %v7609_v16  ;;  %7584 = vmatprep.subr.bf16.mxu0 %v7583_v39  ;;  %v5533_v16 = vld [vmem:[%s11435_s6 + $0x48] sm:$0xff] }
0x1cf6   :  { %7612 = vmatprep.subr.bf16.mxu1 %v7611_v0  ;;  %v7636_v5 = vpack.c.bf16 %v5533_v16, %v5532_v60  ;;  %v5536_v0 = vld [vmem:[%s11435_s6 + $0x60] sm:$0xff] }
0x1cf7   :  { %v7642_v25 = vpack.c.bf16 %v5537_v1, %v5536_v0 }
0x1cf9   :  { %7614 = vmatpush1.bf16.msra.mxu1 %v7613_v37  ;;  %v5538_v37 = vld [vmem:[%s11435_s6 + $0x70] sm:$0xff] }
0x1cfa   :  { %7616 = vmatprep.subr.bf16.mxu1 %v7615_v47 }
0x1cfd   :  { %7618 = vmatpush1.bf16.msra.mxu1 %v7617_v43 }
0x1cfe   :  { %7620 = vmatprep.subr.bf16.mxu1 %v7619_v26  ;;  %v5705_v26 = vld [vmem:[%s11436_s7] ss:$0 sm:$0xff] }
0x1d01   :  { %7622 = vmatpush1.bf16.msra.mxu1 %v7621_v52 }
0x1d81   :  { %v5064_v13 = vpop.xlane.xlu0 %5063 }
0x1d82   :  { %vm5065_vm1 = vcmp.eq.f32.partialorder %v11162_v12, %v5064_v13  ;;  %v5136_v12 = vld [vmem:[%s11433_s4 + $0x180] sm:$0xff]  ;;  %v5070_v28 = vcvt.f32.s32 %v5064_v13  ;;  %v7645_v13 = vpack.c.bf16 %v5539_v50, %v5538_v37 }
0x1d83   :  { %v5066_v32 = vsel %vm5065_vm1, %v5061_v55, inf  ;;  %v7585_v4 = vpack.c.bf16 %v5140_v27, %v5136_v12 }
0x1d84   :  { %5067 = vmin.xlane.f32.xlu1 %v5066_v32  ;;  %v5071_v61 = vshll.u32 %v5070_v28, 16 }
0x1d85   :  { %7586 = vmatpush1.bf16.msra.mxu0 %v7585_v4 }
0x1d86   :  { %7588 = vmatprep.subr.bf16.mxu0 %v7587_v30 }
0x1d89   :  { %7590 = vmatpush1.bf16.msra.mxu0 %v7589_v33 }
0x1d8a   :  { %7623 = vmatprep.subr.bf16.mxu0 %v11494_v7 }
0x1e11   :  { %v5068_v6 = vpop.xlane.xlu1 %5067 }
0x1e12   :  { %v5069_v46 = vcvt.f32.s32 %v5068_v6 }
0x1e14   :  { %v5072_v24 = vadd.s32 %v5071_v61, %v5069_v46 }
0x1e16   :  { %vm5073_vm4 = vcmp.eq.s32.totalorder %v9340_v29, %v5072_v24  ;;  %v5526_v29 = vld [vmem:[%s11435_s6 + $0x10] sm:$0xff] }
0x1e17   :  { %v5699_v11 = vsel %vm5073_vm4, 1.0, %v11493_v53 }
0x1e18   :  { %v5086_v35 = vmul.f32 %v5699_v11, %v5085_v14 }
0x1e1a   :  { %v5087_v20 = vadd.f32 %v5086_v35, %v5083_v59 }
0x1e1c   :  { %5423 = vmatmul.mubr.f32.vlgmr.msra.gmra.mrb[34].mxu0 %v5087_v20  ;;  %5494 = vmatmul.mubr.f32.vlgmr.msra.gmra.mrb[34].mxu1 %v5087_v20 }
0x1e1d   :  { %6068 = vmatprep.mubr.msk.f32.mxu0 %vm7938_vm0, %v11493_v53  ;;  %7625 = vmatpush3.bf16.msra.mxu0 %v7624_v8  ;;  %v5527_v53 = vld [vmem:[%s11435_s6 + $0x18] sm:$0xff] }
0x1e1e   :  { %7626 = vmatprep.subr.bf16.mxu0 %v11494_v7  ;;  %v7627_v21 = vpack.c.bf16 %v5527_v53, %v5526_v29 }
0x1e21   :  { %7628 = vmatpush3.bf16.msra.mxu0 %v7627_v21 }
0x1e22   :  { %7629 = vmatprep.subr.bf16.mxu0 %v11494_v7 }
0x1e25   :  { %7631 = vmatpush3.bf16.msra.mxu0 %v7630_v48 }
0x1e26   :  { %7632 = vmatprep.subr.bf16.mxu0 %v11494_v7 }
0x1e29   :  { %7634 = vmatpush3.bf16.msra.mxu0 %v7633_v23 }
0x1e2a   :  { %7635 = vmatprep.subr.bf16.mxu0 %v11494_v7 }
0x1e2d   :  { %7637 = vmatpush3.bf16.msra.mxu0 %v7636_v5 }
0x1e2e   :  { %7638 = vmatprep.subr.bf16.mxu0 %v11494_v7 }
0x1e31   :  { %7640 = vmatpush3.bf16.msra.mxu0 %v7639_v49 }
0x1e32   :  { %7641 = vmatprep.subr.bf16.mxu0 %v11494_v7 }
0x1e35   :  { %7643 = vmatpush3.bf16.msra.mxu0 %v7642_v25 }
0x1e36   :  { %7644 = vmatprep.subr.bf16.mxu0 %v11494_v7 }
0x1e39   :  { %7646 = vmatpush3.bf16.msra.mxu0 %v7645_v13 }
0x1eef   :  { %v5424_v55 = vpop.f32.mrb[34].mxu0  ;;  %v5495_v32 = vpop.f32.mrb[34].mxu1 }
0x1ef0   :  { %v5702_v44 = vmul.f32 -1.442695, %v5424_v55  ;;  %v5426_v42 = vpop.f32.mrb[35].mxu0  ;;  %v5497_v15 = vpop.f32.mrb[35].mxu1 }
0x1ef1   :  { %v5703_v39 = vmul.f32 -1.442695, %v5426_v42  ;;  %v5704_v18 = vmul.f32 -1.442695, %v5497_v15 }
0x1ef2   :  { %7904 = vpow2.f32 %v5702_v44 }
0x1ef3   :  { %7906 = vpow2.f32 %v5703_v39 }
0x1ef4   :  { %7908 = vpow2.f32 %v5704_v18 }
0x1ef5   :  { %7910 = vtanh.f32 %v5495_v32 }
0x1efc   :  { %v7905_v12 = vpop.eup %7904 }
0x1efd   :  { %v7907_v27 = vpop.eup %7906  ;;  %v5503_v47 = vadd.f32 1.0, %v7905_v12 }
0x1efe   :  { %v5509_v4 = vadd.f32 1.0, %v7907_v27  ;;  %v7909_v54 = vpop.eup %7908 }
0x1eff   :  { %7912 = vrcp.f32 %v5503_v47  ;;  %v7911_v7 = vpop.eup %7910  ;;  %v5516_v2 = vadd.f32 1.0, %v7909_v54 }
0x1f00   :  { %7914 = vrcp.f32 %v5509_v4 }
0x1f01   :  { %7916 = vrcp.f32 %v5516_v2 }
0x1f09   :  { %v7913_v40 = vpop.eup %7912 }
0x1f0a   :  { %v7915_v43 = vpop.eup %7914  ;;  %v5520_v22 = vmul.f32 %v7913_v40, %v7911_v7 }
0x1f0b   :  { %v5519_v57 = vmul.f32 %v7915_v43, %v11056_v63  ;;  %v7917_v9 = vpop.eup %7916 }
0x1f0d   :  { %v5521_v30 = vadd.f32 %v5520_v22, %v5519_v57 }
0x1f0f   :  { %7918 = vtanh.f32 %v5521_v30 }
0x1f19   :  { %v7919_v62 = vpop.eup %7918 }
0x1f1a   :  { %v5523_v3 = vmul.f32 %v7919_v62, %v7917_v9 }
0x1f1c   :  { %6069 = vmatmul.mubr.f32.vlgmr.msra.gmra.mrb[36].mxu0 %v5523_v3 }
0x1fef   :  { %v5613_v33 = vpop.f32.mrb[36].mxu0 }
0x1ff0   :  { %v5614_v34 = vadd.f32 %v5705_v26, %v5613_v33  ;;  %v6070_v10 = vpop.f32.mrb[37].mxu0 }
0x1ff2   :  { %5706 = vst [vmem:[%s11437_s8 + $0xc] sm:$0x3] %v5614_v34 }
0x1ff3   :  { %5623 = vsyncpa [#allocation3], 1 }

</bundles_post_ra>
